<compile_context>
chip_gen: v6e
topology: v6e:2x2x1
jax: 0.10.0
libtpu: 0.0.40
codegen_flags: <defaults>
</compile_context>

<pallas_src>
import functools
import math

import jax
import jax.numpy as jnp
from jax.experimental import pallas as pl
from jax.experimental.pallas import tpu as pltpu


PARAM_ORDER = (
    "w_ada", "b_ada",
    "wq", "bq", "wk", "bk", "wv", "bv", "wo", "bo",
    "w_n2",
    "cwq", "cbq", "cwk", "cbk", "cwv", "cbv", "cwo", "cbo",
    "wqn", "wkn",
    "w_m1", "b_m1", "w_m2", "b_m2",
)


# ---------------------------------------------------------------------------
# In-kernel math helpers (traced inside the Pallas kernel)
# ---------------------------------------------------------------------------
def _silu(x):
    return x * jax.nn.sigmoid(x)


def _layernorm(x, eps):
    mu = jnp.mean(x, axis=-1, keepdims=True)
    xc = x - mu
    var = jnp.mean(xc * xc, axis=-1, keepdims=True)
    return xc * jax.lax.rsqrt(var + eps)


def _rmsnorm(x, w, eps):
    ms = jnp.mean(x * x, axis=-1, keepdims=True)
    return x * jax.lax.rsqrt(ms + eps) * w


def _gelu_tanh(x):
    c = math.sqrt(2.0 / math.pi)
    return 0.5 * x * (1.0 + jnp.tanh(c * (x + 0.044715 * x * x * x)))


def _softmax_lastdim(s):
    m = jnp.max(s, axis=-1, keepdims=True)
    p = jnp.exp(s - m)
    return p / jnp.sum(p, axis=-1, keepdims=True)


# ---------------------------------------------------------------------------
# Kernel: one grid step == one batch element, everything fused.
# ---------------------------------------------------------------------------
def ac_dit_block_kernel(
    x_ref, c_ref, g_ref,
    w_ada_ref, b_ada_ref,
    wq_ref, bq_ref, wk_ref, bk_ref, wv_ref, bv_ref, wo_ref, bo_ref,
    w_n2_ref,
    cwq_ref, cbq_ref, cwk_ref, cbk_ref, cwv_ref, cbv_ref, cwo_ref, cbo_ref,
    wqn_ref, wkn_ref,
    w_m1_ref, b_m1_ref, w_m2_ref, b_m2_ref,
    out_ref,
    *, num_heads, head_dim, hidden, eps,
):
    H = hidden
    nh = num_heads
    hd = head_dim
    scale = 1.0 / math.sqrt(hd)

    x = x_ref[0]          # (N, H)
    c = c_ref[0]          # (1, H)
    g = g_ref[0]          # (L, H)
    n_rows = x.shape[0]

    # ---- adaLN modulation: SiLU(c) @ W + b, chunked into 7 lane-aligned parts
    ada = jnp.dot(_silu(c), w_ada_ref[...],
                  preferred_element_type=jnp.float32) + b_ada_ref[...]   # (1, 7H)
    shift_msa = ada[:, 0 * H:1 * H]
    scale_msa = ada[:, 1 * H:2 * H]
    gate_msa = ada[:, 2 * H:3 * H]
    gate_cross = ada[:, 3 * H:4 * H]
    shift_mlp = ada[:, 4 * H:5 * H]
    scale_mlp = ada[:, 5 * H:6 * H]
    gate_mlp = ada[:, 6 * H:7 * H]

    # ---- self-attention branch: x += gate_msa * Attn(modulate(LN(x)))
    xm = _layernorm(x, eps) * (1.0 + scale_msa) + shift_msa              # (N, H)
    acc = jnp.zeros((n_rows, H), jnp.float32)
    for h in range(nh):                    # static unroll over heads (no concat)
        q_h = jnp.dot(xm, wq_ref[h], preferred_element_type=jnp.float32) + bq_ref[h]
        k_h = jnp.dot(xm, wk_ref[h], preferred_element_type=jnp.float32) + bk_ref[h]
        v_h = jnp.dot(xm, wv_ref[h], preferred_element_type=jnp.float32) + bv_ref[h]
        s = jax.lax.dot_general(q_h, k_h, (((1,), (1,)), ((), ())),
                                preferred_element_type=jnp.float32) * scale
        p = _softmax_lastdim(s)
        o_h = jnp.dot(p, v_h, preferred_element_type=jnp.float32)
        acc = acc + jnp.dot(o_h, wo_ref[h], preferred_element_type=jnp.float32)
    x = x + gate_msa * (acc + bo_ref[...])

    # ---- cross-attention branch: x += gate_cross * CrossAttn(RMSNorm(x), g)
    xn2 = _rmsnorm(x, w_n2_ref[...], eps)                                # (N, H)
    acc = jnp.zeros((n_rows, H), jnp.float32)
    for h in range(nh):
        q_h = jnp.dot(xn2, cwq_ref[h], preferred_element_type=jnp.float32) + cbq_ref[h]
        k_h = jnp.dot(g, cwk_ref[h], preferred_element_type=jnp.float32) + cbk_ref[h]
        v_h = jnp.dot(g, cwv_ref[h], preferred_element_type=jnp.float32) + cbv_ref[h]
        q_h = _rmsnorm(q_h, wqn_ref[...], eps)   # per-head q/k RMSNorm (qk_norm=True)
        k_h = _rmsnorm(k_h, wkn_ref[...], eps)
        s = jax.lax.dot_general(q_h, k_h, (((1,), (1,)), ((), ())),
                                preferred_element_type=jnp.float32) * scale
        p = _softmax_lastdim(s)
        o_h = jnp.dot(p, v_h, preferred_element_type=jnp.float32)
        acc = acc + jnp.dot(o_h, cwo_ref[h], preferred_element_type=jnp.float32)
    x = x + gate_cross * (acc + cbo_ref[...])

    # ---- MLP branch: x += gate_mlp * MLP(modulate(LN(x)))
    xm3 = _layernorm(x, eps) * (1.0 + scale_mlp) + shift_mlp
    h1 = jnp.dot(xm3, w_m1_ref[...], preferred_element_type=jnp.float32) + b_m1_ref[...]
    h1 = _gelu_tanh(h1)
    mlp_out = jnp.dot(h1, w_m2_ref[...], preferred_element_type=jnp.float32) + b_m2_ref[...]
    x = x + gate_mlp * mlp_out

    out_ref[0] = x


# ---------------------------------------------------------------------------
# Wrapper
# ---------------------------------------------------------------------------
def ac_dit_block(x, c, g, params, *, num_heads, eps=1e-6):
    """x: (B, N, H), c: (B, H), g: (B, L, H). Returns (B, N, H) f32."""
    B, N, H = x.shape
    L = g.shape[1]
    hd = H // num_heads
    mlp_hidden = params["w_m1"].shape[1]

    x = x.astype(jnp.float32)
    g = g.astype(jnp.float32)
    c3 = c.astype(jnp.float32).reshape(B, 1, H)
    weights = [params[k].astype(jnp.float32) for k in PARAM_ORDER]

    kernel = functools.partial(
        ac_dit_block_kernel,
        num_heads=num_heads, head_dim=hd, hidden=H, eps=eps)

    def batch_spec(shape):
        tail = (0,) * (len(shape) - 1)

        def imap(b):
            return (b,) + tail

        return pl.BlockSpec((1,) + tuple(shape[1:]), imap)

    def resident_spec(a):
        zeros = (0,) * a.ndim

        def imap(b):
            return zeros

        return pl.BlockSpec(a.shape, imap)

    # Advisory cost estimate so XLA can schedule/overlap the custom call.
    flops = B * (
        2 * H * 7 * H
        + num_heads * (6 * N * H * hd + 4 * N * N * hd + 2 * N * hd * H)
        + num_heads * (2 * N * H * hd + 4 * L * H * hd + 4 * N * L * hd + 2 * N * hd * H)
        + 4 * N * H * mlp_hidden)
    transcendentals = B * (H + num_heads * N * (N + L) + N * mlp_hidden + 8 * N)
    bytes_accessed = (
        (x.size + c3.size + g.size) * 4
        + sum(int(w.size) * 4 for w in weights)
        + B * N * H * 4)

    return pl.pallas_call(
        kernel,
        out_shape=jax.ShapeDtypeStruct((B, N, H), jnp.float32),
        grid_spec=pltpu.PrefetchScalarGridSpec(
            num_scalar_prefetch=0,
            grid=(B,),
            in_specs=[batch_spec(x.shape), batch_spec(c3.shape), batch_spec(g.shape)]
                     + [resident_spec(w) for w in weights],
            out_specs=batch_spec((B, N, H)),
        ),
        compiler_params=pltpu.CompilerParams(dimension_semantics=("parallel",)),
        cost_estimate=pl.CostEstimate(
            flops=flops, transcendentals=transcendentals,
            bytes_accessed=bytes_accessed),
    )(x, c3, g, *weights)


# ---------------------------------------------------------------------------
# Deterministic synthetic parameters (per-head split layout, row-major x @ W)
# ---------------------------------------------------------------------------
def make_params(key, hidden, num_heads, mlp_hidden):
    hd = hidden // num_heads
    keys = jax.random.split(key, 32)
    it = iter(keys)

    def nrm(shape, scale=0.02):
        return jax.random.normal(next(it), shape, jnp.float32) * scale

    return dict(
        # adaLN: hidden -> 7*hidden
        w_ada=nrm((hidden, 7 * hidden)), b_ada=nrm((1, 7 * hidden)),
        # self-attention (weights split per head to avoid in-kernel concat)
        wq=nrm((num_heads, hidden, hd)), bq=nrm((num_heads, 1, hd)),
        wk=nrm((num_heads, hidden, hd)), bk=nrm((num_heads, 1, hd)),
        wv=nrm((num_heads, hidden, hd)), bv=nrm((num_heads, 1, hd)),
        wo=nrm((num_heads, hd, hidden)), bo=nrm((1, hidden)),
        # norm2 (RmsNorm, affine)
        w_n2=1.0 + nrm((1, hidden)),
        # cross-attention
        cwq=nrm((num_heads, hidden, hd)), cbq=nrm((num_heads, 1, hd)),
        cwk=nrm((num_heads, hidden, hd)), cbk=nrm((num_heads, 1, hd)),
        cwv=nrm((num_heads, hidden, hd)), cbv=nrm((num_heads, 1, hd)),
        cwo=nrm((num_heads, hd, hidden)), cbo=nrm((1, hidden)),
        # per-head q/k RMSNorm weights (cross_qk_norm=True)
        wqn=1.0 + nrm((1, hd)), wkn=1.0 + nrm((1, hd)),
        # MLP
        w_m1=nrm((hidden, mlp_hidden)), b_m1=nrm((1, mlp_hidden)),
        w_m2=nrm((mlp_hidden, hidden)), b_m2=nrm((1, hidden)),
    )


# ---------------------------------------------------------------------------
# Pure-JAX reference mirroring the PyTorch forward (eval mode, mask=None)
# ---------------------------------------------------------------------------
def reference(x, c, g, p, *, num_heads, eps=1e-6):
    B, N, H = x.shape
    hd = H // num_heads
    scale = 1.0 / math.sqrt(hd)

    def silu(z):
        return z * jax.nn.sigmoid(z)

    def layernorm(z):
        mu = z.mean(-1, keepdims=True)
        var = ((z - mu) ** 2).mean(-1, keepdims=True)
        return (z - mu) * jax.lax.rsqrt(var + eps)

    def rmsnorm(z, w):
        return z * jax.lax.rsqrt((z * z).mean(-1, keepdims=True) + eps) * w

    def gelu_tanh(z):
        k = math.sqrt(2.0 / math.pi)
        return 0.5 * z * (1.0 + jnp.tanh(k * (z + 0.044715 * z ** 3)))

    ada = silu(c) @ p["w_ada"] + p["b_ada"][0]
    (shift_msa, scale_msa, gate_msa, gate_cross,
     shift_mlp, scale_mlp, gate_mlp) = jnp.split(ada, 7, axis=1)

    # self-attention
    xm = layernorm(x) * (1.0 + scale_msa[:, None, :]) + shift_msa[:, None, :]
    q = jnp.einsum("bnd,hdk->bhnk", xm, p["wq"]) + p["bq"][None]
    k = jnp.einsum("bnd,hdk->bhnk", xm, p["wk"]) + p["bk"][None]
    v = jnp.einsum("bnd,hdk->bhnk", xm, p["wv"]) + p["bv"][None]
    s = jnp.einsum("bhqk,bhmk->bhqm", q, k) * scale
    pr = jax.nn.softmax(s, axis=-1)
    o = jnp.einsum("bhqm,bhmk->bhqk", pr, v)
    attn = jnp.einsum("bhnk,hkd->bnd", o, p["wo"]) + p["bo"][0]
    x = x + gate_msa[:, None, :] * attn

    # cross-attention
    xn2 = rmsnorm(x, p["w_n2"][0])
    q = jnp.einsum("bnd,hdk->bhnk", xn2, p["cwq"]) + p["cbq"][None]
    k = jnp.einsum("bld,hdk->bhlk", g, p["cwk"]) + p["cbk"][None]
    v = jnp.einsum("bld,hdk->bhlk", g, p["cwv"]) + p["cbv"][None]
    q = rmsnorm(q, p["wqn"][0])
    k = rmsnorm(k, p["wkn"][0])
    s = jnp.einsum("bhqk,bhmk->bhqm", q, k) * scale
    pr = jax.nn.softmax(s, axis=-1)
    o = jnp.einsum("bhqm,bhmk->bhqk", pr, v)
    cattn = jnp.einsum("bhnk,hkd->bnd", o, p["cwo"]) + p["cbo"][0]
    x = x + gate_cross[:, None, :] * cattn

    # MLP
    xm3 = layernorm(x) * (1.0 + scale_mlp[:, None, :]) + shift_mlp[:, None, :]
    h1 = gelu_tanh(xm3 @ p["w_m1"] + p["b_m1"][0])
    x = x + gate_mlp[:, None, :] * (h1 @ p["w_m2"] + p["b_m2"][0])
    return x


if __name__ == "__main__":
    B, N, L = 2, 8, 16          # batch, seq len of x, seq len of condition g
    HIDDEN, NUM_HEADS = 128, 4  # hidden=128 keeps every store lane-dense
    MLP_HIDDEN = int(HIDDEN * 4.0)

    key = jax.random.PRNGKey(0)
    kx, kc, kg, kp = jax.random.split(key, 4)
    x = jax.random.normal(kx, (B, N, HIDDEN), jnp.float32)
    c = jax.random.normal(kc, (B, HIDDEN), jnp.float32)
    g = jax.random.normal(kg, (B, L, HIDDEN), jnp.float32)
    params = make_params(kp, HIDDEN, NUM_HEADS, MLP_HIDDEN)

    out = ac_dit_block(x, c, g, params, num_heads=NUM_HEADS)
    out = jax.block_until_ready(out)

    ref = reference(x, c, g, params, num_heads=NUM_HEADS)
    assert out.shape == (B, N, HIDDEN)
    max_err = float(jnp.max(jnp.abs(out - ref)))
    assert jnp.allclose(out, ref, atol=2e-3, rtol=2e-3), (
        f"mismatch vs reference, max abs err {max_err}")

    print("KERNEL_OK")
</pallas_src>

<mosaic_0001>
module attributes {stable_mosaic.version = 11 : i64} {
  func.func @ac_dit_block_kernel(%arg0: i32, %arg1: memref<1x8x128xf32, #tpu.memory_space<vmem>>, %arg2: memref<1x1x128xf32, #tpu.memory_space<vmem>>, %arg3: memref<1x16x128xf32, #tpu.memory_space<vmem>>, %arg4: memref<128x896xf32, #tpu.memory_space<vmem>>, %arg5: memref<1x896xf32, #tpu.memory_space<vmem>>, %arg6: memref<4x128x32xf32, #tpu.memory_space<vmem>>, %arg7: memref<4x1x32xf32, #tpu.memory_space<vmem>>, %arg8: memref<4x128x32xf32, #tpu.memory_space<vmem>>, %arg9: memref<4x1x32xf32, #tpu.memory_space<vmem>>, %arg10: memref<4x128x32xf32, #tpu.memory_space<vmem>>, %arg11: memref<4x1x32xf32, #tpu.memory_space<vmem>>, %arg12: memref<4x32x128xf32, #tpu.memory_space<vmem>>, %arg13: memref<1x128xf32, #tpu.memory_space<vmem>>, %arg14: memref<1x128xf32, #tpu.memory_space<vmem>>, %arg15: memref<4x128x32xf32, #tpu.memory_space<vmem>>, %arg16: memref<4x1x32xf32, #tpu.memory_space<vmem>>, %arg17: memref<4x128x32xf32, #tpu.memory_space<vmem>>, %arg18: memref<4x1x32xf32, #tpu.memory_space<vmem>>, %arg19: memref<4x128x32xf32, #tpu.memory_space<vmem>>, %arg20: memref<4x1x32xf32, #tpu.memory_space<vmem>>, %arg21: memref<4x32x128xf32, #tpu.memory_space<vmem>>, %arg22: memref<1x128xf32, #tpu.memory_space<vmem>>, %arg23: memref<1x32xf32, #tpu.memory_space<vmem>>, %arg24: memref<1x32xf32, #tpu.memory_space<vmem>>, %arg25: memref<128x512xf32, #tpu.memory_space<vmem>>, %arg26: memref<1x512xf32, #tpu.memory_space<vmem>>, %arg27: memref<512x128xf32, #tpu.memory_space<vmem>>, %arg28: memref<1x128xf32, #tpu.memory_space<vmem>>, %arg29: memref<1x8x128xf32, #tpu.memory_space<vmem>>) attributes {dimension_semantics = [#tpu.dimension_semantics<parallel>], iteration_bounds = array<i64: 2>, scalar_prefetch = 0 : i64, scratch_operands = 0 : i64, tpu.core_type = #tpu.core_type<tc>, window_params = [{transform_indices = @transform_0, window_bounds = array<i64: 1, 8, 128>}, {transform_indices = @transform_1, window_bounds = array<i64: 1, 1, 128>}, {transform_indices = @transform_2, window_bounds = array<i64: 1, 16, 128>}, {pipeline_mode = #tpu.pipeline_mode<synchronous>, transform_indices = @transform_3, window_bounds = array<i64: 128, 896>}, {pipeline_mode = #tpu.pipeline_mode<synchronous>, transform_indices = @transform_4, window_bounds = array<i64: 1, 896>}, {pipeline_mode = #tpu.pipeline_mode<synchronous>, transform_indices = @transform_5, window_bounds = array<i64: 4, 128, 32>}, {pipeline_mode = #tpu.pipeline_mode<synchronous>, transform_indices = @transform_6, window_bounds = array<i64: 4, 1, 32>}, {pipeline_mode = #tpu.pipeline_mode<synchronous>, transform_indices = @transform_7, window_bounds = array<i64: 4, 128, 32>}, {pipeline_mode = #tpu.pipeline_mode<synchronous>, transform_indices = @transform_8, window_bounds = array<i64: 4, 1, 32>}, {pipeline_mode = #tpu.pipeline_mode<synchronous>, transform_indices = @transform_9, window_bounds = array<i64: 4, 128, 32>}, {pipeline_mode = #tpu.pipeline_mode<synchronous>, transform_indices = @transform_10, window_bounds = array<i64: 4, 1, 32>}, {pipeline_mode = #tpu.pipeline_mode<synchronous>, transform_indices = @transform_11, window_bounds = array<i64: 4, 32, 128>}, {pipeline_mode = #tpu.pipeline_mode<synchronous>, transform_indices = @transform_12, window_bounds = array<i64: 1, 128>}, {pipeline_mode = #tpu.pipeline_mode<synchronous>, transform_indices = @transform_13, window_bounds = array<i64: 1, 128>}, {pipeline_mode = #tpu.pipeline_mode<synchronous>, transform_indices = @transform_14, window_bounds = array<i64: 4, 128, 32>}, {pipeline_mode = #tpu.pipeline_mode<synchronous>, transform_indices = @transform_15, window_bounds = array<i64: 4, 1, 32>}, {pipeline_mode = #tpu.pipeline_mode<synchronous>, transform_indices = @transform_16, window_bounds = array<i64: 4, 128, 32>}, {pipeline_mode = #tpu.pipeline_mode<synchronous>, transform_indices = @transform_17, window_bounds = array<i64: 4, 1, 32>}, {pipeline_mode = #tpu.pipeline_mode<synchronous>, transform_indices = @transform_18, window_bounds = array<i64: 4, 128, 32>}, {pipeline_mode = #tpu.pipeline_mode<synchronous>, transform_indices = @transform_19, window_bounds = array<i64: 4, 1, 32>}, {pipeline_mode = #tpu.pipeline_mode<synchronous>, transform_indices = @transform_20, window_bounds = array<i64: 4, 32, 128>}, {pipeline_mode = #tpu.pipeline_mode<synchronous>, transform_indices = @transform_21, window_bounds = array<i64: 1, 128>}, {pipeline_mode = #tpu.pipeline_mode<synchronous>, transform_indices = @transform_22, window_bounds = array<i64: 1, 32>}, {pipeline_mode = #tpu.pipeline_mode<synchronous>, transform_indices = @transform_23, window_bounds = array<i64: 1, 32>}, {pipeline_mode = #tpu.pipeline_mode<synchronous>, transform_indices = @transform_24, window_bounds = array<i64: 128, 512>}, {pipeline_mode = #tpu.pipeline_mode<synchronous>, transform_indices = @transform_25, window_bounds = array<i64: 1, 512>}, {pipeline_mode = #tpu.pipeline_mode<synchronous>, transform_indices = @transform_26, window_bounds = array<i64: 512, 128>}, {pipeline_mode = #tpu.pipeline_mode<synchronous>, transform_indices = @transform_27, window_bounds = array<i64: 1, 128>}, {transform_indices = @transform_28, window_bounds = array<i64: 1, 8, 128>}]} {
    %c0 = arith.constant 0 : index
    %c0_0 = arith.constant 0 : index
    %c0_1 = arith.constant 0 : index
    %0 = vector.load %arg1[%c0, %c0_0, %c0_1] : memref<1x8x128xf32, #tpu.memory_space<vmem>>, vector<1x8x128xf32>
    %1 = vector.shape_cast %0 : vector<1x8x128xf32> to vector<8x128xf32>
    %c0_2 = arith.constant 0 : index
    %c0_3 = arith.constant 0 : index
    %c0_4 = arith.constant 0 : index
    %2 = vector.load %arg2[%c0_2, %c0_3, %c0_4] : memref<1x1x128xf32, #tpu.memory_space<vmem>>, vector<1x1x128xf32>
    %3 = vector.shape_cast %2 : vector<1x1x128xf32> to vector<1x128xf32>
    %c0_5 = arith.constant 0 : index
    %c0_6 = arith.constant 0 : index
    %c0_7 = arith.constant 0 : index
    %4 = vector.load %arg3[%c0_5, %c0_6, %c0_7] : memref<1x16x128xf32, #tpu.memory_space<vmem>>, vector<1x16x128xf32>
    %5 = vector.shape_cast %4 : vector<1x16x128xf32> to vector<16x128xf32>
    %6 = arith.negf %3 : vector<1x128xf32>
    %7 = math.exp %6 : vector<1x128xf32>
    %cst = arith.constant 1.000000e+00 : f32
    %8 = vector.broadcast %cst : f32 to vector<1x128xf32>
    %9 = arith.addf %8, %7 : vector<1x128xf32>
    %10 = arith.divf %8, %9 : vector<1x128xf32>
    %11 = arith.mulf %3, %10 : vector<1x128xf32>
    %c0_8 = arith.constant 0 : index
    %c0_9 = arith.constant 0 : index
    %12 = vector.load %arg4[%c0_8, %c0_9] : memref<128x896xf32, #tpu.memory_space<vmem>>, vector<128x896xf32>
    %cst_10 = arith.constant dense<0.000000e+00> : vector<1x896xf32>
    %13 = tpu.matmul %11, %12, %cst_10 {dimension_numbers = #tpu.dot_dimension_numbers<[1], [0], [0], [1], [0, 0, 1, 1], [], []>} : vector<1x128xf32>, vector<128x896xf32>, vector<1x896xf32> -> vector<1x896xf32>
    %c0_11 = arith.constant 0 : index
    %c0_12 = arith.constant 0 : index
    %14 = vector.load %arg5[%c0_11, %c0_12] : memref<1x896xf32, #tpu.memory_space<vmem>>, vector<1x896xf32>
    %15 = arith.addf %13, %14 : vector<1x896xf32>
    %16 = vector.extract_strided_slice %15 {offsets = [0, 0], sizes = [1, 128], strides = [1, 1]} : vector<1x896xf32> to vector<1x128xf32>
    %17 = vector.extract_strided_slice %15 {offsets = [0, 128], sizes = [1, 128], strides = [1, 1]} : vector<1x896xf32> to vector<1x128xf32>
    %18 = vector.extract_strided_slice %15 {offsets = [0, 256], sizes = [1, 128], strides = [1, 1]} : vector<1x896xf32> to vector<1x128xf32>
    %19 = vector.extract_strided_slice %15 {offsets = [0, 384], sizes = [1, 128], strides = [1, 1]} : vector<1x896xf32> to vector<1x128xf32>
    %20 = vector.extract_strided_slice %15 {offsets = [0, 512], sizes = [1, 128], strides = [1, 1]} : vector<1x896xf32> to vector<1x128xf32>
    %21 = vector.extract_strided_slice %15 {offsets = [0, 640], sizes = [1, 128], strides = [1, 1]} : vector<1x896xf32> to vector<1x128xf32>
    %22 = vector.extract_strided_slice %15 {offsets = [0, 768], sizes = [1, 128], strides = [1, 1]} : vector<1x896xf32> to vector<1x128xf32>
    %cst_13 = arith.constant dense<0.000000e+00> : vector<8xf32>
    %23 = vector.multi_reduction <add>, %1, %cst_13 [1] : vector<8x128xf32> to vector<8xf32>
    %24 = vector.shape_cast %23 : vector<8xf32> to vector<8x1xf32>
    %cst_14 = arith.constant 1.280000e+02 : f32
    %25 = vector.broadcast %cst_14 : f32 to vector<8x1xf32>
    %26 = arith.divf %24, %25 : vector<8x1xf32>
    %27 = vector.broadcast %26 : vector<8x1xf32> to vector<8x128xf32>
    %28 = arith.subf %1, %27 : vector<8x128xf32>
    %29 = arith.mulf %28, %28 : vector<8x128xf32>
    %cst_15 = arith.constant dense<0.000000e+00> : vector<8xf32>
    %30 = vector.multi_reduction <add>, %29, %cst_15 [1] : vector<8x128xf32> to vector<8xf32>
    %31 = vector.shape_cast %30 : vector<8xf32> to vector<8x1xf32>
    %cst_16 = arith.constant 1.280000e+02 : f32
    %32 = vector.broadcast %cst_16 : f32 to vector<8x1xf32>
    %33 = arith.divf %31, %32 : vector<8x1xf32>
    %cst_17 = arith.constant 9.99999997E-7 : f32
    %34 = vector.broadcast %cst_17 : f32 to vector<8x1xf32>
    %35 = arith.addf %33, %34 : vector<8x1xf32>
    %36 = math.rsqrt %35 : vector<8x1xf32>
    %37 = vector.broadcast %36 : vector<8x1xf32> to vector<8x128xf32>
    %38 = arith.mulf %28, %37 : vector<8x128xf32>
    %cst_18 = arith.constant 1.000000e+00 : f32
    %39 = vector.broadcast %cst_18 : f32 to vector<1x128xf32>
    %40 = arith.addf %39, %17 : vector<1x128xf32>
    %41 = vector.broadcast %40 : vector<1x128xf32> to vector<8x128xf32>
    %42 = arith.mulf %38, %41 : vector<8x128xf32>
    %43 = vector.broadcast %16 : vector<1x128xf32> to vector<8x128xf32>
    %44 = arith.addf %42, %43 : vector<8x128xf32>
    %cst_19 = arith.constant 0.000000e+00 : f32
    %45 = vector.broadcast %cst_19 : f32 to vector<8x128xf32>
    %c0_20 = arith.constant 0 : index
    %c0_21 = arith.constant 0 : index
    %c0_22 = arith.constant 0 : index
    %46 = vector.load %arg6[%c0_20, %c0_21, %c0_22] : memref<4x128x32xf32, #tpu.memory_space<vmem>>, vector<1x128x32xf32>
    %47 = vector.shape_cast %46 : vector<1x128x32xf32> to vector<128x32xf32>
    %cst_23 = arith.constant dense<0.000000e+00> : vector<8x32xf32>
    %48 = tpu.matmul %44, %47, %cst_23 {dimension_numbers = #tpu.dot_dimension_numbers<[1], [0], [0], [1], [0, 0, 1, 1], [], []>} : vector<8x128xf32>, vector<128x32xf32>, vector<8x32xf32> -> vector<8x32xf32>
    %c0_24 = arith.constant 0 : index
    %c0_25 = arith.constant 0 : index
    %c0_26 = arith.constant 0 : index
    %49 = vector.load %arg7[%c0_24, %c0_25, %c0_26] : memref<4x1x32xf32, #tpu.memory_space<vmem>>, vector<1x1x32xf32>
    %50 = vector.shape_cast %49 : vector<1x1x32xf32> to vector<1x32xf32>
    %51 = vector.broadcast %50 : vector<1x32xf32> to vector<8x32xf32>
    %52 = arith.addf %48, %51 : vector<8x32xf32>
    %c0_27 = arith.constant 0 : index
    %c0_28 = arith.constant 0 : index
    %c0_29 = arith.constant 0 : index
    %53 = vector.load %arg8[%c0_27, %c0_28, %c0_29] : memref<4x128x32xf32, #tpu.memory_space<vmem>>, vector<1x128x32xf32>
    %54 = vector.shape_cast %53 : vector<1x128x32xf32> to vector<128x32xf32>
    %cst_30 = arith.constant dense<0.000000e+00> : vector<8x32xf32>
    %55 = tpu.matmul %44, %54, %cst_30 {dimension_numbers = #tpu.dot_dimension_numbers<[1], [0], [0], [1], [0, 0, 1, 1], [], []>} : vector<8x128xf32>, vector<128x32xf32>, vector<8x32xf32> -> vector<8x32xf32>
    %c0_31 = arith.constant 0 : index
    %c0_32 = arith.constant 0 : index
    %c0_33 = arith.constant 0 : index
    %56 = vector.load %arg9[%c0_31, %c0_32, %c0_33] : memref<4x1x32xf32, #tpu.memory_space<vmem>>, vector<1x1x32xf32>
    %57 = vector.shape_cast %56 : vector<1x1x32xf32> to vector<1x32xf32>
    %58 = vector.broadcast %57 : vector<1x32xf32> to vector<8x32xf32>
    %59 = arith.addf %55, %58 : vector<8x32xf32>
    %c0_34 = arith.constant 0 : index
    %c0_35 = arith.constant 0 : index
    %c0_36 = arith.constant 0 : index
    %60 = vector.load %arg10[%c0_34, %c0_35, %c0_36] : memref<4x128x32xf32, #tpu.memory_space<vmem>>, vector<1x128x32xf32>
    %61 = vector.shape_cast %60 : vector<1x128x32xf32> to vector<128x32xf32>
    %cst_37 = arith.constant dense<0.000000e+00> : vector<8x32xf32>
    %62 = tpu.matmul %44, %61, %cst_37 {dimension_numbers = #tpu.dot_dimension_numbers<[1], [0], [0], [1], [0, 0, 1, 1], [], []>} : vector<8x128xf32>, vector<128x32xf32>, vector<8x32xf32> -> vector<8x32xf32>
    %c0_38 = arith.constant 0 : index
    %c0_39 = arith.constant 0 : index
    %c0_40 = arith.constant 0 : index
    %63 = vector.load %arg11[%c0_38, %c0_39, %c0_40] : memref<4x1x32xf32, #tpu.memory_space<vmem>>, vector<1x1x32xf32>
    %64 = vector.shape_cast %63 : vector<1x1x32xf32> to vector<1x32xf32>
    %65 = vector.broadcast %64 : vector<1x32xf32> to vector<8x32xf32>
    %66 = arith.addf %62, %65 : vector<8x32xf32>
    %cst_41 = arith.constant dense<0.000000e+00> : vector<8x8xf32>
    %67 = tpu.matmul %52, %59, %cst_41 {dimension_numbers = #tpu.dot_dimension_numbers<[1], [1], [0], [0], [0, 0, 1, 0], [], []>} : vector<8x32xf32>, vector<8x32xf32>, vector<8x8xf32> -> vector<8x8xf32>
    %cst_42 = arith.constant 0.176776692 : f32
    %68 = vector.broadcast %cst_42 : f32 to vector<8x8xf32>
    %69 = arith.mulf %67, %68 : vector<8x8xf32>
    %cst_43 = arith.constant dense<0xFF800000> : vector<8xf32>
    %70 = vector.multi_reduction <maximumf>, %69, %cst_43 [1] : vector<8x8xf32> to vector<8xf32>
    %71 = vector.shape_cast %70 : vector<8xf32> to vector<8x1xf32>
    %72 = vector.broadcast %71 : vector<8x1xf32> to vector<8x8xf32>
    %73 = arith.subf %69, %72 : vector<8x8xf32>
    %74 = math.exp %73 : vector<8x8xf32>
    %cst_44 = arith.constant dense<0.000000e+00> : vector<8xf32>
    %75 = vector.multi_reduction <add>, %74, %cst_44 [1] : vector<8x8xf32> to vector<8xf32>
    %76 = vector.shape_cast %75 : vector<8xf32> to vector<8x1xf32>
    %77 = vector.broadcast %76 : vector<8x1xf32> to vector<8x8xf32>
    %78 = arith.divf %74, %77 : vector<8x8xf32>
    %cst_45 = arith.constant dense<0.000000e+00> : vector<8x32xf32>
    %79 = tpu.matmul %78, %66, %cst_45 {dimension_numbers = #tpu.dot_dimension_numbers<[1], [0], [0], [1], [0, 0, 1, 1], [], []>} : vector<8x8xf32>, vector<8x32xf32>, vector<8x32xf32> -> vector<8x32xf32>
    %c0_46 = arith.constant 0 : index
    %c0_47 = arith.constant 0 : index
    %c0_48 = arith.constant 0 : index
    %80 = vector.load %arg12[%c0_46, %c0_47, %c0_48] : memref<4x32x128xf32, #tpu.memory_space<vmem>>, vector<1x32x128xf32>
    %81 = vector.shape_cast %80 : vector<1x32x128xf32> to vector<32x128xf32>
    %cst_49 = arith.constant dense<0.000000e+00> : vector<8x128xf32>
    %82 = tpu.matmul %79, %81, %cst_49 {dimension_numbers = #tpu.dot_dimension_numbers<[1], [0], [0], [1], [0, 0, 1, 1], [], []>} : vector<8x32xf32>, vector<32x128xf32>, vector<8x128xf32> -> vector<8x128xf32>
    %83 = arith.addf %45, %82 : vector<8x128xf32>
    %c1 = arith.constant 1 : index
    %c0_50 = arith.constant 0 : index
    %c0_51 = arith.constant 0 : index
    %84 = vector.load %arg6[%c1, %c0_50, %c0_51] : memref<4x128x32xf32, #tpu.memory_space<vmem>>, vector<1x128x32xf32>
    %85 = vector.shape_cast %84 : vector<1x128x32xf32> to vector<128x32xf32>
    %cst_52 = arith.constant dense<0.000000e+00> : vector<8x32xf32>
    %86 = tpu.matmul %44, %85, %cst_52 {dimension_numbers = #tpu.dot_dimension_numbers<[1], [0], [0], [1], [0, 0, 1, 1], [], []>} : vector<8x128xf32>, vector<128x32xf32>, vector<8x32xf32> -> vector<8x32xf32>
    %c1_53 = arith.constant 1 : index
    %c0_54 = arith.constant 0 : index
    %c0_55 = arith.constant 0 : index
    %87 = vector.load %arg7[%c1_53, %c0_54, %c0_55] : memref<4x1x32xf32, #tpu.memory_space<vmem>>, vector<1x1x32xf32>
    %88 = vector.shape_cast %87 : vector<1x1x32xf32> to vector<1x32xf32>
    %89 = vector.broadcast %88 : vector<1x32xf32> to vector<8x32xf32>
    %90 = arith.addf %86, %89 : vector<8x32xf32>
    %c1_56 = arith.constant 1 : index
    %c0_57 = arith.constant 0 : index
    %c0_58 = arith.constant 0 : index
    %91 = vector.load %arg8[%c1_56, %c0_57, %c0_58] : memref<4x128x32xf32, #tpu.memory_space<vmem>>, vector<1x128x32xf32>
    %92 = vector.shape_cast %91 : vector<1x128x32xf32> to vector<128x32xf32>
    %cst_59 = arith.constant dense<0.000000e+00> : vector<8x32xf32>
    %93 = tpu.matmul %44, %92, %cst_59 {dimension_numbers = #tpu.dot_dimension_numbers<[1], [0], [0], [1], [0, 0, 1, 1], [], []>} : vector<8x128xf32>, vector<128x32xf32>, vector<8x32xf32> -> vector<8x32xf32>
    %c1_60 = arith.constant 1 : index
    %c0_61 = arith.constant 0 : index
    %c0_62 = arith.constant 0 : index
    %94 = vector.load %arg9[%c1_60, %c0_61, %c0_62] : memref<4x1x32xf32, #tpu.memory_space<vmem>>, vector<1x1x32xf32>
    %95 = vector.shape_cast %94 : vector<1x1x32xf32> to vector<1x32xf32>
    %96 = vector.broadcast %95 : vector<1x32xf32> to vector<8x32xf32>
    %97 = arith.addf %93, %96 : vector<8x32xf32>
    %c1_63 = arith.constant 1 : index
    %c0_64 = arith.constant 0 : index
    %c0_65 = arith.constant 0 : index
    %98 = vector.load %arg10[%c1_63, %c0_64, %c0_65] : memref<4x128x32xf32, #tpu.memory_space<vmem>>, vector<1x128x32xf32>
    %99 = vector.shape_cast %98 : vector<1x128x32xf32> to vector<128x32xf32>
    %cst_66 = arith.constant dense<0.000000e+00> : vector<8x32xf32>
    %100 = tpu.matmul %44, %99, %cst_66 {dimension_numbers = #tpu.dot_dimension_numbers<[1], [0], [0], [1], [0, 0, 1, 1], [], []>} : vector<8x128xf32>, vector<128x32xf32>, vector<8x32xf32> -> vector<8x32xf32>
    %c1_67 = arith.constant 1 : index
    %c0_68 = arith.constant 0 : index
    %c0_69 = arith.constant 0 : index
    %101 = vector.load %arg11[%c1_67, %c0_68, %c0_69] : memref<4x1x32xf32, #tpu.memory_space<vmem>>, vector<1x1x32xf32>
    %102 = vector.shape_cast %101 : vector<1x1x32xf32> to vector<1x32xf32>
    %103 = vector.broadcast %102 : vector<1x32xf32> to vector<8x32xf32>
    %104 = arith.addf %100, %103 : vector<8x32xf32>
    %cst_70 = arith.constant dense<0.000000e+00> : vector<8x8xf32>
    %105 = tpu.matmul %90, %97, %cst_70 {dimension_numbers = #tpu.dot_dimension_numbers<[1], [1], [0], [0], [0, 0, 1, 0], [], []>} : vector<8x32xf32>, vector<8x32xf32>, vector<8x8xf32> -> vector<8x8xf32>
    %cst_71 = arith.constant 0.176776692 : f32
    %106 = vector.broadcast %cst_71 : f32 to vector<8x8xf32>
    %107 = arith.mulf %105, %106 : vector<8x8xf32>
    %cst_72 = arith.constant dense<0xFF800000> : vector<8xf32>
    %108 = vector.multi_reduction <maximumf>, %107, %cst_72 [1] : vector<8x8xf32> to vector<8xf32>
    %109 = vector.shape_cast %108 : vector<8xf32> to vector<8x1xf32>
    %110 = vector.broadcast %109 : vector<8x1xf32> to vector<8x8xf32>
    %111 = arith.subf %107, %110 : vector<8x8xf32>
    %112 = math.exp %111 : vector<8x8xf32>
    %cst_73 = arith.constant dense<0.000000e+00> : vector<8xf32>
    %113 = vector.multi_reduction <add>, %112, %cst_73 [1] : vector<8x8xf32> to vector<8xf32>
    %114 = vector.shape_cast %113 : vector<8xf32> to vector<8x1xf32>
    %115 = vector.broadcast %114 : vector<8x1xf32> to vector<8x8xf32>
    %116 = arith.divf %112, %115 : vector<8x8xf32>
    %cst_74 = arith.constant dense<0.000000e+00> : vector<8x32xf32>
    %117 = tpu.matmul %116, %104, %cst_74 {dimension_numbers = #tpu.dot_dimension_numbers<[1], [0], [0], [1], [0, 0, 1, 1], [], []>} : vector<8x8xf32>, vector<8x32xf32>, vector<8x32xf32> -> vector<8x32xf32>
    %c1_75 = arith.constant 1 : index
    %c0_76 = arith.constant 0 : index
    %c0_77 = arith.constant 0 : index
    %118 = vector.load %arg12[%c1_75, %c0_76, %c0_77] : memref<4x32x128xf32, #tpu.memory_space<vmem>>, vector<1x32x128xf32>
    %119 = vector.shape_cast %118 : vector<1x32x128xf32> to vector<32x128xf32>
    %cst_78 = arith.constant dense<0.000000e+00> : vector<8x128xf32>
    %120 = tpu.matmul %117, %119, %cst_78 {dimension_numbers = #tpu.dot_dimension_numbers<[1], [0], [0], [1], [0, 0, 1, 1], [], []>} : vector<8x32xf32>, vector<32x128xf32>, vector<8x128xf32> -> vector<8x128xf32>
    %121 = arith.addf %83, %120 : vector<8x128xf32>
    %c2 = arith.constant 2 : index
    %c0_79 = arith.constant 0 : index
    %c0_80 = arith.constant 0 : index
    %122 = vector.load %arg6[%c2, %c0_79, %c0_80] : memref<4x128x32xf32, #tpu.memory_space<vmem>>, vector<1x128x32xf32>
    %123 = vector.shape_cast %122 : vector<1x128x32xf32> to vector<128x32xf32>
    %cst_81 = arith.constant dense<0.000000e+00> : vector<8x32xf32>
    %124 = tpu.matmul %44, %123, %cst_81 {dimension_numbers = #tpu.dot_dimension_numbers<[1], [0], [0], [1], [0, 0, 1, 1], [], []>} : vector<8x128xf32>, vector<128x32xf32>, vector<8x32xf32> -> vector<8x32xf32>
    %c2_82 = arith.constant 2 : index
    %c0_83 = arith.constant 0 : index
    %c0_84 = arith.constant 0 : index
    %125 = vector.load %arg7[%c2_82, %c0_83, %c0_84] : memref<4x1x32xf32, #tpu.memory_space<vmem>>, vector<1x1x32xf32>
    %126 = vector.shape_cast %125 : vector<1x1x32xf32> to vector<1x32xf32>
    %127 = vector.broadcast %126 : vector<1x32xf32> to vector<8x32xf32>
    %128 = arith.addf %124, %127 : vector<8x32xf32>
    %c2_85 = arith.constant 2 : index
    %c0_86 = arith.constant 0 : index
    %c0_87 = arith.constant 0 : index
    %129 = vector.load %arg8[%c2_85, %c0_86, %c0_87] : memref<4x128x32xf32, #tpu.memory_space<vmem>>, vector<1x128x32xf32>
    %130 = vector.shape_cast %129 : vector<1x128x32xf32> to vector<128x32xf32>
    %cst_88 = arith.constant dense<0.000000e+00> : vector<8x32xf32>
    %131 = tpu.matmul %44, %130, %cst_88 {dimension_numbers = #tpu.dot_dimension_numbers<[1], [0], [0], [1], [0, 0, 1, 1], [], []>} : vector<8x128xf32>, vector<128x32xf32>, vector<8x32xf32> -> vector<8x32xf32>
    %c2_89 = arith.constant 2 : index
    %c0_90 = arith.constant 0 : index
    %c0_91 = arith.constant 0 : index
    %132 = vector.load %arg9[%c2_89, %c0_90, %c0_91] : memref<4x1x32xf32, #tpu.memory_space<vmem>>, vector<1x1x32xf32>
    %133 = vector.shape_cast %132 : vector<1x1x32xf32> to vector<1x32xf32>
    %134 = vector.broadcast %133 : vector<1x32xf32> to vector<8x32xf32>
    %135 = arith.addf %131, %134 : vector<8x32xf32>
    %c2_92 = arith.constant 2 : index
    %c0_93 = arith.constant 0 : index
    %c0_94 = arith.constant 0 : index
    %136 = vector.load %arg10[%c2_92, %c0_93, %c0_94] : memref<4x128x32xf32, #tpu.memory_space<vmem>>, vector<1x128x32xf32>
    %137 = vector.shape_cast %136 : vector<1x128x32xf32> to vector<128x32xf32>
    %cst_95 = arith.constant dense<0.000000e+00> : vector<8x32xf32>
    %138 = tpu.matmul %44, %137, %cst_95 {dimension_numbers = #tpu.dot_dimension_numbers<[1], [0], [0], [1], [0, 0, 1, 1], [], []>} : vector<8x128xf32>, vector<128x32xf32>, vector<8x32xf32> -> vector<8x32xf32>
    %c2_96 = arith.constant 2 : index
    %c0_97 = arith.constant 0 : index
    %c0_98 = arith.constant 0 : index
    %139 = vector.load %arg11[%c2_96, %c0_97, %c0_98] : memref<4x1x32xf32, #tpu.memory_space<vmem>>, vector<1x1x32xf32>
    %140 = vector.shape_cast %139 : vector<1x1x32xf32> to vector<1x32xf32>
    %141 = vector.broadcast %140 : vector<1x32xf32> to vector<8x32xf32>
    %142 = arith.addf %138, %141 : vector<8x32xf32>
    %cst_99 = arith.constant dense<0.000000e+00> : vector<8x8xf32>
    %143 = tpu.matmul %128, %135, %cst_99 {dimension_numbers = #tpu.dot_dimension_numbers<[1], [1], [0], [0], [0, 0, 1, 0], [], []>} : vector<8x32xf32>, vector<8x32xf32>, vector<8x8xf32> -> vector<8x8xf32>
    %cst_100 = arith.constant 0.176776692 : f32
    %144 = vector.broadcast %cst_100 : f32 to vector<8x8xf32>
    %145 = arith.mulf %143, %144 : vector<8x8xf32>
    %cst_101 = arith.constant dense<0xFF800000> : vector<8xf32>
    %146 = vector.multi_reduction <maximumf>, %145, %cst_101 [1] : vector<8x8xf32> to vector<8xf32>
    %147 = vector.shape_cast %146 : vector<8xf32> to vector<8x1xf32>
    %148 = vector.broadcast %147 : vector<8x1xf32> to vector<8x8xf32>
    %149 = arith.subf %145, %148 : vector<8x8xf32>
    %150 = math.exp %149 : vector<8x8xf32>
    %cst_102 = arith.constant dense<0.000000e+00> : vector<8xf32>
    %151 = vector.multi_reduction <add>, %150, %cst_102 [1] : vector<8x8xf32> to vector<8xf32>
    %152 = vector.shape_cast %151 : vector<8xf32> to vector<8x1xf32>
    %153 = vector.broadcast %152 : vector<8x1xf32> to vector<8x8xf32>
    %154 = arith.divf %150, %153 : vector<8x8xf32>
    %cst_103 = arith.constant dense<0.000000e+00> : vector<8x32xf32>
    %155 = tpu.matmul %154, %142, %cst_103 {dimension_numbers = #tpu.dot_dimension_numbers<[1], [0], [0], [1], [0, 0, 1, 1], [], []>} : vector<8x8xf32>, vector<8x32xf32>, vector<8x32xf32> -> vector<8x32xf32>
    %c2_104 = arith.constant 2 : index
    %c0_105 = arith.constant 0 : index
    %c0_106 = arith.constant 0 : index
    %156 = vector.load %arg12[%c2_104, %c0_105, %c0_106] : memref<4x32x128xf32, #tpu.memory_space<vmem>>, vector<1x32x128xf32>
    %157 = vector.shape_cast %156 : vector<1x32x128xf32> to vector<32x128xf32>
    %cst_107 = arith.constant dense<0.000000e+00> : vector<8x128xf32>
    %158 = tpu.matmul %155, %157, %cst_107 {dimension_numbers = #tpu.dot_dimension_numbers<[1], [0], [0], [1], [0, 0, 1, 1], [], []>} : vector<8x32xf32>, vector<32x128xf32>, vector<8x128xf32> -> vector<8x128xf32>
    %159 = arith.addf %121, %158 : vector<8x128xf32>
    %c3 = arith.constant 3 : index
    %c0_108 = arith.constant 0 : index
    %c0_109 = arith.constant 0 : index
    %160 = vector.load %arg6[%c3, %c0_108, %c0_109] : memref<4x128x32xf32, #tpu.memory_space<vmem>>, vector<1x128x32xf32>
    %161 = vector.shape_cast %160 : vector<1x128x32xf32> to vector<128x32xf32>
    %cst_110 = arith.constant dense<0.000000e+00> : vector<8x32xf32>
    %162 = tpu.matmul %44, %161, %cst_110 {dimension_numbers = #tpu.dot_dimension_numbers<[1], [0], [0], [1], [0, 0, 1, 1], [], []>} : vector<8x128xf32>, vector<128x32xf32>, vector<8x32xf32> -> vector<8x32xf32>
    %c3_111 = arith.constant 3 : index
    %c0_112 = arith.constant 0 : index
    %c0_113 = arith.constant 0 : index
    %163 = vector.load %arg7[%c3_111, %c0_112, %c0_113] : memref<4x1x32xf32, #tpu.memory_space<vmem>>, vector<1x1x32xf32>
    %164 = vector.shape_cast %163 : vector<1x1x32xf32> to vector<1x32xf32>
    %165 = vector.broadcast %164 : vector<1x32xf32> to vector<8x32xf32>
    %166 = arith.addf %162, %165 : vector<8x32xf32>
    %c3_114 = arith.constant 3 : index
    %c0_115 = arith.constant 0 : index
    %c0_116 = arith.constant 0 : index
    %167 = vector.load %arg8[%c3_114, %c0_115, %c0_116] : memref<4x128x32xf32, #tpu.memory_space<vmem>>, vector<1x128x32xf32>
    %168 = vector.shape_cast %167 : vector<1x128x32xf32> to vector<128x32xf32>
    %cst_117 = arith.constant dense<0.000000e+00> : vector<8x32xf32>
    %169 = tpu.matmul %44, %168, %cst_117 {dimension_numbers = #tpu.dot_dimension_numbers<[1], [0], [0], [1], [0, 0, 1, 1], [], []>} : vector<8x128xf32>, vector<128x32xf32>, vector<8x32xf32> -> vector<8x32xf32>
    %c3_118 = arith.constant 3 : index
    %c0_119 = arith.constant 0 : index
    %c0_120 = arith.constant 0 : index
    %170 = vector.load %arg9[%c3_118, %c0_119, %c0_120] : memref<4x1x32xf32, #tpu.memory_space<vmem>>, vector<1x1x32xf32>
    %171 = vector.shape_cast %170 : vector<1x1x32xf32> to vector<1x32xf32>
    %172 = vector.broadcast %171 : vector<1x32xf32> to vector<8x32xf32>
    %173 = arith.addf %169, %172 : vector<8x32xf32>
    %c3_121 = arith.constant 3 : index
    %c0_122 = arith.constant 0 : index
    %c0_123 = arith.constant 0 : index
    %174 = vector.load %arg10[%c3_121, %c0_122, %c0_123] : memref<4x128x32xf32, #tpu.memory_space<vmem>>, vector<1x128x32xf32>
    %175 = vector.shape_cast %174 : vector<1x128x32xf32> to vector<128x32xf32>
    %cst_124 = arith.constant dense<0.000000e+00> : vector<8x32xf32>
    %176 = tpu.matmul %44, %175, %cst_124 {dimension_numbers = #tpu.dot_dimension_numbers<[1], [0], [0], [1], [0, 0, 1, 1], [], []>} : vector<8x128xf32>, vector<128x32xf32>, vector<8x32xf32> -> vector<8x32xf32>
    %c3_125 = arith.constant 3 : index
    %c0_126 = arith.constant 0 : index
    %c0_127 = arith.constant 0 : index
    %177 = vector.load %arg11[%c3_125, %c0_126, %c0_127] : memref<4x1x32xf32, #tpu.memory_space<vmem>>, vector<1x1x32xf32>
    %178 = vector.shape_cast %177 : vector<1x1x32xf32> to vector<1x32xf32>
    %179 = vector.broadcast %178 : vector<1x32xf32> to vector<8x32xf32>
    %180 = arith.addf %176, %179 : vector<8x32xf32>
    %cst_128 = arith.constant dense<0.000000e+00> : vector<8x8xf32>
    %181 = tpu.matmul %166, %173, %cst_128 {dimension_numbers = #tpu.dot_dimension_numbers<[1], [1], [0], [0], [0, 0, 1, 0], [], []>} : vector<8x32xf32>, vector<8x32xf32>, vector<8x8xf32> -> vector<8x8xf32>
    %cst_129 = arith.constant 0.176776692 : f32
    %182 = vector.broadcast %cst_129 : f32 to vector<8x8xf32>
    %183 = arith.mulf %181, %182 : vector<8x8xf32>
    %cst_130 = arith.constant dense<0xFF800000> : vector<8xf32>
    %184 = vector.multi_reduction <maximumf>, %183, %cst_130 [1] : vector<8x8xf32> to vector<8xf32>
    %185 = vector.shape_cast %184 : vector<8xf32> to vector<8x1xf32>
    %186 = vector.broadcast %185 : vector<8x1xf32> to vector<8x8xf32>
    %187 = arith.subf %183, %186 : vector<8x8xf32>
    %188 = math.exp %187 : vector<8x8xf32>
    %cst_131 = arith.constant dense<0.000000e+00> : vector<8xf32>
    %189 = vector.multi_reduction <add>, %188, %cst_131 [1] : vector<8x8xf32> to vector<8xf32>
    %190 = vector.shape_cast %189 : vector<8xf32> to vector<8x1xf32>
    %191 = vector.broadcast %190 : vector<8x1xf32> to vector<8x8xf32>
    %192 = arith.divf %188, %191 : vector<8x8xf32>
    %cst_132 = arith.constant dense<0.000000e+00> : vector<8x32xf32>
    %193 = tpu.matmul %192, %180, %cst_132 {dimension_numbers = #tpu.dot_dimension_numbers<[1], [0], [0], [1], [0, 0, 1, 1], [], []>} : vector<8x8xf32>, vector<8x32xf32>, vector<8x32xf32> -> vector<8x32xf32>
    %c3_133 = arith.constant 3 : index
    %c0_134 = arith.constant 0 : index
    %c0_135 = arith.constant 0 : index
    %194 = vector.load %arg12[%c3_133, %c0_134, %c0_135] : memref<4x32x128xf32, #tpu.memory_space<vmem>>, vector<1x32x128xf32>
    %195 = vector.shape_cast %194 : vector<1x32x128xf32> to vector<32x128xf32>
    %cst_136 = arith.constant dense<0.000000e+00> : vector<8x128xf32>
    %196 = tpu.matmul %193, %195, %cst_136 {dimension_numbers = #tpu.dot_dimension_numbers<[1], [0], [0], [1], [0, 0, 1, 1], [], []>} : vector<8x32xf32>, vector<32x128xf32>, vector<8x128xf32> -> vector<8x128xf32>
    %197 = arith.addf %159, %196 : vector<8x128xf32>
    %c0_137 = arith.constant 0 : index
    %c0_138 = arith.constant 0 : index
    %198 = vector.load %arg13[%c0_137, %c0_138] : memref<1x128xf32, #tpu.memory_space<vmem>>, vector<1x128xf32>
    %199 = vector.broadcast %198 : vector<1x128xf32> to vector<8x128xf32>
    %200 = arith.addf %197, %199 : vector<8x128xf32>
    %201 = vector.broadcast %18 : vector<1x128xf32> to vector<8x128xf32>
    %202 = arith.mulf %201, %200 : vector<8x128xf32>
    %203 = arith.addf %1, %202 : vector<8x128xf32>
    %c0_139 = arith.constant 0 : index
    %c0_140 = arith.constant 0 : index
    %204 = vector.load %arg14[%c0_139, %c0_140] : memref<1x128xf32, #tpu.memory_space<vmem>>, vector<1x128xf32>
    %205 = arith.mulf %203, %203 : vector<8x128xf32>
    %cst_141 = arith.constant dense<0.000000e+00> : vector<8xf32>
    %206 = vector.multi_reduction <add>, %205, %cst_141 [1] : vector<8x128xf32> to vector<8xf32>
    %207 = vector.shape_cast %206 : vector<8xf32> to vector<8x1xf32>
    %cst_142 = arith.constant 1.280000e+02 : f32
    %208 = vector.broadcast %cst_142 : f32 to vector<8x1xf32>
    %209 = arith.divf %207, %208 : vector<8x1xf32>
    %cst_143 = arith.constant 9.99999997E-7 : f32
    %210 = vector.broadcast %cst_143 : f32 to vector<8x1xf32>
    %211 = arith.addf %209, %210 : vector<8x1xf32>
    %212 = math.rsqrt %211 : vector<8x1xf32>
    %213 = vector.broadcast %212 : vector<8x1xf32> to vector<8x128xf32>
    %214 = arith.mulf %203, %213 : vector<8x128xf32>
    %215 = vector.broadcast %204 : vector<1x128xf32> to vector<8x128xf32>
    %216 = arith.mulf %214, %215 : vector<8x128xf32>
    %cst_144 = arith.constant 0.000000e+00 : f32
    %217 = vector.broadcast %cst_144 : f32 to vector<8x128xf32>
    %c0_145 = arith.constant 0 : index
    %c0_146 = arith.constant 0 : index
    %c0_147 = arith.constant 0 : index
    %218 = vector.load %arg15[%c0_145, %c0_146, %c0_147] : memref<4x128x32xf32, #tpu.memory_space<vmem>>, vector<1x128x32xf32>
    %219 = vector.shape_cast %218 : vector<1x128x32xf32> to vector<128x32xf32>
    %cst_148 = arith.constant dense<0.000000e+00> : vector<8x32xf32>
    %220 = tpu.matmul %216, %219, %cst_148 {dimension_numbers = #tpu.dot_dimension_numbers<[1], [0], [0], [1], [0, 0, 1, 1], [], []>} : vector<8x128xf32>, vector<128x32xf32>, vector<8x32xf32> -> vector<8x32xf32>
    %c0_149 = arith.constant 0 : index
    %c0_150 = arith.constant 0 : index
    %c0_151 = arith.constant 0 : index
    %221 = vector.load %arg16[%c0_149, %c0_150, %c0_151] : memref<4x1x32xf32, #tpu.memory_space<vmem>>, vector<1x1x32xf32>
    %222 = vector.shape_cast %221 : vector<1x1x32xf32> to vector<1x32xf32>
    %223 = vector.broadcast %222 : vector<1x32xf32> to vector<8x32xf32>
    %224 = arith.addf %220, %223 : vector<8x32xf32>
    %c0_152 = arith.constant 0 : index
    %c0_153 = arith.constant 0 : index
    %c0_154 = arith.constant 0 : index
    %225 = vector.load %arg17[%c0_152, %c0_153, %c0_154] : memref<4x128x32xf32, #tpu.memory_space<vmem>>, vector<1x128x32xf32>
    %226 = vector.shape_cast %225 : vector<1x128x32xf32> to vector<128x32xf32>
    %cst_155 = arith.constant dense<0.000000e+00> : vector<16x32xf32>
    %227 = tpu.matmul %5, %226, %cst_155 {dimension_numbers = #tpu.dot_dimension_numbers<[1], [0], [0], [1], [0, 0, 1, 1], [], []>} : vector<16x128xf32>, vector<128x32xf32>, vector<16x32xf32> -> vector<16x32xf32>
    %c0_156 = arith.constant 0 : index
    %c0_157 = arith.constant 0 : index
    %c0_158 = arith.constant 0 : index
    %228 = vector.load %arg18[%c0_156, %c0_157, %c0_158] : memref<4x1x32xf32, #tpu.memory_space<vmem>>, vector<1x1x32xf32>
    %229 = vector.shape_cast %228 : vector<1x1x32xf32> to vector<1x32xf32>
    %230 = vector.broadcast %229 : vector<1x32xf32> to vector<16x32xf32>
    %231 = arith.addf %227, %230 : vector<16x32xf32>
    %c0_159 = arith.constant 0 : index
    %c0_160 = arith.constant 0 : index
    %c0_161 = arith.constant 0 : index
    %232 = vector.load %arg19[%c0_159, %c0_160, %c0_161] : memref<4x128x32xf32, #tpu.memory_space<vmem>>, vector<1x128x32xf32>
    %233 = vector.shape_cast %232 : vector<1x128x32xf32> to vector<128x32xf32>
    %cst_162 = arith.constant dense<0.000000e+00> : vector<16x32xf32>
    %234 = tpu.matmul %5, %233, %cst_162 {dimension_numbers = #tpu.dot_dimension_numbers<[1], [0], [0], [1], [0, 0, 1, 1], [], []>} : vector<16x128xf32>, vector<128x32xf32>, vector<16x32xf32> -> vector<16x32xf32>
    %c0_163 = arith.constant 0 : index
    %c0_164 = arith.constant 0 : index
    %c0_165 = arith.constant 0 : index
    %235 = vector.load %arg20[%c0_163, %c0_164, %c0_165] : memref<4x1x32xf32, #tpu.memory_space<vmem>>, vector<1x1x32xf32>
    %236 = vector.shape_cast %235 : vector<1x1x32xf32> to vector<1x32xf32>
    %237 = vector.broadcast %236 : vector<1x32xf32> to vector<16x32xf32>
    %238 = arith.addf %234, %237 : vector<16x32xf32>
    %c0_166 = arith.constant 0 : index
    %c0_167 = arith.constant 0 : index
    %239 = vector.load %arg23[%c0_166, %c0_167] : memref<1x32xf32, #tpu.memory_space<vmem>>, vector<1x32xf32>
    %240 = arith.mulf %224, %224 : vector<8x32xf32>
    %cst_168 = arith.constant dense<0.000000e+00> : vector<8xf32>
    %241 = vector.multi_reduction <add>, %240, %cst_168 [1] : vector<8x32xf32> to vector<8xf32>
    %242 = vector.shape_cast %241 : vector<8xf32> to vector<8x1xf32>
    %cst_169 = arith.constant 3.200000e+01 : f32
    %243 = vector.broadcast %cst_169 : f32 to vector<8x1xf32>
    %244 = arith.divf %242, %243 : vector<8x1xf32>
    %cst_170 = arith.constant 9.99999997E-7 : f32
    %245 = vector.broadcast %cst_170 : f32 to vector<8x1xf32>
    %246 = arith.addf %244, %245 : vector<8x1xf32>
    %247 = math.rsqrt %246 : vector<8x1xf32>
    %248 = vector.broadcast %247 : vector<8x1xf32> to vector<8x32xf32>
    %249 = arith.mulf %224, %248 : vector<8x32xf32>
    %250 = vector.broadcast %239 : vector<1x32xf32> to vector<8x32xf32>
    %251 = arith.mulf %249, %250 : vector<8x32xf32>
    %c0_171 = arith.constant 0 : index
    %c0_172 = arith.constant 0 : index
    %252 = vector.load %arg24[%c0_171, %c0_172] : memref<1x32xf32, #tpu.memory_space<vmem>>, vector<1x32xf32>
    %253 = arith.mulf %231, %231 : vector<16x32xf32>
    %cst_173 = arith.constant dense<0.000000e+00> : vector<16xf32>
    %254 = vector.multi_reduction <add>, %253, %cst_173 [1] : vector<16x32xf32> to vector<16xf32>
    %255 = vector.shape_cast %254 : vector<16xf32> to vector<16x1xf32>
    %cst_174 = arith.constant 3.200000e+01 : f32
    %256 = vector.broadcast %cst_174 : f32 to vector<16x1xf32>
    %257 = arith.divf %255, %256 : vector<16x1xf32>
    %cst_175 = arith.constant 9.99999997E-7 : f32
    %258 = vector.broadcast %cst_175 : f32 to vector<16x1xf32>
    %259 = arith.addf %257, %258 : vector<16x1xf32>
    %260 = math.rsqrt %259 : vector<16x1xf32>
    %261 = vector.broadcast %260 : vector<16x1xf32> to vector<16x32xf32>
    %262 = arith.mulf %231, %261 : vector<16x32xf32>
    %263 = vector.broadcast %252 : vector<1x32xf32> to vector<16x32xf32>
    %264 = arith.mulf %262, %263 : vector<16x32xf32>
    %cst_176 = arith.constant dense<0.000000e+00> : vector<8x16xf32>
    %265 = tpu.matmul %251, %264, %cst_176 {dimension_numbers = #tpu.dot_dimension_numbers<[1], [1], [0], [0], [0, 0, 1, 0], [], []>} : vector<8x32xf32>, vector<16x32xf32>, vector<8x16xf32> -> vector<8x16xf32>
    %cst_177 = arith.constant 0.176776692 : f32
    %266 = vector.broadcast %cst_177 : f32 to vector<8x16xf32>
    %267 = arith.mulf %265, %266 : vector<8x16xf32>
    %cst_178 = arith.constant dense<0xFF800000> : vector<8xf32>
    %268 = vector.multi_reduction <maximumf>, %267, %cst_178 [1] : vector<8x16xf32> to vector<8xf32>
    %269 = vector.shape_cast %268 : vector<8xf32> to vector<8x1xf32>
    %270 = vector.broadcast %269 : vector<8x1xf32> to vector<8x16xf32>
    %271 = arith.subf %267, %270 : vector<8x16xf32>
    %272 = math.exp %271 : vector<8x16xf32>
    %cst_179 = arith.constant dense<0.000000e+00> : vector<8xf32>
    %273 = vector.multi_reduction <add>, %272, %cst_179 [1] : vector<8x16xf32> to vector<8xf32>
    %274 = vector.shape_cast %273 : vector<8xf32> to vector<8x1xf32>
    %275 = vector.broadcast %274 : vector<8x1xf32> to vector<8x16xf32>
    %276 = arith.divf %272, %275 : vector<8x16xf32>
    %cst_180 = arith.constant dense<0.000000e+00> : vector<8x32xf32>
    %277 = tpu.matmul %276, %238, %cst_180 {dimension_numbers = #tpu.dot_dimension_numbers<[1], [0], [0], [1], [0, 0, 1, 1], [], []>} : vector<8x16xf32>, vector<16x32xf32>, vector<8x32xf32> -> vector<8x32xf32>
    %c0_181 = arith.constant 0 : index
    %c0_182 = arith.constant 0 : index
    %c0_183 = arith.constant 0 : index
    %278 = vector.load %arg21[%c0_181, %c0_182, %c0_183] : memref<4x32x128xf32, #tpu.memory_space<vmem>>, vector<1x32x128xf32>
    %279 = vector.shape_cast %278 : vector<1x32x128xf32> to vector<32x128xf32>
    %cst_184 = arith.constant dense<0.000000e+00> : vector<8x128xf32>
    %280 = tpu.matmul %277, %279, %cst_184 {dimension_numbers = #tpu.dot_dimension_numbers<[1], [0], [0], [1], [0, 0, 1, 1], [], []>} : vector<8x32xf32>, vector<32x128xf32>, vector<8x128xf32> -> vector<8x128xf32>
    %281 = arith.addf %217, %280 : vector<8x128xf32>
    %c1_185 = arith.constant 1 : index
    %c0_186 = arith.constant 0 : index
    %c0_187 = arith.constant 0 : index
    %282 = vector.load %arg15[%c1_185, %c0_186, %c0_187] : memref<4x128x32xf32, #tpu.memory_space<vmem>>, vector<1x128x32xf32>
    %283 = vector.shape_cast %282 : vector<1x128x32xf32> to vector<128x32xf32>
    %cst_188 = arith.constant dense<0.000000e+00> : vector<8x32xf32>
    %284 = tpu.matmul %216, %283, %cst_188 {dimension_numbers = #tpu.dot_dimension_numbers<[1], [0], [0], [1], [0, 0, 1, 1], [], []>} : vector<8x128xf32>, vector<128x32xf32>, vector<8x32xf32> -> vector<8x32xf32>
    %c1_189 = arith.constant 1 : index
    %c0_190 = arith.constant 0 : index
    %c0_191 = arith.constant 0 : index
    %285 = vector.load %arg16[%c1_189, %c0_190, %c0_191] : memref<4x1x32xf32, #tpu.memory_space<vmem>>, vector<1x1x32xf32>
    %286 = vector.shape_cast %285 : vector<1x1x32xf32> to vector<1x32xf32>
    %287 = vector.broadcast %286 : vector<1x32xf32> to vector<8x32xf32>
    %288 = arith.addf %284, %287 : vector<8x32xf32>
    %c1_192 = arith.constant 1 : index
    %c0_193 = arith.constant 0 : index
    %c0_194 = arith.constant 0 : index
    %289 = vector.load %arg17[%c1_192, %c0_193, %c0_194] : memref<4x128x32xf32, #tpu.memory_space<vmem>>, vector<1x128x32xf32>
    %290 = vector.shape_cast %289 : vector<1x128x32xf32> to vector<128x32xf32>
    %cst_195 = arith.constant dense<0.000000e+00> : vector<16x32xf32>
    %291 = tpu.matmul %5, %290, %cst_195 {dimension_numbers = #tpu.dot_dimension_numbers<[1], [0], [0], [1], [0, 0, 1, 1], [], []>} : vector<16x128xf32>, vector<128x32xf32>, vector<16x32xf32> -> vector<16x32xf32>
    %c1_196 = arith.constant 1 : index
    %c0_197 = arith.constant 0 : index
    %c0_198 = arith.constant 0 : index
    %292 = vector.load %arg18[%c1_196, %c0_197, %c0_198] : memref<4x1x32xf32, #tpu.memory_space<vmem>>, vector<1x1x32xf32>
    %293 = vector.shape_cast %292 : vector<1x1x32xf32> to vector<1x32xf32>
    %294 = vector.broadcast %293 : vector<1x32xf32> to vector<16x32xf32>
    %295 = arith.addf %291, %294 : vector<16x32xf32>
    %c1_199 = arith.constant 1 : index
    %c0_200 = arith.constant 0 : index
    %c0_201 = arith.constant 0 : index
    %296 = vector.load %arg19[%c1_199, %c0_200, %c0_201] : memref<4x128x32xf32, #tpu.memory_space<vmem>>, vector<1x128x32xf32>
    %297 = vector.shape_cast %296 : vector<1x128x32xf32> to vector<128x32xf32>
    %cst_202 = arith.constant dense<0.000000e+00> : vector<16x32xf32>
    %298 = tpu.matmul %5, %297, %cst_202 {dimension_numbers = #tpu.dot_dimension_numbers<[1], [0], [0], [1], [0, 0, 1, 1], [], []>} : vector<16x128xf32>, vector<128x32xf32>, vector<16x32xf32> -> vector<16x32xf32>
    %c1_203 = arith.constant 1 : index
    %c0_204 = arith.constant 0 : index
    %c0_205 = arith.constant 0 : index
    %299 = vector.load %arg20[%c1_203, %c0_204, %c0_205] : memref<4x1x32xf32, #tpu.memory_space<vmem>>, vector<1x1x32xf32>
    %300 = vector.shape_cast %299 : vector<1x1x32xf32> to vector<1x32xf32>
    %301 = vector.broadcast %300 : vector<1x32xf32> to vector<16x32xf32>
    %302 = arith.addf %298, %301 : vector<16x32xf32>
    %c0_206 = arith.constant 0 : index
    %c0_207 = arith.constant 0 : index
    %303 = vector.load %arg23[%c0_206, %c0_207] : memref<1x32xf32, #tpu.memory_space<vmem>>, vector<1x32xf32>
    %304 = arith.mulf %288, %288 : vector<8x32xf32>
    %cst_208 = arith.constant dense<0.000000e+00> : vector<8xf32>
    %305 = vector.multi_reduction <add>, %304, %cst_208 [1] : vector<8x32xf32> to vector<8xf32>
    %306 = vector.shape_cast %305 : vector<8xf32> to vector<8x1xf32>
    %cst_209 = arith.constant 3.200000e+01 : f32
    %307 = vector.broadcast %cst_209 : f32 to vector<8x1xf32>
    %308 = arith.divf %306, %307 : vector<8x1xf32>
    %cst_210 = arith.constant 9.99999997E-7 : f32
    %309 = vector.broadcast %cst_210 : f32 to vector<8x1xf32>
    %310 = arith.addf %308, %309 : vector<8x1xf32>
    %311 = math.rsqrt %310 : vector<8x1xf32>
    %312 = vector.broadcast %311 : vector<8x1xf32> to vector<8x32xf32>
    %313 = arith.mulf %288, %312 : vector<8x32xf32>
    %314 = vector.broadcast %303 : vector<1x32xf32> to vector<8x32xf32>
    %315 = arith.mulf %313, %314 : vector<8x32xf32>
    %c0_211 = arith.constant 0 : index
    %c0_212 = arith.constant 0 : index
    %316 = vector.load %arg24[%c0_211, %c0_212] : memref<1x32xf32, #tpu.memory_space<vmem>>, vector<1x32xf32>
    %317 = arith.mulf %295, %295 : vector<16x32xf32>
    %cst_213 = arith.constant dense<0.000000e+00> : vector<16xf32>
    %318 = vector.multi_reduction <add>, %317, %cst_213 [1] : vector<16x32xf32> to vector<16xf32>
    %319 = vector.shape_cast %318 : vector<16xf32> to vector<16x1xf32>
    %cst_214 = arith.constant 3.200000e+01 : f32
    %320 = vector.broadcast %cst_214 : f32 to vector<16x1xf32>
    %321 = arith.divf %319, %320 : vector<16x1xf32>
    %cst_215 = arith.constant 9.99999997E-7 : f32
    %322 = vector.broadcast %cst_215 : f32 to vector<16x1xf32>
    %323 = arith.addf %321, %322 : vector<16x1xf32>
    %324 = math.rsqrt %323 : vector<16x1xf32>
    %325 = vector.broadcast %324 : vector<16x1xf32> to vector<16x32xf32>
    %326 = arith.mulf %295, %325 : vector<16x32xf32>
    %327 = vector.broadcast %316 : vector<1x32xf32> to vector<16x32xf32>
    %328 = arith.mulf %326, %327 : vector<16x32xf32>
    %cst_216 = arith.constant dense<0.000000e+00> : vector<8x16xf32>
    %329 = tpu.matmul %315, %328, %cst_216 {dimension_numbers = #tpu.dot_dimension_numbers<[1], [1], [0], [0], [0, 0, 1, 0], [], []>} : vector<8x32xf32>, vector<16x32xf32>, vector<8x16xf32> -> vector<8x16xf32>
    %cst_217 = arith.constant 0.176776692 : f32
    %330 = vector.broadcast %cst_217 : f32 to vector<8x16xf32>
    %331 = arith.mulf %329, %330 : vector<8x16xf32>
    %cst_218 = arith.constant dense<0xFF800000> : vector<8xf32>
    %332 = vector.multi_reduction <maximumf>, %331, %cst_218 [1] : vector<8x16xf32> to vector<8xf32>
    %333 = vector.shape_cast %332 : vector<8xf32> to vector<8x1xf32>
    %334 = vector.broadcast %333 : vector<8x1xf32> to vector<8x16xf32>
    %335 = arith.subf %331, %334 : vector<8x16xf32>
    %336 = math.exp %335 : vector<8x16xf32>
    %cst_219 = arith.constant dense<0.000000e+00> : vector<8xf32>
    %337 = vector.multi_reduction <add>, %336, %cst_219 [1] : vector<8x16xf32> to vector<8xf32>
    %338 = vector.shape_cast %337 : vector<8xf32> to vector<8x1xf32>
    %339 = vector.broadcast %338 : vector<8x1xf32> to vector<8x16xf32>
    %340 = arith.divf %336, %339 : vector<8x16xf32>
    %cst_220 = arith.constant dense<0.000000e+00> : vector<8x32xf32>
    %341 = tpu.matmul %340, %302, %cst_220 {dimension_numbers = #tpu.dot_dimension_numbers<[1], [0], [0], [1], [0, 0, 1, 1], [], []>} : vector<8x16xf32>, vector<16x32xf32>, vector<8x32xf32> -> vector<8x32xf32>
    %c1_221 = arith.constant 1 : index
    %c0_222 = arith.constant 0 : index
    %c0_223 = arith.constant 0 : index
    %342 = vector.load %arg21[%c1_221, %c0_222, %c0_223] : memref<4x32x128xf32, #tpu.memory_space<vmem>>, vector<1x32x128xf32>
    %343 = vector.shape_cast %342 : vector<1x32x128xf32> to vector<32x128xf32>
    %cst_224 = arith.constant dense<0.000000e+00> : vector<8x128xf32>
    %344 = tpu.matmul %341, %343, %cst_224 {dimension_numbers = #tpu.dot_dimension_numbers<[1], [0], [0], [1], [0, 0, 1, 1], [], []>} : vector<8x32xf32>, vector<32x128xf32>, vector<8x128xf32> -> vector<8x128xf32>
    %345 = arith.addf %281, %344 : vector<8x128xf32>
    %c2_225 = arith.constant 2 : index
    %c0_226 = arith.constant 0 : index
    %c0_227 = arith.constant 0 : index
    %346 = vector.load %arg15[%c2_225, %c0_226, %c0_227] : memref<4x128x32xf32, #tpu.memory_space<vmem>>, vector<1x128x32xf32>
    %347 = vector.shape_cast %346 : vector<1x128x32xf32> to vector<128x32xf32>
    %cst_228 = arith.constant dense<0.000000e+00> : vector<8x32xf32>
    %348 = tpu.matmul %216, %347, %cst_228 {dimension_numbers = #tpu.dot_dimension_numbers<[1], [0], [0], [1], [0, 0, 1, 1], [], []>} : vector<8x128xf32>, vector<128x32xf32>, vector<8x32xf32> -> vector<8x32xf32>
    %c2_229 = arith.constant 2 : index
    %c0_230 = arith.constant 0 : index
    %c0_231 = arith.constant 0 : index
    %349 = vector.load %arg16[%c2_229, %c0_230, %c0_231] : memref<4x1x32xf32, #tpu.memory_space<vmem>>, vector<1x1x32xf32>
    %350 = vector.shape_cast %349 : vector<1x1x32xf32> to vector<1x32xf32>
    %351 = vector.broadcast %350 : vector<1x32xf32> to vector<8x32xf32>
    %352 = arith.addf %348, %351 : vector<8x32xf32>
    %c2_232 = arith.constant 2 : index
    %c0_233 = arith.constant 0 : index
    %c0_234 = arith.constant 0 : index
    %353 = vector.load %arg17[%c2_232, %c0_233, %c0_234] : memref<4x128x32xf32, #tpu.memory_space<vmem>>, vector<1x128x32xf32>
    %354 = vector.shape_cast %353 : vector<1x128x32xf32> to vector<128x32xf32>
    %cst_235 = arith.constant dense<0.000000e+00> : vector<16x32xf32>
    %355 = tpu.matmul %5, %354, %cst_235 {dimension_numbers = #tpu.dot_dimension_numbers<[1], [0], [0], [1], [0, 0, 1, 1], [], []>} : vector<16x128xf32>, vector<128x32xf32>, vector<16x32xf32> -> vector<16x32xf32>
    %c2_236 = arith.constant 2 : index
    %c0_237 = arith.constant 0 : index
    %c0_238 = arith.constant 0 : index
    %356 = vector.load %arg18[%c2_236, %c0_237, %c0_238] : memref<4x1x32xf32, #tpu.memory_space<vmem>>, vector<1x1x32xf32>
    %357 = vector.shape_cast %356 : vector<1x1x32xf32> to vector<1x32xf32>
    %358 = vector.broadcast %357 : vector<1x32xf32> to vector<16x32xf32>
    %359 = arith.addf %355, %358 : vector<16x32xf32>
    %c2_239 = arith.constant 2 : index
    %c0_240 = arith.constant 0 : index
    %c0_241 = arith.constant 0 : index
    %360 = vector.load %arg19[%c2_239, %c0_240, %c0_241] : memref<4x128x32xf32, #tpu.memory_space<vmem>>, vector<1x128x32xf32>
    %361 = vector.shape_cast %360 : vector<1x128x32xf32> to vector<128x32xf32>
    %cst_242 = arith.constant dense<0.000000e+00> : vector<16x32xf32>
    %362 = tpu.matmul %5, %361, %cst_242 {dimension_numbers = #tpu.dot_dimension_numbers<[1], [0], [0], [1], [0, 0, 1, 1], [], []>} : vector<16x128xf32>, vector<128x32xf32>, vector<16x32xf32> -> vector<16x32xf32>
    %c2_243 = arith.constant 2 : index
    %c0_244 = arith.constant 0 : index
    %c0_245 = arith.constant 0 : index
    %363 = vector.load %arg20[%c2_243, %c0_244, %c0_245] : memref<4x1x32xf32, #tpu.memory_space<vmem>>, vector<1x1x32xf32>
    %364 = vector.shape_cast %363 : vector<1x1x32xf32> to vector<1x32xf32>
    %365 = vector.broadcast %364 : vector<1x32xf32> to vector<16x32xf32>
    %366 = arith.addf %362, %365 : vector<16x32xf32>
    %c0_246 = arith.constant 0 : index
    %c0_247 = arith.constant 0 : index
    %367 = vector.load %arg23[%c0_246, %c0_247] : memref<1x32xf32, #tpu.memory_space<vmem>>, vector<1x32xf32>
    %368 = arith.mulf %352, %352 : vector<8x32xf32>
    %cst_248 = arith.constant dense<0.000000e+00> : vector<8xf32>
    %369 = vector.multi_reduction <add>, %368, %cst_248 [1] : vector<8x32xf32> to vector<8xf32>
    %370 = vector.shape_cast %369 : vector<8xf32> to vector<8x1xf32>
    %cst_249 = arith.constant 3.200000e+01 : f32
    %371 = vector.broadcast %cst_249 : f32 to vector<8x1xf32>
    %372 = arith.divf %370, %371 : vector<8x1xf32>
    %cst_250 = arith.constant 9.99999997E-7 : f32
    %373 = vector.broadcast %cst_250 : f32 to vector<8x1xf32>
    %374 = arith.addf %372, %373 : vector<8x1xf32>
    %375 = math.rsqrt %374 : vector<8x1xf32>
    %376 = vector.broadcast %375 : vector<8x1xf32> to vector<8x32xf32>
    %377 = arith.mulf %352, %376 : vector<8x32xf32>
    %378 = vector.broadcast %367 : vector<1x32xf32> to vector<8x32xf32>
    %379 = arith.mulf %377, %378 : vector<8x32xf32>
    %c0_251 = arith.constant 0 : index
    %c0_252 = arith.constant 0 : index
    %380 = vector.load %arg24[%c0_251, %c0_252] : memref<1x32xf32, #tpu.memory_space<vmem>>, vector<1x32xf32>
    %381 = arith.mulf %359, %359 : vector<16x32xf32>
    %cst_253 = arith.constant dense<0.000000e+00> : vector<16xf32>
    %382 = vector.multi_reduction <add>, %381, %cst_253 [1] : vector<16x32xf32> to vector<16xf32>
    %383 = vector.shape_cast %382 : vector<16xf32> to vector<16x1xf32>
    %cst_254 = arith.constant 3.200000e+01 : f32
    %384 = vector.broadcast %cst_254 : f32 to vector<16x1xf32>
    %385 = arith.divf %383, %384 : vector<16x1xf32>
    %cst_255 = arith.constant 9.99999997E-7 : f32
    %386 = vector.broadcast %cst_255 : f32 to vector<16x1xf32>
    %387 = arith.addf %385, %386 : vector<16x1xf32>
    %388 = math.rsqrt %387 : vector<16x1xf32>
    %389 = vector.broadcast %388 : vector<16x1xf32> to vector<16x32xf32>
    %390 = arith.mulf %359, %389 : vector<16x32xf32>
    %391 = vector.broadcast %380 : vector<1x32xf32> to vector<16x32xf32>
    %392 = arith.mulf %390, %391 : vector<16x32xf32>
    %cst_256 = arith.constant dense<0.000000e+00> : vector<8x16xf32>
    %393 = tpu.matmul %379, %392, %cst_256 {dimension_numbers = #tpu.dot_dimension_numbers<[1], [1], [0], [0], [0, 0, 1, 0], [], []>} : vector<8x32xf32>, vector<16x32xf32>, vector<8x16xf32> -> vector<8x16xf32>
    %cst_257 = arith.constant 0.176776692 : f32
    %394 = vector.broadcast %cst_257 : f32 to vector<8x16xf32>
    %395 = arith.mulf %393, %394 : vector<8x16xf32>
    %cst_258 = arith.constant dense<0xFF800000> : vector<8xf32>
    %396 = vector.multi_reduction <maximumf>, %395, %cst_258 [1] : vector<8x16xf32> to vector<8xf32>
    %397 = vector.shape_cast %396 : vector<8xf32> to vector<8x1xf32>
    %398 = vector.broadcast %397 : vector<8x1xf32> to vector<8x16xf32>
    %399 = arith.subf %395, %398 : vector<8x16xf32>
    %400 = math.exp %399 : vector<8x16xf32>
    %cst_259 = arith.constant dense<0.000000e+00> : vector<8xf32>
    %401 = vector.multi_reduction <add>, %400, %cst_259 [1] : vector<8x16xf32> to vector<8xf32>
    %402 = vector.shape_cast %401 : vector<8xf32> to vector<8x1xf32>
    %403 = vector.broadcast %402 : vector<8x1xf32> to vector<8x16xf32>
    %404 = arith.divf %400, %403 : vector<8x16xf32>
    %cst_260 = arith.constant dense<0.000000e+00> : vector<8x32xf32>
    %405 = tpu.matmul %404, %366, %cst_260 {dimension_numbers = #tpu.dot_dimension_numbers<[1], [0], [0], [1], [0, 0, 1, 1], [], []>} : vector<8x16xf32>, vector<16x32xf32>, vector<8x32xf32> -> vector<8x32xf32>
    %c2_261 = arith.constant 2 : index
    %c0_262 = arith.constant 0 : index
    %c0_263 = arith.constant 0 : index
    %406 = vector.load %arg21[%c2_261, %c0_262, %c0_263] : memref<4x32x128xf32, #tpu.memory_space<vmem>>, vector<1x32x128xf32>
    %407 = vector.shape_cast %406 : vector<1x32x128xf32> to vector<32x128xf32>
    %cst_264 = arith.constant dense<0.000000e+00> : vector<8x128xf32>
    %408 = tpu.matmul %405, %407, %cst_264 {dimension_numbers = #tpu.dot_dimension_numbers<[1], [0], [0], [1], [0, 0, 1, 1], [], []>} : vector<8x32xf32>, vector<32x128xf32>, vector<8x128xf32> -> vector<8x128xf32>
    %409 = arith.addf %345, %408 : vector<8x128xf32>
    %c3_265 = arith.constant 3 : index
    %c0_266 = arith.constant 0 : index
    %c0_267 = arith.constant 0 : index
    %410 = vector.load %arg15[%c3_265, %c0_266, %c0_267] : memref<4x128x32xf32, #tpu.memory_space<vmem>>, vector<1x128x32xf32>
    %411 = vector.shape_cast %410 : vector<1x128x32xf32> to vector<128x32xf32>
    %cst_268 = arith.constant dense<0.000000e+00> : vector<8x32xf32>
    %412 = tpu.matmul %216, %411, %cst_268 {dimension_numbers = #tpu.dot_dimension_numbers<[1], [0], [0], [1], [0, 0, 1, 1], [], []>} : vector<8x128xf32>, vector<128x32xf32>, vector<8x32xf32> -> vector<8x32xf32>
    %c3_269 = arith.constant 3 : index
    %c0_270 = arith.constant 0 : index
    %c0_271 = arith.constant 0 : index
    %413 = vector.load %arg16[%c3_269, %c0_270, %c0_271] : memref<4x1x32xf32, #tpu.memory_space<vmem>>, vector<1x1x32xf32>
    %414 = vector.shape_cast %413 : vector<1x1x32xf32> to vector<1x32xf32>
    %415 = vector.broadcast %414 : vector<1x32xf32> to vector<8x32xf32>
    %416 = arith.addf %412, %415 : vector<8x32xf32>
    %c3_272 = arith.constant 3 : index
    %c0_273 = arith.constant 0 : index
    %c0_274 = arith.constant 0 : index
    %417 = vector.load %arg17[%c3_272, %c0_273, %c0_274] : memref<4x128x32xf32, #tpu.memory_space<vmem>>, vector<1x128x32xf32>
    %418 = vector.shape_cast %417 : vector<1x128x32xf32> to vector<128x32xf32>
    %cst_275 = arith.constant dense<0.000000e+00> : vector<16x32xf32>
    %419 = tpu.matmul %5, %418, %cst_275 {dimension_numbers = #tpu.dot_dimension_numbers<[1], [0], [0], [1], [0, 0, 1, 1], [], []>} : vector<16x128xf32>, vector<128x32xf32>, vector<16x32xf32> -> vector<16x32xf32>
    %c3_276 = arith.constant 3 : index
    %c0_277 = arith.constant 0 : index
    %c0_278 = arith.constant 0 : index
    %420 = vector.load %arg18[%c3_276, %c0_277, %c0_278] : memref<4x1x32xf32, #tpu.memory_space<vmem>>, vector<1x1x32xf32>
    %421 = vector.shape_cast %420 : vector<1x1x32xf32> to vector<1x32xf32>
    %422 = vector.broadcast %421 : vector<1x32xf32> to vector<16x32xf32>
    %423 = arith.addf %419, %422 : vector<16x32xf32>
    %c3_279 = arith.constant 3 : index
    %c0_280 = arith.constant 0 : index
    %c0_281 = arith.constant 0 : index
    %424 = vector.load %arg19[%c3_279, %c0_280, %c0_281] : memref<4x128x32xf32, #tpu.memory_space<vmem>>, vector<1x128x32xf32>
    %425 = vector.shape_cast %424 : vector<1x128x32xf32> to vector<128x32xf32>
    %cst_282 = arith.constant dense<0.000000e+00> : vector<16x32xf32>
    %426 = tpu.matmul %5, %425, %cst_282 {dimension_numbers = #tpu.dot_dimension_numbers<[1], [0], [0], [1], [0, 0, 1, 1], [], []>} : vector<16x128xf32>, vector<128x32xf32>, vector<16x32xf32> -> vector<16x32xf32>
    %c3_283 = arith.constant 3 : index
    %c0_284 = arith.constant 0 : index
    %c0_285 = arith.constant 0 : index
    %427 = vector.load %arg20[%c3_283, %c0_284, %c0_285] : memref<4x1x32xf32, #tpu.memory_space<vmem>>, vector<1x1x32xf32>
    %428 = vector.shape_cast %427 : vector<1x1x32xf32> to vector<1x32xf32>
    %429 = vector.broadcast %428 : vector<1x32xf32> to vector<16x32xf32>
    %430 = arith.addf %426, %429 : vector<16x32xf32>
    %c0_286 = arith.constant 0 : index
    %c0_287 = arith.constant 0 : index
    %431 = vector.load %arg23[%c0_286, %c0_287] : memref<1x32xf32, #tpu.memory_space<vmem>>, vector<1x32xf32>
    %432 = arith.mulf %416, %416 : vector<8x32xf32>
    %cst_288 = arith.constant dense<0.000000e+00> : vector<8xf32>
    %433 = vector.multi_reduction <add>, %432, %cst_288 [1] : vector<8x32xf32> to vector<8xf32>
    %434 = vector.shape_cast %433 : vector<8xf32> to vector<8x1xf32>
    %cst_289 = arith.constant 3.200000e+01 : f32
    %435 = vector.broadcast %cst_289 : f32 to vector<8x1xf32>
    %436 = arith.divf %434, %435 : vector<8x1xf32>
    %cst_290 = arith.constant 9.99999997E-7 : f32
    %437 = vector.broadcast %cst_290 : f32 to vector<8x1xf32>
    %438 = arith.addf %436, %437 : vector<8x1xf32>
    %439 = math.rsqrt %438 : vector<8x1xf32>
    %440 = vector.broadcast %439 : vector<8x1xf32> to vector<8x32xf32>
    %441 = arith.mulf %416, %440 : vector<8x32xf32>
    %442 = vector.broadcast %431 : vector<1x32xf32> to vector<8x32xf32>
    %443 = arith.mulf %441, %442 : vector<8x32xf32>
    %c0_291 = arith.constant 0 : index
    %c0_292 = arith.constant 0 : index
    %444 = vector.load %arg24[%c0_291, %c0_292] : memref<1x32xf32, #tpu.memory_space<vmem>>, vector<1x32xf32>
    %445 = arith.mulf %423, %423 : vector<16x32xf32>
    %cst_293 = arith.constant dense<0.000000e+00> : vector<16xf32>
    %446 = vector.multi_reduction <add>, %445, %cst_293 [1] : vector<16x32xf32> to vector<16xf32>
    %447 = vector.shape_cast %446 : vector<16xf32> to vector<16x1xf32>
    %cst_294 = arith.constant 3.200000e+01 : f32
    %448 = vector.broadcast %cst_294 : f32 to vector<16x1xf32>
    %449 = arith.divf %447, %448 : vector<16x1xf32>
    %cst_295 = arith.constant 9.99999997E-7 : f32
    %450 = vector.broadcast %cst_295 : f32 to vector<16x1xf32>
    %451 = arith.addf %449, %450 : vector<16x1xf32>
    %452 = math.rsqrt %451 : vector<16x1xf32>
    %453 = vector.broadcast %452 : vector<16x1xf32> to vector<16x32xf32>
    %454 = arith.mulf %423, %453 : vector<16x32xf32>
    %455 = vector.broadcast %444 : vector<1x32xf32> to vector<16x32xf32>
    %456 = arith.mulf %454, %455 : vector<16x32xf32>
    %cst_296 = arith.constant dense<0.000000e+00> : vector<8x16xf32>
    %457 = tpu.matmul %443, %456, %cst_296 {dimension_numbers = #tpu.dot_dimension_numbers<[1], [1], [0], [0], [0, 0, 1, 0], [], []>} : vector<8x32xf32>, vector<16x32xf32>, vector<8x16xf32> -> vector<8x16xf32>
    %cst_297 = arith.constant 0.176776692 : f32
    %458 = vector.broadcast %cst_297 : f32 to vector<8x16xf32>
    %459 = arith.mulf %457, %458 : vector<8x16xf32>
    %cst_298 = arith.constant dense<0xFF800000> : vector<8xf32>
    %460 = vector.multi_reduction <maximumf>, %459, %cst_298 [1] : vector<8x16xf32> to vector<8xf32>
    %461 = vector.shape_cast %460 : vector<8xf32> to vector<8x1xf32>
    %462 = vector.broadcast %461 : vector<8x1xf32> to vector<8x16xf32>
    %463 = arith.subf %459, %462 : vector<8x16xf32>
    %464 = math.exp %463 : vector<8x16xf32>
    %cst_299 = arith.constant dense<0.000000e+00> : vector<8xf32>
    %465 = vector.multi_reduction <add>, %464, %cst_299 [1] : vector<8x16xf32> to vector<8xf32>
    %466 = vector.shape_cast %465 : vector<8xf32> to vector<8x1xf32>
    %467 = vector.broadcast %466 : vector<8x1xf32> to vector<8x16xf32>
    %468 = arith.divf %464, %467 : vector<8x16xf32>
    %cst_300 = arith.constant dense<0.000000e+00> : vector<8x32xf32>
    %469 = tpu.matmul %468, %430, %cst_300 {dimension_numbers = #tpu.dot_dimension_numbers<[1], [0], [0], [1], [0, 0, 1, 1], [], []>} : vector<8x16xf32>, vector<16x32xf32>, vector<8x32xf32> -> vector<8x32xf32>
    %c3_301 = arith.constant 3 : index
    %c0_302 = arith.constant 0 : index
    %c0_303 = arith.constant 0 : index
    %470 = vector.load %arg21[%c3_301, %c0_302, %c0_303] : memref<4x32x128xf32, #tpu.memory_space<vmem>>, vector<1x32x128xf32>
    %471 = vector.shape_cast %470 : vector<1x32x128xf32> to vector<32x128xf32>
    %cst_304 = arith.constant dense<0.000000e+00> : vector<8x128xf32>
    %472 = tpu.matmul %469, %471, %cst_304 {dimension_numbers = #tpu.dot_dimension_numbers<[1], [0], [0], [1], [0, 0, 1, 1], [], []>} : vector<8x32xf32>, vector<32x128xf32>, vector<8x128xf32> -> vector<8x128xf32>
    %473 = arith.addf %409, %472 : vector<8x128xf32>
    %c0_305 = arith.constant 0 : index
    %c0_306 = arith.constant 0 : index
    %474 = vector.load %arg22[%c0_305, %c0_306] : memref<1x128xf32, #tpu.memory_space<vmem>>, vector<1x128xf32>
    %475 = vector.broadcast %474 : vector<1x128xf32> to vector<8x128xf32>
    %476 = arith.addf %473, %475 : vector<8x128xf32>
    %477 = vector.broadcast %19 : vector<1x128xf32> to vector<8x128xf32>
    %478 = arith.mulf %477, %476 : vector<8x128xf32>
    %479 = arith.addf %203, %478 : vector<8x128xf32>
    %cst_307 = arith.constant dense<0.000000e+00> : vector<8xf32>
    %480 = vector.multi_reduction <add>, %479, %cst_307 [1] : vector<8x128xf32> to vector<8xf32>
    %481 = vector.shape_cast %480 : vector<8xf32> to vector<8x1xf32>
    %cst_308 = arith.constant 1.280000e+02 : f32
    %482 = vector.broadcast %cst_308 : f32 to vector<8x1xf32>
    %483 = arith.divf %481, %482 : vector<8x1xf32>
    %484 = vector.broadcast %483 : vector<8x1xf32> to vector<8x128xf32>
    %485 = arith.subf %479, %484 : vector<8x128xf32>
    %486 = arith.mulf %485, %485 : vector<8x128xf32>
    %cst_309 = arith.constant dense<0.000000e+00> : vector<8xf32>
    %487 = vector.multi_reduction <add>, %486, %cst_309 [1] : vector<8x128xf32> to vector<8xf32>
    %488 = vector.shape_cast %487 : vector<8xf32> to vector<8x1xf32>
    %cst_310 = arith.constant 1.280000e+02 : f32
    %489 = vector.broadcast %cst_310 : f32 to vector<8x1xf32>
    %490 = arith.divf %488, %489 : vector<8x1xf32>
    %cst_311 = arith.constant 9.99999997E-7 : f32
    %491 = vector.broadcast %cst_311 : f32 to vector<8x1xf32>
    %492 = arith.addf %490, %491 : vector<8x1xf32>
    %493 = math.rsqrt %492 : vector<8x1xf32>
    %494 = vector.broadcast %493 : vector<8x1xf32> to vector<8x128xf32>
    %495 = arith.mulf %485, %494 : vector<8x128xf32>
    %cst_312 = arith.constant 1.000000e+00 : f32
    %496 = vector.broadcast %cst_312 : f32 to vector<1x128xf32>
    %497 = arith.addf %496, %21 : vector<1x128xf32>
    %498 = vector.broadcast %497 : vector<1x128xf32> to vector<8x128xf32>
    %499 = arith.mulf %495, %498 : vector<8x128xf32>
    %500 = vector.broadcast %20 : vector<1x128xf32> to vector<8x128xf32>
    %501 = arith.addf %499, %500 : vector<8x128xf32>
    %c0_313 = arith.constant 0 : index
    %c0_314 = arith.constant 0 : index
    %502 = vector.load %arg25[%c0_313, %c0_314] : memref<128x512xf32, #tpu.memory_space<vmem>>, vector<128x512xf32>
    %cst_315 = arith.constant dense<0.000000e+00> : vector<8x512xf32>
    %503 = tpu.matmul %501, %502, %cst_315 {dimension_numbers = #tpu.dot_dimension_numbers<[1], [0], [0], [1], [0, 0, 1, 1], [], []>} : vector<8x128xf32>, vector<128x512xf32>, vector<8x512xf32> -> vector<8x512xf32>
    %c0_316 = arith.constant 0 : index
    %c0_317 = arith.constant 0 : index
    %504 = vector.load %arg26[%c0_316, %c0_317] : memref<1x512xf32, #tpu.memory_space<vmem>>, vector<1x512xf32>
    %505 = vector.broadcast %504 : vector<1x512xf32> to vector<8x512xf32>
    %506 = arith.addf %503, %505 : vector<8x512xf32>
    %cst_318 = arith.constant 5.000000e-01 : f32
    %507 = vector.broadcast %cst_318 : f32 to vector<8x512xf32>
    %508 = arith.mulf %507, %506 : vector<8x512xf32>
    %cst_319 = arith.constant 4.471500e-02 : f32
    %509 = vector.broadcast %cst_319 : f32 to vector<8x512xf32>
    %510 = arith.mulf %509, %506 : vector<8x512xf32>
    %511 = arith.mulf %510, %506 : vector<8x512xf32>
    %512 = arith.mulf %511, %506 : vector<8x512xf32>
    %513 = arith.addf %506, %512 : vector<8x512xf32>
    %cst_320 = arith.constant 0.797884583 : f32
    %514 = vector.broadcast %cst_320 : f32 to vector<8x512xf32>
    %515 = arith.mulf %514, %513 : vector<8x512xf32>
    %516 = math.tanh %515 : vector<8x512xf32>
    %cst_321 = arith.constant 1.000000e+00 : f32
    %517 = vector.broadcast %cst_321 : f32 to vector<8x512xf32>
    %518 = arith.addf %517, %516 : vector<8x512xf32>
    %519 = arith.mulf %508, %518 : vector<8x512xf32>
    %c0_322 = arith.constant 0 : index
    %c0_323 = arith.constant 0 : index
    %520 = vector.load %arg27[%c0_322, %c0_323] : memref<512x128xf32, #tpu.memory_space<vmem>>, vector<512x128xf32>
    %cst_324 = arith.constant dense<0.000000e+00> : vector<8x128xf32>
    %521 = tpu.matmul %519, %520, %cst_324 {dimension_numbers = #tpu.dot_dimension_numbers<[1], [0], [0], [1], [0, 0, 1, 1], [], []>} : vector<8x512xf32>, vector<512x128xf32>, vector<8x128xf32> -> vector<8x128xf32>
    %c0_325 = arith.constant 0 : index
    %c0_326 = arith.constant 0 : index
    %522 = vector.load %arg28[%c0_325, %c0_326] : memref<1x128xf32, #tpu.memory_space<vmem>>, vector<1x128xf32>
    %523 = vector.broadcast %522 : vector<1x128xf32> to vector<8x128xf32>
    %524 = arith.addf %521, %523 : vector<8x128xf32>
    %525 = vector.broadcast %22 : vector<1x128xf32> to vector<8x128xf32>
    %526 = arith.mulf %525, %524 : vector<8x128xf32>
    %527 = arith.addf %479, %526 : vector<8x128xf32>
    %c0_327 = arith.constant 0 : index
    %c0_328 = arith.constant 0 : index
    %c0_329 = arith.constant 0 : index
    %528 = vector.load %arg29[%c0_327, %c0_328, %c0_329] : memref<1x8x128xf32, #tpu.memory_space<vmem>>, vector<1x8x128xf32>
    %529 = vector.shape_cast %528 : vector<1x8x128xf32> to vector<8x128xf32>
    %530 = vector.shape_cast %527 : vector<8x128xf32> to vector<1x8x128xf32>
    tpu.vector_store %arg29[%c0_327, %c0_328, %c0_329], %530 {strides = array<i32>} : memref<1x8x128xf32, #tpu.memory_space<vmem>>, vector<1x8x128xf32>,
    return
  }
  func.func @transform_0(%arg0: i32) -> (i32, i32, i32) {
    %c0_i32 = arith.constant 0 : i32
    %c0_i32_0 = arith.constant 0 : i32
    %c0_i32_1 = arith.constant 0 : i32
    return %arg0, %c0_i32, %c0_i32_0 : i32, i32, i32
  }
  func.func @transform_1(%arg0: i32) -> (i32, i32, i32) {
    %c0_i32 = arith.constant 0 : i32
    %c0_i32_0 = arith.constant 0 : i32
    %c0_i32_1 = arith.constant 0 : i32
    return %arg0, %c0_i32, %c0_i32_0 : i32, i32, i32
  }
  func.func @transform_2(%arg0: i32) -> (i32, i32, i32) {
    %c0_i32 = arith.constant 0 : i32
    %c0_i32_0 = arith.constant 0 : i32
    %c0_i32_1 = arith.constant 0 : i32
    return %arg0, %c0_i32, %c0_i32_0 : i32, i32, i32
  }
  func.func @transform_3(%arg0: i32) -> (i32, i32) {
    %c0_i32 = arith.constant 0 : i32
    %c0_i32_0 = arith.constant 0 : i32
    %c0_i32_1 = arith.constant 0 : i32
    return %c0_i32, %c0_i32_0 : i32, i32
  }
  func.func @transform_4(%arg0: i32) -> (i32, i32) {
    %c0_i32 = arith.constant 0 : i32
    %c0_i32_0 = arith.constant 0 : i32
    %c0_i32_1 = arith.constant 0 : i32
    return %c0_i32, %c0_i32_0 : i32, i32
  }
  func.func @transform_5(%arg0: i32) -> (i32, i32, i32) {
    %c0_i32 = arith.constant 0 : i32
    %c0_i32_0 = arith.constant 0 : i32
    %c0_i32_1 = arith.constant 0 : i32
    %c0_i32_2 = arith.constant 0 : i32
    return %c0_i32, %c0_i32_0, %c0_i32_1 : i32, i32, i32
  }
  func.func @transform_6(%arg0: i32) -> (i32, i32, i32) {
    %c0_i32 = arith.constant 0 : i32
    %c0_i32_0 = arith.constant 0 : i32
    %c0_i32_1 = arith.constant 0 : i32
    %c0_i32_2 = arith.constant 0 : i32
    return %c0_i32, %c0_i32_0, %c0_i32_1 : i32, i32, i32
  }
  func.func @transform_7(%arg0: i32) -> (i32, i32, i32) {
    %c0_i32 = arith.constant 0 : i32
    %c0_i32_0 = arith.constant 0 : i32
    %c0_i32_1 = arith.constant 0 : i32
    %c0_i32_2 = arith.constant 0 : i32
    return %c0_i32, %c0_i32_0, %c0_i32_1 : i32, i32, i32
  }
  func.func @transform_8(%arg0: i32) -> (i32, i32, i32) {
    %c0_i32 = arith.constant 0 : i32
    %c0_i32_0 = arith.constant 0 : i32
    %c0_i32_1 = arith.constant 0 : i32
    %c0_i32_2 = arith.constant 0 : i32
    return %c0_i32, %c0_i32_0, %c0_i32_1 : i32, i32, i32
  }
  func.func @transform_9(%arg0: i32) -> (i32, i32, i32) {
    %c0_i32 = arith.constant 0 : i32
    %c0_i32_0 = arith.constant 0 : i32
    %c0_i32_1 = arith.constant 0 : i32
    %c0_i32_2 = arith.constant 0 : i32
    return %c0_i32, %c0_i32_0, %c0_i32_1 : i32, i32, i32
  }
  func.func @transform_10(%arg0: i32) -> (i32, i32, i32) {
    %c0_i32 = arith.constant 0 : i32
    %c0_i32_0 = arith.constant 0 : i32
    %c0_i32_1 = arith.constant 0 : i32
    %c0_i32_2 = arith.constant 0 : i32
    return %c0_i32, %c0_i32_0, %c0_i32_1 : i32, i32, i32
  }
  func.func @transform_11(%arg0: i32) -> (i32, i32, i32) {
    %c0_i32 = arith.constant 0 : i32
    %c0_i32_0 = arith.constant 0 : i32
    %c0_i32_1 = arith.constant 0 : i32
    %c0_i32_2 = arith.constant 0 : i32
    return %c0_i32, %c0_i32_0, %c0_i32_1 : i32, i32, i32
  }
  func.func @transform_12(%arg0: i32) -> (i32, i32) {
    %c0_i32 = arith.constant 0 : i32
    %c0_i32_0 = arith.constant 0 : i32
    %c0_i32_1 = arith.constant 0 : i32
    return %c0_i32, %c0_i32_0 : i32, i32
  }
  func.func @transform_13(%arg0: i32) -> (i32, i32) {
    %c0_i32 = arith.constant 0 : i32
    %c0_i32_0 = arith.constant 0 : i32
    %c0_i32_1 = arith.constant 0 : i32
    return %c0_i32, %c0_i32_0 : i32, i32
  }
  func.func @transform_14(%arg0: i32) -> (i32, i32, i32) {
    %c0_i32 = arith.constant 0 : i32
    %c0_i32_0 = arith.constant 0 : i32
    %c0_i32_1 = arith.constant 0 : i32
    %c0_i32_2 = arith.constant 0 : i32
    return %c0_i32, %c0_i32_0, %c0_i32_1 : i32, i32, i32
  }
  func.func @transform_15(%arg0: i32) -> (i32, i32, i32) {
    %c0_i32 = arith.constant 0 : i32
    %c0_i32_0 = arith.constant 0 : i32
    %c0_i32_1 = arith.constant 0 : i32
    %c0_i32_2 = arith.constant 0 : i32
    return %c0_i32, %c0_i32_0, %c0_i32_1 : i32, i32, i32
  }
  func.func @transform_16(%arg0: i32) -> (i32, i32, i32) {
    %c0_i32 = arith.constant 0 : i32
    %c0_i32_0 = arith.constant 0 : i32
    %c0_i32_1 = arith.constant 0 : i32
    %c0_i32_2 = arith.constant 0 : i32
    return %c0_i32, %c0_i32_0, %c0_i32_1 : i32, i32, i32
  }
  func.func @transform_17(%arg0: i32) -> (i32, i32, i32) {
    %c0_i32 = arith.constant 0 : i32
    %c0_i32_0 = arith.constant 0 : i32
    %c0_i32_1 = arith.constant 0 : i32
    %c0_i32_2 = arith.constant 0 : i32
    return %c0_i32, %c0_i32_0, %c0_i32_1 : i32, i32, i32
  }
  func.func @transform_18(%arg0: i32) -> (i32, i32, i32) {
    %c0_i32 = arith.constant 0 : i32
    %c0_i32_0 = arith.constant 0 : i32
    %c0_i32_1 = arith.constant 0 : i32
    %c0_i32_2 = arith.constant 0 : i32
    return %c0_i32, %c0_i32_0, %c0_i32_1 : i32, i32, i32
  }
  func.func @transform_19(%arg0: i32) -> (i32, i32, i32) {
    %c0_i32 = arith.constant 0 : i32
    %c0_i32_0 = arith.constant 0 : i32
    %c0_i32_1 = arith.constant 0 : i32
    %c0_i32_2 = arith.constant 0 : i32
    return %c0_i32, %c0_i32_0, %c0_i32_1 : i32, i32, i32
  }
  func.func @transform_20(%arg0: i32) -> (i32, i32, i32) {
    %c0_i32 = arith.constant 0 : i32
    %c0_i32_0 = arith.constant 0 : i32
    %c0_i32_1 = arith.constant 0 : i32
    %c0_i32_2 = arith.constant 0 : i32
    return %c0_i32, %c0_i32_0, %c0_i32_1 : i32, i32, i32
  }
  func.func @transform_21(%arg0: i32) -> (i32, i32) {
    %c0_i32 = arith.constant 0 : i32
    %c0_i32_0 = arith.constant 0 : i32
    %c0_i32_1 = arith.constant 0 : i32
    return %c0_i32, %c0_i32_0 : i32, i32
  }
  func.func @transform_22(%arg0: i32) -> (i32, i32) {
    %c0_i32 = arith.constant 0 : i32
    %c0_i32_0 = arith.constant 0 : i32
    %c0_i32_1 = arith.constant 0 : i32
    return %c0_i32, %c0_i32_0 : i32, i32
  }
  func.func @transform_23(%arg0: i32) -> (i32, i32) {
    %c0_i32 = arith.constant 0 : i32
    %c0_i32_0 = arith.constant 0 : i32
    %c0_i32_1 = arith.constant 0 : i32
    return %c0_i32, %c0_i32_0 : i32, i32
  }
  func.func @transform_24(%arg0: i32) -> (i32, i32) {
    %c0_i32 = arith.constant 0 : i32
    %c0_i32_0 = arith.constant 0 : i32
    %c0_i32_1 = arith.constant 0 : i32
    return %c0_i32, %c0_i32_0 : i32, i32
  }
  func.func @transform_25(%arg0: i32) -> (i32, i32) {
    %c0_i32 = arith.constant 0 : i32
    %c0_i32_0 = arith.constant 0 : i32
    %c0_i32_1 = arith.constant 0 : i32
    return %c0_i32, %c0_i32_0 : i32, i32
  }
  func.func @transform_26(%arg0: i32) -> (i32, i32) {
    %c0_i32 = arith.constant 0 : i32
    %c0_i32_0 = arith.constant 0 : i32
    %c0_i32_1 = arith.constant 0 : i32
    return %c0_i32, %c0_i32_0 : i32, i32
  }
  func.func @transform_27(%arg0: i32) -> (i32, i32) {
    %c0_i32 = arith.constant 0 : i32
    %c0_i32_0 = arith.constant 0 : i32
    %c0_i32_1 = arith.constant 0 : i32
    return %c0_i32, %c0_i32_0 : i32, i32
  }
  func.func @transform_28(%arg0: i32) -> (i32, i32, i32) {
    %c0_i32 = arith.constant 0 : i32
    %c0_i32_0 = arith.constant 0 : i32
    %c0_i32_1 = arith.constant 0 : i32
    return %arg0, %c0_i32, %c0_i32_0 : i32, i32, i32
  }
}

</mosaic_0001>

<bundles_post_ra>
// kernel: tpu_custom_call.1
= control target key start
LH: loop header
LB: loop body
LE: loop exit
PB: predicated region body
PF: predicated region fallthrough
CT: control target
= control target key end

     0   :  { %s11586_s0 = inlined_call_operand.vmem [shape: f32[2,8,128], index: 0, kind: input, shape index: {}]   ;;  %s11587_s1 = inlined_call_operand.vmem [shape: f32[2,1,128], index: 1, kind: input, shape index: {}]   ;;  %s11588_s2 = inlined_call_operand.vmem [shape: f32[2,16,128], index: 2, kind: input, shape index: {}]   ;;  %s11589_s3 = inlined_call_operand.vmem [shape: f32[128,896], index: 3, kind: input, shape index: {}]   ;;  %s11590_s4 = inlined_call_operand.vmem [shape: f32[1,896], index: 4, kind: input, shape index: {}]   ;;  %s11591_s5 = inlined_call_operand.vmem [shape: f32[4,128,32], index: 5, kind: input, shape index: {}]   ;;  %s11592_s6 = inlined_call_operand.vmem [shape: f32[4,1,32], index: 6, kind: input, shape index: {}]   ;;  %s11593_s7 = inlined_call_operand.vmem [shape: f32[4,128,32], index: 7, kind: input, shape index: {}]   ;;  %s11594_s8 = inlined_call_operand.vmem [shape: f32[4,1,32], index: 8, kind: input, shape index: {}]   ;;  %s11595_s9 = inlined_call_operand.vmem [shape: f32[4,128,32], index: 9, kind: input, shape index: {}]   ;;  %s11596_s10 = inlined_call_operand.vmem [shape: f32[4,1,32], index: 10, kind: input, shape index: {}]   ;;  %s11597_s11 = inlined_call_operand.vmem [shape: f32[4,32,128], index: 11, kind: input, shape index: {}]   ;;  %s11598_s12 = inlined_call_operand.vmem [shape: f32[1,128], index: 12, kind: input, shape index: {}]   ;;  %s11599_s13 = inlined_call_operand.vmem [shape: f32[1,128], index: 13, kind: input, shape index: {}]   ;;  %s11600_s14 = inlined_call_operand.vmem [shape: f32[4,128,32], index: 14, kind: input, shape index: {}]   ;;  %s11601_s15 = inlined_call_operand.vmem [shape: f32[4,1,32], index: 15, kind: input, shape index: {}]   ;;  %s11602_s16 = inlined_call_operand.vmem [shape: f32[4,128,32], index: 16, kind: input, shape index: {}]   ;;  %s11603_s17 = inlined_call_operand.vmem [shape: f32[4,1,32], index: 17, kind: input, shape index: {}]   ;;  %s11604_s18 = inlined_call_operand.vmem [shape: f32[4,128,32], index: 18, kind: input, shape index: {}]   ;;  %s11605_s19 = inlined_call_operand.vmem [shape: f32[4,1,32], index: 19, kind: input, shape index: {}]   ;;  %s11606_s20 = inlined_call_operand.vmem [shape: f32[4,32,128], index: 20, kind: input, shape index: {}]   ;;  %s11607_s21 = inlined_call_operand.vmem [shape: f32[1,128], index: 21, kind: input, shape index: {}]   ;;  %s11608_s22 = inlined_call_operand.vmem [shape: f32[1,32], index: 22, kind: input, shape index: {}]   ;;  %s11609_s23 = inlined_call_operand.vmem [shape: f32[1,32], index: 23, kind: input, shape index: {}]   ;;  %s11610_s24 = inlined_call_operand.vmem [shape: f32[128,512], index: 24, kind: input, shape index: {}]   ;;  %s11611_s25 = inlined_call_operand.vmem [shape: f32[1,512], index: 25, kind: input, shape index: {}]   ;;  %s11612_s26 = inlined_call_operand.vmem [shape: f32[512,128], index: 26, kind: input, shape index: {}]   ;;  %s11613_s27 = inlined_call_operand.vmem [shape: f32[1,128], index: 27, kind: input, shape index: {}]   ;;  %s11614_s28 = inlined_call_operand.hbm [shape: f32[2,8,128], index: 28, kind: output, shape index: {}]  }
   0x1   :  { %11642 = sst [smem:[#allocation14_spill]] %s11586_s0 }
   0x2   :  { %11643 = sst [smem:[#allocation15_spill]] %s11587_s1 }
   0x3   :  { %11644 = sst [smem:[#allocation16_spill]] %s11588_s2 }
   0x4   :  { %11645 = sst [smem:[#allocation17_spill]] %s11589_s3 }
   0x5   :  { %11646 = sst [smem:[#allocation18_spill]] %s11590_s4 }
   0x6   :  { %11647 = sst [smem:[#allocation19_spill]] %s11591_s5 }
   0x7   :  { %11648 = sst [smem:[#allocation20_spill]] %s11592_s6 }
   0x8   :  { %11649 = sst [smem:[#allocation21_spill]] %s11593_s7 }
   0x9   :  { %11650 = sst [smem:[#allocation22_spill]] %s11594_s8 }
   0xa   :  { %11651 = sst [smem:[#allocation23_spill]] %s11595_s9 }
   0xb   :  { %11652 = sst [smem:[#allocation24_spill]] %s11596_s10 }
   0xc   :  { %11653 = sst [smem:[#allocation25_spill]] %s11597_s11 }
   0xd   :  { %11654 = sst [smem:[#allocation26_spill]] %s11598_s12 }
   0xe   :  { %11655 = sst [smem:[#allocation27_spill]] %s11611_s25 }
   0xf   :  { %11656 = sst [smem:[#allocation28_spill]] %s11613_s27 }
  0x10   :  { %11657 = sst [smem:[#allocation29_spill]] %s11614_s28 }
  0x11   :  { %33 = vsyncpa [#allocation3], 0 }
  0x12   :  { %35 = vsyncpa [#allocation3 + $0x1], 0  ;;  %s8726_s8 = smov 0   ;;  %s8728_s5 = smov 0  }
  0x13   :  { %s8730_s9 = smov 0   ;;  %s8732_s30 = smov 0  }
  0x14 LB: > { %11658 = sst [smem:[#allocation5_spill]] %s8564_s8  ;;  %s8747_s3 = sadd.s32 4294967295, %s8576_s30   ;;  %s8576_s30 = sphi %s8732_s30, %s11695_s30   ;;  %s8572_s9 = sphi %s8730_s9, %s11698_s9   ;;  %s8568_s5 = sphi %s8728_s5, %s11697_s5   ;;  %s8564_s8 = sphi %s8726_s8, %s11696_s8  }
  0x15   : > { %11659 = sst [smem:[#allocation6_spill]] %s8568_s5  ;;  %s6342_s6 = sadd.s32 4294967294, %s8576_s30  }
  0x16   : > { %11660 = sst [smem:[#allocation7_spill]] %s8572_s9  ;;  %s8751_s10 = sadd.s32 1, %s8576_s30  }
  0x17   : > { %11661 = sst [smem:[#allocation8_spill]] %s8576_s30  ;;  %s651_s0 = sadd.s32 1, %s8572_s9 }
  0x18   : > { %11662 = sst [smem:[#allocation9_spill]] %s8747_s3  ;;  %s648_s11 = ssub.s32 %s8576_s30, %s8751_s10 }
  0x19   : > { %11663 = sst [smem:[#allocation10_spill]] %s8751_s10  ;;  %p661_p0 = scmp.ne.s32.totalorder %s8572_s9, %s8568_s5 }
  0x1a   : > { %p649_p1 = scmp.eq.s32.totalorder %s648_s11, 0  ;;  %p662_p2 = scmp.eq.s32.totalorder %s8747_s3, 1 }
  0x1b   : > { %p667_p3 = scmp.ne.s32.totalorder %s8568_s5, %s8564_s8  ;;  %p668_p4 = scmp.eq.s32.totalorder %s6342_s6, 1 }
  0x1c   : > { %s8762_s29 = scalar_select %p649_p1, %s8572_s9, %s651_s0  }
  0x1d   : > { %p8764_p5 = por %p662_p2, %p661_p0  ;;  %p8768_p6 = por %p668_p4, %p667_p3 }
  0x1e   : > { %11664 = sst [smem:[#allocation11_spill]] %s8762_s29  ;;  %p6345_p7 = scmp.ge.s32.totalorder %s8576_s30, 1 }
  0x1f   : > { %s11665_s2 = scalar_select %p8764_p5, 1, 0 }
  0x20   : > { %s11667_s7 = scalar_select %p8768_p6, 1, 0 }
  0x21   : > { %11666 = sst [smem:[#allocation12_spill]] %s11665_s2  ;;  %p782_p8 = scmp.lt.s32.totalorder %s8576_s30, 3 }
  0x22   : > { %11668 = sst [smem:[#allocation13_spill]] %s11667_s7 }
  0x23   : > { %p783_p9 = pnand %p6345_p7, %p782_p8 }
  0x24   : > { %p863_p10 = scmp.lt.s32.totalorder (!%p783_p9), %s8747_s3, 1  ;;  %s11669_s4 = sld [smem:[#allocation17_spill]] (!%p783_p9) }
  0x25   : > { %786 = sbr.rel (%p783_p9) target bundleno = 9288 (0x2448), region = 132  ;;  %s11670_s30 = sld [smem:[#allocation14_spill]] (!%p783_p9) }
  0x26   : > { %s11671_s12 = sld [smem:[#allocation15_spill]] (!%p783_p9) }
  0x27   : > { %s11672_s2 = sld [smem:[#allocation19_spill]] (!%p783_p9) }
  0x28   : > { %s11679_s10 = sld [smem:[#allocation20_spill]] (!%p783_p9) }
  0x29   : > { %s11686_s6 = sld [smem:[#allocation6_spill]] (!%p783_p9) }
  0x2a   : > { %v992_v0 = vld [vmem:[%s11669_s4 + $0x350] sm:$0xff]  ;;  %v991_v1 = vld [vmem:[%s11669_s4 + $0x348] sm:$0xff]  ;;  %v985_v2 = vld [vmem:[%s11669_s4 + $0x318] sm:$0xff]  ;;  %v8578_v4 = vmov 0.0   ;;  %s8789_s7 = scalar_select %p863_p10, %s8747_s3, 1  ;;  %vm8579_vm0 = vmmov 0  }
  0x2b   : > { %1035 = vmatprep.subr.mxu0 %v992_v0  ;;  %v984_v3 = vld [vmem:[%s11669_s4 + $0x310] sm:$0xff]  ;;  %1099 = vmatprep.mubr.f32.mxu0 %v8578_v4  ;;  %v978_v5 = vld [vmem:[%s11669_s4 + $0x2e0] sm:$0xff]  ;;  %v977_v6 = vld [vmem:[%s11669_s4 + $0x2d8] sm:$0xff]  ;;  %vm1620_vm1 = vcmask 261120   ;;  %vm1698_vm2 = vcmask 64512   ;;  %s11682_s3 = sld [smem:[#allocation25_spill]] }
  0x2c   : > { %1036 = vmatpush1.msra.mxu0 %v991_v1  ;;  %1170 = vmatprep.mubr.f32.mxu1 %v8578_v4  ;;  %s6347_s9 = sshll.u32 %s8789_s7, 3  ;;  %v971_v7 = vld [vmem:[%s11669_s4 + $0x2a8] sm:$0xff]  ;;  %v970_v8 = vld [vmem:[%s11669_s4 + $0x2a0] sm:$0xff]  ;;  %v964_v10 = vld [vmem:[%s11669_s4 + $0x270] sm:$0xff]  ;;  %s869_s1 = scalar_lea.vmem %s11671_s12, %s8789_s7  ;;  %vm3874_vm3 = vcmask 130048  }
  0x2d   : > { %1037 = vmatprep.subr.mxu0 %v985_v2  ;;  %s8805_s28 = scalar_lea.vmem %s11670_s30, %s6347_s9  ;;  %v963_v11 = vld [vmem:[%s11669_s4 + $0x268] sm:$0xff]  ;;  %v957_v12 = vld [vmem:[%s11669_s4 + $0x238] sm:$0xff]  ;;  %v956_v13 = vld [vmem:[%s11669_s4 + $0x230] sm:$0xff]  ;;  %s11673_s9 = sld [smem:[#allocation21_spill]] }
  0x2e   : > { %1038 = vmatpush1.msra.mxu0 %v984_v3  ;;  %v8811_v9 = vld [vmem:[%s8805_s28] sm:$0xff]  ;;  %v949_v15 = vld [vmem:[%s11669_s4 + $0x1f8] sm:$0xff]  ;;  %v943_v17 = vld [vmem:[%s11669_s4 + $0x1c8] sm:$0xff]  ;;  %s11675_s30 = sld [smem:[#allocation18_spill]]  ;;  %s6751_s8 = sshll.u32 %s8789_s7, 4 }
  0x2f   : > { %1039 = vmatprep.subr.mxu0 %v978_v5  ;;  %1318 = vadd.xlane.f32.xlu0 %v8811_v9  ;;  %v950_v14 = vld [vmem:[%s11669_s4 + $0x200] sm:$0xff]  ;;  %v936_v20 = vld [vmem:[%s11669_s4 + $0x190] sm:$0xff]  ;;  %v935_v21 = vld [vmem:[%s11669_s4 + $0x188] sm:$0xff]  ;;  %s11677_s12 = sld [smem:[#allocation23_spill]] }
  0x30   : > { %1040 = vmatpush1.msra.mxu0 %v977_v6  ;;  %v8836_v16 = vld [vmem:[%s869_s1] sm:$0x1]  ;;  %v929_v22 = vld [vmem:[%s11669_s4 + $0x158] sm:$0xff]  ;;  %v928_v23 = vld [vmem:[%s11669_s4 + $0x150] sm:$0xff]  ;;  %s11678_s1 = sld [smem:[#allocation22_spill]] }
  0x31   : > { %1041 = vmatprep.subr.mxu0 %v971_v7  ;;  %v6350_v18 = vmul.f32 -1.442695, %v8836_v16  ;;  %v942_v19 = vld [vmem:[%s11669_s4 + $0x1c0] sm:$0xff]  ;;  %v921_v25 = vld [vmem:[%s11669_s4 + $0x118] sm:$0xff]  ;;  %v915_v26 = vld [vmem:[%s11669_s4 + $0xe8] sm:$0xff]  ;;  %s11684_s7 = sld [smem:[#allocation26_spill]] }
  0x32   : > { %1042 = vmatpush1.msra.mxu0 %v970_v8  ;;  %v922_v24 = vld [vmem:[%s11669_s4 + $0x120] sm:$0xff]  ;;  %v908_v28 = vld [vmem:[%s11669_s4 + $0xb0] sm:$0xff]  ;;  %v907_v29 = vld [vmem:[%s11669_s4 + $0xa8] sm:$0xff] }
  0x33   : > { %1043 = vmatprep.subr.mxu0 %v964_v10  ;;  %8435 = vpow2.f32 %v6350_v18  ;;  %v914_v27 = vld [vmem:[%s11669_s4 + $0xe0] sm:$0xff]  ;;  %v993_v31 = vld [vmem:[%s11669_s4 + $0x358] sm:$0xff]  ;;  %v987_v32 = vld [vmem:[%s11669_s4 + $0x328] sm:$0xff]  ;;  %s11674_s0 = smov %s11673_s9 }
  0x34   : > { %1044 = vmatpush1.msra.mxu0 %v963_v11  ;;  %v994_v30 = vld [vmem:[%s11669_s4 + $0x360] sm:$0xff]  ;;  %v901_v33 = vld [vmem:[%s11669_s4 + $0x78] sm:$0xff]  ;;  %v900_v35 = vld [vmem:[%s11669_s4 + $0x70] sm:$0xff]  ;;  %s11676_s27 = smov %s11675_s30 }
  0x35   : > { %1045 = vmatprep.subr.mxu0 %v957_v12  ;;  %1106 = vmatprep.subr.mxu1 %v994_v30  ;;  %v986_v34 = vld [vmem:[%s11669_s4 + $0x320] sm:$0xff]  ;;  %v980_v36 = vld [vmem:[%s11669_s4 + $0x2f0] sm:$0xff]  ;;  %v979_v38 = vld [vmem:[%s11669_s4 + $0x2e8] sm:$0xff] }
  0x36   : > { %1046 = vmatpush1.msra.mxu0 %v956_v13  ;;  %1107 = vmatpush1.msra.mxu1 %v993_v31  ;;  %v894_v37 = vld [vmem:[%s11669_s4 + $0x40] sm:$0xff]  ;;  %v893_v40 = vld [vmem:[%s11669_s4 + $0x38] sm:$0xff]  ;;  %v887_v42 = vld [vmem:[%s11669_s4 + $0x8] sm:$0xff] }
  0x37   : > { %1047 = vmatprep.subr.mxu0 %v950_v14  ;;  %1108 = vmatprep.subr.mxu1 %v987_v32  ;;  %v973_v41 = vld [vmem:[%s11669_s4 + $0x2b8] sm:$0xff]  ;;  %v972_v44 = vld [vmem:[%s11669_s4 + $0x2b0] sm:$0xff]  ;;  %v886_v45 = vld [vmem:[%s11669_s4] sm:$0xff] }
  0x38   : > { %1048 = vmatpush1.msra.mxu0 %v949_v15  ;;  %1109 = vmatpush1.msra.mxu1 %v986_v34  ;;  %v966_v46 = vld [vmem:[%s11669_s4 + $0x280] sm:$0xff]  ;;  %v965_v47 = vld [vmem:[%s11669_s4 + $0x278] sm:$0xff]  ;;  %v959_v48 = vld [vmem:[%s11669_s4 + $0x248] sm:$0xff] }
  0x39   : > { %1049 = vmatprep.subr.mxu0 %v943_v17  ;;  %1110 = vmatprep.subr.mxu1 %v980_v36  ;;  %v958_v49 = vld [vmem:[%s11669_s4 + $0x240] sm:$0xff]  ;;  %v952_v50 = vld [vmem:[%s11669_s4 + $0x210] sm:$0xff]  ;;  %v951_v52 = vld [vmem:[%s11669_s4 + $0x208] sm:$0xff] }
  0x3a   : > { %1050 = vmatpush1.msra.mxu0 %v942_v19  ;;  %1111 = vmatpush1.msra.mxu1 %v979_v38  ;;  %v996_v51 = vld [vmem:[%s11669_s4 + $0x370] sm:$0xff]  ;;  %v945_v53 = vld [vmem:[%s11669_s4 + $0x1d8] sm:$0xff]  ;;  %v938_v55 = vld [vmem:[%s11669_s4 + $0x1a0] sm:$0xff] }
  0x3b   : > { %1051 = vmatprep.subr.mxu0 %v936_v20  ;;  %1112 = vmatprep.subr.mxu1 %v973_v41  ;;  %v944_v54 = vld [vmem:[%s11669_s4 + $0x1d0] sm:$0xff]  ;;  %v937_v56 = vld [vmem:[%s11669_s4 + $0x198] sm:$0xff]  ;;  %v931_v57 = vld [vmem:[%s11669_s4 + $0x168] sm:$0xff] }
  0x3c   : > { %1052 = vmatpush1.msra.mxu0 %v935_v21  ;;  %1113 = vmatpush1.msra.mxu1 %v972_v44  ;;  %v930_v58 = vld [vmem:[%s11669_s4 + $0x160] sm:$0xff]  ;;  %v924_v59 = vld [vmem:[%s11669_s4 + $0x130] sm:$0xff]  ;;  %v923_v60 = vld [vmem:[%s11669_s4 + $0x128] sm:$0xff] }
  0x3d   : > { %1053 = vmatprep.subr.mxu0 %v929_v22  ;;  %1114 = vmatprep.subr.mxu1 %v966_v46  ;;  %v917_v62 = vld [vmem:[%s11669_s4 + $0xf8] sm:$0xff]  ;;  %v916_v0 = vld [vmem:[%s11669_s4 + $0xf0] sm:$0xff]  ;;  %v995_v1 = vld [vmem:[%s11669_s4 + $0x368] sm:$0xff] }
  0x3e   : > { %1054 = vmatpush1.msra.mxu0 %v928_v23  ;;  %1115 = vmatpush1.msra.mxu1 %v965_v47  ;;  %v910_v2 = vld [vmem:[%s11669_s4 + $0xc0] sm:$0xff]  ;;  %v989_v3 = vld [vmem:[%s11669_s4 + $0x338] sm:$0xff]  ;;  %v988_v6 = vld [vmem:[%s11669_s4 + $0x330] sm:$0xff] }
  0x3f   : > { %1055 = vmatprep.subr.mxu0 %v922_v24  ;;  %1116 = vmatprep.subr.mxu1 %v959_v48  ;;  %v909_v5 = vld [vmem:[%s11669_s4 + $0xb8] sm:$0xff]  ;;  %v903_v7 = vld [vmem:[%s11669_s4 + $0x88] sm:$0xff]  ;;  %v982_v8 = vld [vmem:[%s11669_s4 + $0x300] sm:$0xff] }
  0x40   : > { %1056 = vmatpush1.msra.mxu0 %v921_v25  ;;  %v8436_v39 = vpop.eup %8435  ;;  %1117 = vmatpush1.msra.mxu1 %v958_v49  ;;  %v902_v10 = vld [vmem:[%s11669_s4 + $0x80] sm:$0xff]  ;;  %v981_v11 = vld [vmem:[%s11669_s4 + $0x2f8] sm:$0xff]  ;;  %v896_v12 = vld [vmem:[%s11669_s4 + $0x50] sm:$0xff] }
  0x41   : > { %1057 = vmatprep.subr.mxu0 %v915_v26  ;;  %v882_v43 = vadd.f32 1.0, %v8436_v39  ;;  %1118 = vmatprep.subr.mxu1 %v952_v50  ;;  %v975_v13 = vld [vmem:[%s11669_s4 + $0x2c8] sm:$0xff]  ;;  %v974_v15 = vld [vmem:[%s11669_s4 + $0x2c0] sm:$0xff]  ;;  %v968_v17 = vld [vmem:[%s11669_s4 + $0x290] sm:$0xff] }
  0x42   : > { %1058 = vmatpush1.msra.mxu0 %v914_v27  ;;  %1119 = vmatpush1.msra.mxu1 %v951_v52  ;;  %v895_v14 = vld [vmem:[%s11669_s4 + $0x48] sm:$0xff]  ;;  %v888_v18 = vld [vmem:[%s11669_s4 + $0x10] sm:$0xff]  ;;  %v997_v20 = vld [vmem:[%s11669_s4 + $0x378] sm:$0xff] }
  0x43   : > { %1059 = vmatprep.subr.mxu0 %v908_v28  ;;  %8437 = vrcp.f32 %v882_v43  ;;  %1120 = vmatprep.subr.mxu1 %v945_v53  ;;  %v967_v19 = vld [vmem:[%s11669_s4 + $0x288] sm:$0xff]  ;;  %v961_v21 = vld [vmem:[%s11669_s4 + $0x258] sm:$0xff]  ;;  %v960_v22 = vld [vmem:[%s11669_s4 + $0x250] sm:$0xff] }
  0x44   : > { %1060 = vmatpush1.msra.mxu0 %v907_v29  ;;  %1121 = vmatpush1.msra.mxu1 %v944_v54  ;;  %v990_v23 = vld [vmem:[%s11669_s4 + $0x340] sm:$0xff]  ;;  %v953_v25 = vld [vmem:[%s11669_s4 + $0x218] sm:$0xff]  ;;  %v983_v26 = vld [vmem:[%s11669_s4 + $0x308] sm:$0xff] }
  0x45   : > { %1061 = vmatprep.subr.mxu0 %v901_v33  ;;  %1122 = vmatprep.subr.mxu1 %v938_v55  ;;  %v954_v24 = vld [vmem:[%s11669_s4 + $0x220] sm:$0xff]  ;;  %v947_v27 = vld [vmem:[%s11669_s4 + $0x1e8] sm:$0xff]  ;;  %v976_v29 = vld [vmem:[%s11669_s4 + $0x2d0] sm:$0xff] }
  0x46   : > { %1062 = vmatpush1.msra.mxu0 %v900_v35  ;;  %1123 = vmatpush1.msra.mxu1 %v937_v56  ;;  %v946_v28 = vld [vmem:[%s11669_s4 + $0x1e0] sm:$0xff]  ;;  %v940_v30 = vld [vmem:[%s11669_s4 + $0x1b0] sm:$0xff]  ;;  %v939_v31 = vld [vmem:[%s11669_s4 + $0x1a8] sm:$0xff] }
  0x47   : > { %1063 = vmatprep.subr.mxu0 %v894_v37  ;;  %1124 = vmatprep.subr.mxu1 %v931_v57  ;;  %v969_v32 = vld [vmem:[%s11669_s4 + $0x298] sm:$0xff]  ;;  %v932_v34 = vld [vmem:[%s11669_s4 + $0x170] sm:$0xff]  ;;  %v962_v35 = vld [vmem:[%s11669_s4 + $0x260] sm:$0xff] }
  0x48   : > { %1064 = vmatpush1.msra.mxu0 %v893_v40  ;;  %1125 = vmatpush1.msra.mxu1 %v930_v58  ;;  %v933_v33 = vld [vmem:[%s11669_s4 + $0x178] sm:$0xff]  ;;  %v926_v36 = vld [vmem:[%s11669_s4 + $0x140] sm:$0xff]  ;;  %v955_v38 = vld [vmem:[%s11669_s4 + $0x228] sm:$0xff] }
  0x49   : > { %1065 = vmatprep.subr.mxu0 %v887_v42  ;;  %1126 = vmatprep.subr.mxu1 %v924_v59  ;;  %v925_v37 = vld [vmem:[%s11669_s4 + $0x138] sm:$0xff]  ;;  %v919_v39 = vld [vmem:[%s11669_s4 + $0x108] sm:$0xff]  ;;  %v918_v40 = vld [vmem:[%s11669_s4 + $0x100] sm:$0xff] }
  0x4a   : > { %1066 = vmatpush1.msra.mxu0 %v886_v45  ;;  %1127 = vmatpush1.msra.mxu1 %v923_v60  ;;  %v948_v41 = vld [vmem:[%s11669_s4 + $0x1f0] sm:$0xff]  ;;  %v911_v43 = vld [vmem:[%s11669_s4 + $0xc8] sm:$0xff]  ;;  %v941_v44 = vld [vmem:[%s11669_s4 + $0x1b8] sm:$0xff] }
  0x4b   : > { %1177 = vmatprep.subr.mxu0 %v996_v51  ;;  %1128 = vmatprep.subr.mxu1 %v917_v62  ;;  %v912_v42 = vld [vmem:[%s11669_s4 + $0xd0] sm:$0xff]  ;;  %v905_v45 = vld [vmem:[%s11669_s4 + $0x98] sm:$0xff]  ;;  %v934_v47 = vld [vmem:[%s11669_s4 + $0x180] sm:$0xff] }
  0x4c   : > { %1129 = vmatpush1.msra.mxu1 %v916_v0  ;;  %v904_v46 = vld [vmem:[%s11669_s4 + $0x90] sm:$0xff]  ;;  %v898_v48 = vld [vmem:[%s11669_s4 + $0x60] sm:$0xff]  ;;  %v897_v49 = vld [vmem:[%s11669_s4 + $0x58] sm:$0xff] }
  0x4d   : > { %1130 = vmatprep.subr.mxu1 %v910_v2  ;;  %v927_v50 = vld [vmem:[%s11669_s4 + $0x148] sm:$0xff]  ;;  %v890_v52 = vld [vmem:[%s11669_s4 + $0x20] sm:$0xff]  ;;  %v920_v53 = vld [vmem:[%s11669_s4 + $0x110] sm:$0xff] }
  0x4e   : > { %1131 = vmatpush1.msra.mxu1 %v909_v5  ;;  %v891_v51 = vld [vmem:[%s11669_s4 + $0x28] sm:$0xff]  ;;  %v913_v54 = vld [vmem:[%s11669_s4 + $0xd8] sm:$0xff]  ;;  %v906_v55 = vld [vmem:[%s11669_s4 + $0xa0] sm:$0xff] }
  0x4f   : > { %1132 = vmatprep.subr.mxu1 %v903_v7  ;;  %v1356_v56 = vld [vmem:[%s11672_s2 + $0x78] sm:$0xff]  ;;  %v899_v57 = vld [vmem:[%s11669_s4 + $0x68] sm:$0xff]  ;;  %v1355_v58 = vld [vmem:[%s11672_s2 + $0x70] sm:$0xff] }
  0x50   : > { %v8438_v61 = vpop.eup %8437  ;;  %1133 = vmatpush1.msra.mxu1 %v902_v10  ;;  %v892_v59 = vld [vmem:[%s11669_s4 + $0x30] sm:$0xff]  ;;  %v1354_v60 = vld [vmem:[%s11672_s2 + $0x68] sm:$0xff]  ;;  %v1353_v62 = vld [vmem:[%s11672_s2 + $0x60] sm:$0xff] }
  0x51   : > { %v8966_v63 = vmul.f32 %v8438_v61, %v8836_v16  ;;  %v889_v16 = vld [vmem:[%s11669_s4 + $0x18] sm:$0xff]  ;;  %1134 = vmatprep.subr.mxu1 %v896_v12  ;;  %v1448_v0 = vld [vmem:[%s11674_s0 + $0x70] sm:$0xff]  ;;  %v1443_v12 = vld [vmem:[%s11674_s0 + $0x48] sm:$0xff] }
  0x52   : > { %1135 = vmatpush1.msra.mxu1 %v895_v14  ;;  %v1449_v61 = vld [vmem:[%s11673_s9 + $0x78] sm:$0xff]  ;;  %v1444_v10 = vld [vmem:[%s11674_s0 + $0x50] sm:$0xff]  ;;  %v1442_v14 = vld [vmem:[%s11674_s0 + $0x40] sm:$0xff]  ;;  %s11680_s9 = sld [smem:[#allocation24_spill]] }
  0x53   : > { %1100 = vmatmul.mubr.f32.vlgmr.msra.gmra.mxu0 %v8966_v63  ;;  %1136 = vmatprep.subr.mxu1 %v889_v16  ;;  %v1352_v7 = vld [vmem:[%s11672_s2 + $0x58] sm:$0xff] }
  0x54   : > { %1178 = vmatpush1.msra.mxu0 %v995_v1  ;;  %1137 = vmatpush1.msra.mxu1 %v888_v18  ;;  %v1447_v1 = vld [vmem:[%s11674_s0 + $0x68] sm:$0xff]  ;;  %v1441_v16 = vld [vmem:[%s11674_s0 + $0x38] sm:$0xff]  ;;  %v1440_v18 = vld [vmem:[%s11674_s0 + $0x30] sm:$0xff] }
  0x55   : > { %1179 = vmatprep.subr.mxu0 %v989_v3  ;;  %1171 = vmatmul.mubr.f32.vlgmr.msra.gmra.mxu1 %v8966_v63 }
  0x56   : > { %1180 = vmatpush1.msra.mxu0 %v988_v6  ;;  %7335 = vmatprep.subr.mxu1 %v8578_v4 }
  0x57   : > { %1181 = vmatprep.subr.mxu0 %v982_v8  ;;  %7336 = vmatpush3.msra.mxu1 %v997_v20  ;;  %v1445_v8 = vld [vmem:[%s11674_s0 + $0x58] sm:$0xff]  ;;  %v1439_v20 = vld [vmem:[%s11674_s0 + $0x28] sm:$0xff] }
  0x58   : > { %1182 = vmatpush1.msra.mxu0 %v981_v11  ;;  %7337 = vmatprep.subr.mxu1 %v8578_v4  ;;  %v1350_v11 = vld [vmem:[%s11672_s2 + $0x48] sm:$0xff]  ;;  %s11681_s11 = smov %s11680_s9 }
  0x59   : > { %1183 = vmatprep.subr.mxu0 %v975_v13  ;;  %7338 = vmatpush3.msra.mxu1 %v990_v23  ;;  %v1349_v13 = vld [vmem:[%s11672_s2 + $0x40] sm:$0xff]  ;;  %v1344_v23 = vld [vmem:[%s11672_s2 + $0x18] sm:$0xff] }
  0x5a   : > { %1184 = vmatpush1.msra.mxu0 %v974_v15  ;;  %7339 = vmatprep.subr.mxu1 %v8578_v4  ;;  %v1348_v15 = vld [vmem:[%s11672_s2 + $0x38] sm:$0xff] }
  0x5b   : > { %1185 = vmatprep.subr.mxu0 %v968_v17  ;;  %7340 = vmatpush3.msra.mxu1 %v983_v26  ;;  %v1347_v17 = vld [vmem:[%s11672_s2 + $0x30] sm:$0xff] }
  0x5c   : > { %1186 = vmatpush1.msra.mxu0 %v967_v19  ;;  %7341 = vmatprep.subr.mxu1 %v8578_v4  ;;  %v1346_v19 = vld [vmem:[%s11672_s2 + $0x28] sm:$0xff]  ;;  %v1436_v26 = vld [vmem:[%s11674_s0 + $0x10] sm:$0xff] }
  0x5d   : > { %1187 = vmatprep.subr.mxu0 %v961_v21  ;;  %7342 = vmatpush3.msra.mxu1 %v976_v29  ;;  %v1345_v21 = vld [vmem:[%s11672_s2 + $0x20] sm:$0xff] }
  0x5e   : > { %1188 = vmatpush1.msra.mxu0 %v960_v22  ;;  %7343 = vmatprep.subr.mxu1 %v8578_v4  ;;  %v1438_v22 = vld [vmem:[%s11674_s0 + $0x20] sm:$0xff] }
  0x5f   : > { %1189 = vmatprep.subr.mxu0 %v954_v24  ;;  %7344 = vmatpush3.msra.mxu1 %v969_v32  ;;  %v1437_v24 = vld [vmem:[%s11674_s0 + $0x18] sm:$0xff]  ;;  %v1341_v29 = vld [vmem:[%s11672_s2] sm:$0xff] }
  0x60   : > { %1190 = vmatpush1.msra.mxu0 %v953_v25  ;;  %7345 = vmatprep.subr.mxu1 %v8578_v4  ;;  %v1343_v25 = vld [vmem:[%s11672_s2 + $0x10] sm:$0xff] }
  0x61   : > { %1191 = vmatprep.subr.mxu0 %v947_v27  ;;  %7346 = vmatpush3.msra.mxu1 %v962_v35  ;;  %v1342_v27 = vld [vmem:[%s11672_s2 + $0x8] sm:$0xff]  ;;  %v1000_v35 = vlaneseq }
  0x62   : > { %1192 = vmatpush1.msra.mxu0 %v946_v28  ;;  %7347 = vmatprep.subr.mxu1 %v8578_v4  ;;  %v1435_v28 = vld [vmem:[%s11674_s0 + $0x8] sm:$0xff] }
  0x63   : > { %1193 = vmatprep.subr.mxu0 %v940_v30  ;;  %7348 = vmatpush3.msra.mxu1 %v955_v38  ;;  %v1434_v30 = vld [vmem:[%s11674_s0] sm:$0xff] }
  0x64   : > { %1194 = vmatpush1.msra.mxu0 %v939_v31  ;;  %7349 = vmatprep.subr.mxu1 %v8578_v4 }
  0x65   : > { %1195 = vmatprep.subr.mxu0 %v933_v33  ;;  %7350 = vmatpush3.msra.mxu1 %v948_v41  ;;  %v998_v41 = vld [vmem:[%s11675_s30] sm:$0xff]  ;;  %s11688_s30 = sld [smem:[#allocation28_spill]] }
  0x66   : > { %1196 = vmatpush1.msra.mxu0 %v932_v34  ;;  %7351 = vmatprep.subr.mxu1 %v8578_v4 }
  0x67   : > { %1197 = vmatprep.subr.mxu0 %v926_v36  ;;  %7352 = vmatpush3.msra.mxu1 %v941_v44  ;;  %v9304_v36 = vshrl.u32 %v1000_v35, 7 }
  0x68   : > { %1198 = vmatpush1.msra.mxu0 %v925_v37  ;;  %7353 = vmatprep.subr.mxu1 %v8578_v4 }
  0x69   : > { %1199 = vmatprep.subr.mxu0 %v919_v39  ;;  %7354 = vmatpush3.msra.mxu1 %v934_v47 }
  0x6a   : > { %1200 = vmatpush1.msra.mxu0 %v918_v40  ;;  %7355 = vmatprep.subr.mxu1 %v8578_v4  ;;  %v1006_v40 = vsub.s32 1, %v9304_v36 }
  0x6b   : > { %1201 = vmatprep.subr.mxu0 %v912_v42  ;;  %7356 = vmatpush3.msra.mxu1 %v927_v50 }
  0x6c   : > { %1202 = vmatpush1.msra.mxu0 %v911_v43  ;;  %7357 = vmatprep.subr.mxu1 %v8578_v4  ;;  %v1007_v43 = vrot.slane %v998_v41, %v1006_v40 }
  0x6d   : > { %1203 = vmatprep.subr.mxu0 %v905_v45  ;;  %7358 = vmatpush3.msra.mxu1 %v920_v53  ;;  %v9313_v45 = vsub.s32 0, %v9304_v36 }
  0x6e   : > { %1204 = vmatpush1.msra.mxu0 %v904_v46  ;;  %7367 = vmatprep.mubr.msk.f32.mxu1 %vm8579_vm0, %v8578_v4 }
  0x6f   : > { %1205 = vmatprep.subr.mxu0 %v898_v48  ;;  %7359 = vmatprep.subr.mxu1 %v8578_v4  ;;  %v1003_v47 = vrot.slane %v998_v41, %v9313_v45 }
  0x70   : > { %1206 = vmatpush1.msra.mxu0 %v897_v49  ;;  %1241 = vmatprep.mubr.f32.mxu0 %v8578_v4 }
  0x71   : > { %1207 = vmatprep.subr.mxu0 %v891_v51  ;;  %7360 = vmatpush3.msra.mxu1 %v913_v54 }
  0x72   : > { %1208 = vmatpush1.msra.mxu0 %v890_v52  ;;  %7361 = vmatprep.subr.mxu1 %v8578_v4 }
  0x73   : > { %7370 = vmatprep.subr.mxu0 %v8578_v4  ;;  %1242 = vmatmul.mubr.f32.vlgmr.msra.gmra.mxu0 %v8966_v63 }
  0x74   : > { %7362 = vmatpush3.msra.mxu1 %v906_v55  ;;  %7371 = vmatpush3.msra.mxu0 %v1356_v56  ;;  %v1542_v56 = vld [vmem:[%s11677_s12 + $0x78] sm:$0xff] }
  0x75   : > { %7363 = vmatprep.subr.mxu1 %v8578_v4  ;;  %7372 = vmatprep.subr.mxu0 %v8578_v4 }
  0x76   : > { %7364 = vmatpush3.msra.mxu1 %v899_v57  ;;  %7373 = vmatpush3.msra.mxu0 %v1355_v58  ;;  %v1541_v57 = vld [vmem:[%s11677_s12 + $0x70] sm:$0xff]  ;;  %v1540_v58 = vld [vmem:[%s11677_s12 + $0x68] sm:$0xff] }
  0x77   : > { %7365 = vmatprep.subr.mxu1 %v8578_v4  ;;  %7374 = vmatprep.subr.mxu0 %v8578_v4 }
  0x78   : > { %7366 = vmatpush3.msra.mxu1 %v892_v59  ;;  %7375 = vmatpush3.msra.mxu0 %v1354_v60  ;;  %v1539_v59 = vld [vmem:[%s11677_s12 + $0x60] sm:$0xff]  ;;  %v1538_v60 = vld [vmem:[%s11677_s12 + $0x58] sm:$0xff] }
  0x79   : > { %7368 = vmatmul.mubr.f32.vlgmr.msra.gmra.mxu1 %v8966_v63  ;;  %7405 = vmatprep.subr.mxu1 %v8578_v4  ;;  %v1446_v63 = vld [vmem:[%s11674_s0 + $0x60] sm:$0xff] }
  0x7a   : > { %7406 = vmatpush3.msra.mxu1 %v1449_v61  ;;  %7376 = vmatprep.subr.mxu0 %v8578_v4  ;;  %v1537_v61 = vld [vmem:[%s11677_s12 + $0x50] sm:$0xff] }
  0x7b   : > { %7407 = vmatprep.subr.mxu1 %v8578_v4  ;;  %7377 = vmatpush3.msra.mxu0 %v1353_v62  ;;  %v1536_v62 = vld [vmem:[%s11677_s12 + $0x48] sm:$0xff] }
  0x7c   : > { %7408 = vmatpush3.msra.mxu1 %v1448_v0  ;;  %7378 = vmatprep.subr.mxu0 %v8578_v4  ;;  %v1535_v0 = vld [vmem:[%s11677_s12 + $0x40] sm:$0xff] }
  0x7d   : > { %7409 = vmatprep.subr.mxu1 %v8578_v4  ;;  %7402 = vmatprep.mubr.msk.f32.mxu0 %vm8579_vm0, %v8578_v4 }
  0x7e   : > { %7410 = vmatpush3.msra.mxu1 %v1447_v1  ;;  %7437 = vmatprep.mubr.msk.f32.mxu1 %vm8579_vm0, %v8578_v4  ;;  %v1534_v1 = vld [vmem:[%s11677_s12 + $0x38] sm:$0xff] }
  0x7f   : > { %7411 = vmatprep.subr.mxu1 %v8578_v4  ;;  %7379 = vmatpush3.msra.mxu0 %v1352_v7  ;;  %v1528_v7 = vld [vmem:[%s11677_s12 + $0x8] sm:$0xff] }
  0x80   : > { %7412 = vmatpush3.msra.mxu1 %v1446_v63  ;;  %7380 = vmatprep.subr.mxu0 %v8578_v4  ;;  %v1533_v63 = vld [vmem:[%s11677_s12 + $0x30] sm:$0xff] }
  0x81   : > { %7413 = vmatprep.subr.mxu1 %v8578_v4 }
  0x82   : > { %7414 = vmatpush3.msra.mxu1 %v1445_v8  ;;  %v1527_v8 = vld [vmem:[%s11677_s12] sm:$0xff] }
  0x83   : > { %7415 = vmatprep.subr.mxu1 %v8578_v4 }
  0x84   : > { %7416 = vmatpush3.msra.mxu1 %v1444_v10  ;;  %v6389_v10 = vld [vmem:[%s11674_s0 + $0xf0] sm:$0xff] }
  0x85   : > { %7417 = vmatprep.subr.mxu1 %v8578_v4 }
  0x86   : > { %7418 = vmatpush3.msra.mxu1 %v1443_v12  ;;  %v6387_v12 = vld [vmem:[%s11674_s0 + $0xe0] sm:$0xff] }
  0x87   : > { %7419 = vmatprep.subr.mxu1 %v8578_v4 }
  0x88   : > { %7420 = vmatpush3.msra.mxu1 %v1442_v14  ;;  %v6385_v14 = vld [vmem:[%s11674_s0 + $0xd0] sm:$0xff] }
  0x89   : > { %7421 = vmatprep.subr.mxu1 %v8578_v4 }
  0x8a   : > { %7422 = vmatpush3.msra.mxu1 %v1441_v16  ;;  %v6383_v16 = vld [vmem:[%s11674_s0 + $0xc0] sm:$0xff] }
  0x8b   : > { %7423 = vmatprep.subr.mxu1 %v8578_v4 }
  0x8c   : > { %7424 = vmatpush3.msra.mxu1 %v1440_v18  ;;  %v6381_v18 = vld [vmem:[%s11674_s0 + $0xb0] sm:$0xff] }
  0x8d   : > { %7425 = vmatprep.subr.mxu1 %v8578_v4 }
  0x8e   : > { %7426 = vmatpush3.msra.mxu1 %v1439_v20  ;;  %v6379_v20 = vld [vmem:[%s11674_s0 + $0xa0] sm:$0xff] }
  0x8f   : > { %7427 = vmatprep.subr.mxu1 %v8578_v4 }
  0x90   : > { %7428 = vmatpush3.msra.mxu1 %v1438_v22  ;;  %v6377_v22 = vld [vmem:[%s11674_s0 + $0x90] sm:$0xff] }
  0x91   : > { %7429 = vmatprep.subr.mxu1 %v8578_v4 }
  0x92   : > { %7430 = vmatpush3.msra.mxu1 %v1437_v24  ;;  %v6375_v24 = vld [vmem:[%s11674_s0 + $0x80] sm:$0xff] }
  0x93   : > { %7431 = vmatprep.subr.mxu1 %v8578_v4 }
  0x94   : > { %7432 = vmatpush3.msra.mxu1 %v1436_v26 }
  0x95   : > { %7433 = vmatprep.subr.mxu1 %v8578_v4 }
  0x96   : > { %7434 = vmatpush3.msra.mxu1 %v1435_v28 }
  0x97   : > { %7435 = vmatprep.subr.mxu1 %v8578_v4 }
  0x98   : > { %7436 = vmatpush3.msra.mxu1 %v1434_v30  ;;  %v6351_v30 = vld [vmem:[%s11679_s10] ss:$0 sm:$0xff] }
  0x99   : > { %7475 = vmatprep.subr.mxu1 %v8578_v4 }
  0xb8   : > { %v1319_v2 = vpop.xlane.xlu0 %1318 }
  0xb9   : > { %v1321_v3 = vmul.f32 0.0078125, %v1319_v2  ;;  %v1532_v2 = vld [vmem:[%s11677_s12 + $0x28] sm:$0xff] }
  0xbb   : > { %v9198_v5 = vsub.f32 %v8811_v9, %v1321_v3  ;;  %v1351_v9 = vld [vmem:[%s11672_s2 + $0x50] sm:$0xff]  ;;  %v1531_v3 = vld [vmem:[%s11677_s12 + $0x20] sm:$0xff] }
  0xbc   : > { %7381 = vmatpush3.msra.mxu0 %v1351_v9  ;;  %v6390_v9 = vld [vmem:[%s11674_s0 + $0xf8] sm:$0xff] }
  0xbd   : > { %v1323_v6 = vmul.f32 %v9198_v5, %v9198_v5  ;;  %7382 = vmatprep.subr.mxu0 %v8578_v4 }
  0xbe   : > { %7383 = vmatpush3.msra.mxu0 %v1350_v11  ;;  %v6388_v11 = vld [vmem:[%s11674_s0 + $0xe8] sm:$0xff] }
  0xbf   : > { %1324 = vadd.xlane.f32.xlu0 %v1323_v6  ;;  %7384 = vmatprep.subr.mxu0 %v8578_v4  ;;  %v1529_v6 = vld [vmem:[%s11677_s12 + $0x10] sm:$0xff] }
  0xc0   : > { %7385 = vmatpush3.msra.mxu0 %v1349_v13  ;;  %v6386_v13 = vld [vmem:[%s11674_s0 + $0xd8] sm:$0xff] }
  0xc1   : > { %7386 = vmatprep.subr.mxu0 %v8578_v4 }
  0xc2   : > { %7387 = vmatpush3.msra.mxu0 %v1348_v15  ;;  %v6384_v15 = vld [vmem:[%s11674_s0 + $0xc8] sm:$0xff] }
  0xc3   : > { %7388 = vmatprep.subr.mxu0 %v8578_v4 }
  0xc4   : > { %7389 = vmatpush3.msra.mxu0 %v1347_v17  ;;  %v6382_v17 = vld [vmem:[%s11674_s0 + $0xb8] sm:$0xff] }
  0xc5   : > { %7390 = vmatprep.subr.mxu0 %v8578_v4 }
  0xc6   : > { %7391 = vmatpush3.msra.mxu0 %v1346_v19  ;;  %v6380_v19 = vld [vmem:[%s11674_s0 + $0xa8] sm:$0xff] }
  0xc7   : > { %7392 = vmatprep.subr.mxu0 %v8578_v4 }
  0xc8   : > { %7393 = vmatpush3.msra.mxu0 %v1345_v21  ;;  %v6378_v21 = vld [vmem:[%s11674_s0 + $0x98] sm:$0xff] }
  0xc9   : > { %7394 = vmatprep.subr.mxu0 %v8578_v4 }
  0xca   : > { %7395 = vmatpush3.msra.mxu0 %v1344_v23  ;;  %v6376_v23 = vld [vmem:[%s11674_s0 + $0x88] sm:$0xff] }
  0xcb   : > { %7396 = vmatprep.subr.mxu0 %v8578_v4 }
  0xcc   : > { %7397 = vmatpush3.msra.mxu0 %v1343_v25 }
  0xcd   : > { %7398 = vmatprep.subr.mxu0 %v8578_v4 }
  0xce   : > { %7399 = vmatpush3.msra.mxu0 %v1342_v27  ;;  %v6352_v27 = vld [vmem:[%s11678_s1] ss:$0 sm:$0xff] }
  0xcf   : > { %7400 = vmatprep.subr.mxu0 %v8578_v4 }
  0xd0   : > { %7401 = vmatpush3.msra.mxu0 %v1341_v29 }
  0xd1   : > { %7440 = vmatprep.subr.mxu0 %v8578_v4 }
 0x113   : > { %v1101_v42 = vpop.f32.mrf.mxu0 }
 0x114   : > { %v1102_v49 = vadd.f32 %v1101_v42, %v1003_v47 }
 0x115   : > { %v9298_v31 = vpop.f32.mrf.mxu1  ;;  %v1103_v44 = vpop.f32.mrf.mxu0 }
 0x116   : > { %v1104_v46 = vadd.f32 %v1103_v44, %v1007_v43  ;;  %v1339_v53 = vrot.slane %v1102_v49, %v9313_v45  ;;  %v6392_v44 = vld [vmem:[%s11678_s1 + $0x1] ss:$0 sm:$0xff] }
 0x117   : > { %v9300_v32 = vpop.f32.mrf.mxu1 }
 0x118   : > { %v1330_v48 = vadd.f32 1.0, %v1104_v46 }
 0x11a   : > { %v1334_v52 = vrot.slane %v1330_v48, %v9313_v45 }
 0x133   : > { %v9461_v25 = vpop.f32.mrf.mxu0 }
 0x135   : > { %v9463_v26 = vpop.f32.mrf.mxu0 }
 0x139   : > { %v9302_v33 = vpop.f32.mrf.mxu1 }
 0x13b   : > { %v7369_v34 = vpop.f32.mrf.mxu1 }
 0x148   : > { %v1325_v37 = vpop.xlane.xlu0 %1324 }
 0x149   : > { %v1326_v38 = vmul.f32 0.0078125, %v1325_v37 }
 0x14b   : > { %v1327_v39 = vadd.f32 1e-06, %v1326_v38 }
 0x14d   : > { %8439 = vrsqrt.f32 %v1327_v39  ;;  %v6353_v39 = vld [vmem:[%s11680_s9] ss:$0 sm:$0xff] }
 0x15a   : > { %v8440_v50 = vpop.eup %8439 }
 0x15b   : > { %v1329_v51 = vmul.f32 %v8440_v50, %v9198_v5  ;;  %v1530_v5 = vld [vmem:[%s11677_s12 + $0x18] sm:$0xff] }
 0x15d   : > { %v1335_v54 = vmul.f32 %v1334_v52, %v1329_v51 }
 0x15f   : > { %v9319_v55 = vadd.f32 %v1339_v53, %v1335_v54 }
 0x161   : > { %7403 = vmatmul.mubr.f32.vlgmr.msra.gmra.mxu0 %v9319_v55  ;;  %7438 = vmatmul.mubr.f32.vlgmr.msra.gmra.mxu1 %v9319_v55 }
 0x162   : > { %7441 = vmatpush3.msra.mxu0 %v1542_v56  ;;  %7472 = vmatprep.mubr.msk.f32.mxu0 %vm8579_vm0, %v8578_v4 }
 0x163   : > { %7442 = vmatprep.subr.mxu0 %v8578_v4  ;;  %7477 = vmatprep.mubr.msk.f32.mxu1 %vm8579_vm0, %v8578_v4 }
 0x164   : > { %7443 = vmatpush3.msra.mxu0 %v1541_v57 }
 0x165   : > { %7444 = vmatprep.subr.mxu0 %v8578_v4 }
 0x166   : > { %7445 = vmatpush3.msra.mxu0 %v1540_v58 }
 0x167   : > { %7446 = vmatprep.subr.mxu0 %v8578_v4 }
 0x168   : > { %7447 = vmatpush3.msra.mxu0 %v1539_v59 }
 0x169   : > { %7448 = vmatprep.subr.mxu0 %v8578_v4 }
 0x16a   : > { %7449 = vmatpush3.msra.mxu0 %v1538_v60 }
 0x16b   : > { %7450 = vmatprep.subr.mxu0 %v8578_v4 }
 0x16c   : > { %7451 = vmatpush3.msra.mxu0 %v1537_v61 }
 0x16d   : > { %7452 = vmatprep.subr.mxu0 %v8578_v4 }
 0x16e   : > { %7453 = vmatpush3.msra.mxu0 %v1536_v62  ;;  %v6372_v62 = vld [vmem:[%s11672_s2 + $0xf8] sm:$0xff] }
 0x16f   : > { %7454 = vmatprep.subr.mxu0 %v8578_v4 }
 0x170   : > { %7455 = vmatpush3.msra.mxu0 %v1535_v0  ;;  %v6371_v0 = vld [vmem:[%s11672_s2 + $0xf0] sm:$0xff] }
 0x171   : > { %7456 = vmatprep.subr.mxu0 %v8578_v4 }
 0x172   : > { %7457 = vmatpush3.msra.mxu0 %v1534_v1  ;;  %v6370_v1 = vld [vmem:[%s11672_s2 + $0xe8] sm:$0xff] }
 0x173   : > { %7458 = vmatprep.subr.mxu0 %v8578_v4 }
 0x174   : > { %7459 = vmatpush3.msra.mxu0 %v1533_v63  ;;  %v6369_v63 = vld [vmem:[%s11672_s2 + $0xe0] sm:$0xff] }
 0x175   : > { %7460 = vmatprep.subr.mxu0 %v8578_v4 }
 0x176   : > { %7461 = vmatpush3.msra.mxu0 %v1532_v2  ;;  %v6368_v2 = vld [vmem:[%s11672_s2 + $0xd8] sm:$0xff] }
 0x177   : > { %7462 = vmatprep.subr.mxu0 %v8578_v4 }
 0x178   : > { %7463 = vmatpush3.msra.mxu0 %v1531_v3  ;;  %v6367_v3 = vld [vmem:[%s11672_s2 + $0xd0] sm:$0xff] }
 0x179   : > { %7464 = vmatprep.subr.mxu0 %v8578_v4 }
 0x17a   : > { %7465 = vmatpush3.msra.mxu0 %v1530_v5  ;;  %v6366_v5 = vld [vmem:[%s11672_s2 + $0xc8] sm:$0xff] }
 0x17b   : > { %7466 = vmatprep.subr.mxu0 %v8578_v4 }
 0x17c   : > { %7467 = vmatpush3.msra.mxu0 %v1529_v6  ;;  %v6365_v6 = vld [vmem:[%s11672_s2 + $0xc0] sm:$0xff] }
 0x17d   : > { %7468 = vmatprep.subr.mxu0 %v8578_v4 }
 0x17e   : > { %7469 = vmatpush3.msra.mxu0 %v1528_v7  ;;  %v6364_v7 = vld [vmem:[%s11672_s2 + $0xb8] sm:$0xff] }
 0x17f   : > { %7470 = vmatprep.subr.mxu0 %v8578_v4 }
 0x180   : > { %7471 = vmatpush3.msra.mxu0 %v1527_v8  ;;  %v6363_v8 = vld [vmem:[%s11672_s2 + $0xb0] sm:$0xff] }
 0x181   : > { %7473 = vmatmul.mubr.f32.vlgmr.msra.gmra.mxu0 %v9319_v55  ;;  %7520 = vmatprep.subr.mxu0 %v8578_v4 }
 0x182   : > { %7521 = vmatpush3.msra.mxu0 %v6390_v9  ;;  %7552 = vmatprep.mubr.msk.f32.mxu0 %vm8579_vm0, %v8578_v4  ;;  %v6362_v9 = vld [vmem:[%s11672_s2 + $0xa8] sm:$0xff] }
 0x183   : > { %7522 = vmatprep.subr.mxu0 %v8578_v4 }
 0x184   : > { %7523 = vmatpush3.msra.mxu0 %v6389_v10  ;;  %v6361_v10 = vld [vmem:[%s11672_s2 + $0xa0] sm:$0xff] }
 0x185   : > { %7524 = vmatprep.subr.mxu0 %v8578_v4 }
 0x186   : > { %7525 = vmatpush3.msra.mxu0 %v6388_v11  ;;  %v6360_v11 = vld [vmem:[%s11672_s2 + $0x98] sm:$0xff] }
 0x187   : > { %7526 = vmatprep.subr.mxu0 %v8578_v4 }
 0x188   : > { %7527 = vmatpush3.msra.mxu0 %v6387_v12  ;;  %v6359_v12 = vld [vmem:[%s11672_s2 + $0x90] sm:$0xff] }
 0x189   : > { %7528 = vmatprep.subr.mxu0 %v8578_v4 }
 0x18a   : > { %7529 = vmatpush3.msra.mxu0 %v6386_v13  ;;  %v6358_v13 = vld [vmem:[%s11672_s2 + $0x88] sm:$0xff] }
 0x18b   : > { %7530 = vmatprep.subr.mxu0 %v8578_v4 }
 0x18c   : > { %7531 = vmatpush3.msra.mxu0 %v6385_v14  ;;  %v6357_v14 = vld [vmem:[%s11672_s2 + $0x80] sm:$0xff] }
 0x18d   : > { %7532 = vmatprep.subr.mxu0 %v8578_v4 }
 0x18e   : > { %7533 = vmatpush3.msra.mxu0 %v6384_v15  ;;  %v6408_v15 = vld [vmem:[%s11677_s12 + $0xf8] sm:$0xff] }
 0x18f   : > { %7534 = vmatprep.subr.mxu0 %v8578_v4 }
 0x190   : > { %7535 = vmatpush3.msra.mxu0 %v6383_v16  ;;  %v6407_v16 = vld [vmem:[%s11677_s12 + $0xf0] sm:$0xff] }
 0x191   : > { %7536 = vmatprep.subr.mxu0 %v8578_v4 }
 0x192   : > { %7537 = vmatpush3.msra.mxu0 %v6382_v17  ;;  %v6406_v17 = vld [vmem:[%s11677_s12 + $0xe8] sm:$0xff] }
 0x193   : > { %7538 = vmatprep.subr.mxu0 %v8578_v4 }
 0x194   : > { %7539 = vmatpush3.msra.mxu0 %v6381_v18  ;;  %v6405_v18 = vld [vmem:[%s11677_s12 + $0xe0] sm:$0xff] }
 0x195   : > { %7540 = vmatprep.subr.mxu0 %v8578_v4 }
 0x196   : > { %7541 = vmatpush3.msra.mxu0 %v6380_v19  ;;  %v6404_v19 = vld [vmem:[%s11677_s12 + $0xd8] sm:$0xff] }
 0x197   : > { %7542 = vmatprep.subr.mxu0 %v8578_v4 }
 0x198   : > { %7543 = vmatpush3.msra.mxu0 %v6379_v20  ;;  %v6403_v20 = vld [vmem:[%s11677_s12 + $0xd0] sm:$0xff] }
 0x199   : > { %7544 = vmatprep.subr.mxu0 %v8578_v4 }
 0x19a   : > { %7545 = vmatpush3.msra.mxu0 %v6378_v21  ;;  %v6402_v21 = vld [vmem:[%s11677_s12 + $0xc8] sm:$0xff] }
 0x19b   : > { %7546 = vmatprep.subr.mxu0 %v8578_v4 }
 0x19c   : > { %7547 = vmatpush3.msra.mxu0 %v6377_v22  ;;  %v6401_v22 = vld [vmem:[%s11677_s12 + $0xc0] sm:$0xff] }
 0x19d   : > { %7548 = vmatprep.subr.mxu0 %v8578_v4 }
 0x19e   : > { %7549 = vmatpush3.msra.mxu0 %v6376_v23  ;;  %v6400_v23 = vld [vmem:[%s11677_s12 + $0xb8] sm:$0xff] }
 0x19f   : > { %7550 = vmatprep.subr.mxu0 %v8578_v4 }
 0x1a0   : > { %7551 = vmatpush3.msra.mxu0 %v6375_v24  ;;  %v6399_v24 = vld [vmem:[%s11677_s12 + $0xb0] sm:$0xff] }
 0x1a1   : > { %7553 = vmatmul.mubr.f32.vlgmr.msra.gmra.mxu0 %v9319_v55  ;;  %7590 = vmatprep.subr.mxu0 %v8578_v4 }
 0x1a2   : > { %7592 = vmatprep.mubr.msk.f32.mxu0 %vm8579_vm0, %v8578_v4 }
 0x221   : > { %v1430_v28 = vpop.f32.mrf.mxu0  ;;  %v1523_v29 = vpop.f32.mrf.mxu1 }
 0x222   : > { %v1524_v34 = vadd.f32 %v6352_v27, %v1523_v29  ;;  %v1431_v38 = vadd.f32 %v6351_v30, %v1430_v28  ;;  %v6398_v27 = vld [vmem:[%s11677_s12 + $0xa8] sm:$0xff]  ;;  %v6397_v28 = vld [vmem:[%s11677_s12 + $0xa0] sm:$0xff]  ;;  %v6396_v29 = vld [vmem:[%s11677_s12 + $0x98] sm:$0xff] }
 0x223   : > { %v7404_v35 = vpop.f32.mrf.mxu0  ;;  %v7439_v37 = vpop.f32.mrf.mxu1  ;;  %v6395_v30 = vld [vmem:[%s11677_s12 + $0x90] sm:$0xff] }
 0x224   : > { %7476 = vmatpush3.xpose.msk.msra.mxu1 %vm1620_vm1, %v1524_v34  ;;  %v6394_v34 = vld [vmem:[%s11677_s12 + $0x88] sm:$0xff]  ;;  %v6393_v35 = vld [vmem:[%s11677_s12 + $0x80] sm:$0xff]  ;;  %v1786_v37 = vld [vmem:[%s11682_s3 + $0x18] sm:$0xff] }
 0x225   : > { %7480 = vmatprep.subr.mxu1 %v8578_v4 }
 0x227   : > { %7478 = vmatmul.mubr.msk.f32.vlgmr.msra.gmra.mxu1 %vm1620_vm1, %v1431_v38  ;;  %v1785_v38 = vld [vmem:[%s11682_s3 + $0x10] sm:$0xff] }
 0x228   : > { %7482 = vmatprep.mubr.msk.f32.mxu1 %vm8579_vm0, %v8578_v4 }
 0x241   : > { %v1616_v41 = vpop.f32.mrf.mxu0 }
 0x242   : > { %v1617_v42 = vadd.f32 %v6353_v39, %v1616_v41  ;;  %v1784_v39 = vld [vmem:[%s11682_s3 + $0x8] sm:$0xff]  ;;  %v1783_v41 = vld [vmem:[%s11682_s3] sm:$0xff] }
 0x243   : > { %v7474_v43 = vpop.f32.mrf.mxu0 }
 0x244   : > { %7481 = vmatpush3.msra.mxu1 %v1617_v42  ;;  %v6453_v42 = vld [vmem:[%s11674_s0 + $0x178] sm:$0xff] }
 0x245   : > { %7485 = vmatprep.subr.mxu1 %v8578_v4 }
 0x261   : > { %v1973_v46 = vpop.f32.mrf.mxu0 }
 0x262   : > { %v1974_v47 = vadd.f32 %v6392_v44, %v1973_v46  ;;  %v6452_v44 = vld [vmem:[%s11674_s0 + $0x170] sm:$0xff] }
 0x263   : > { %v7554_v48 = vpop.f32.mrf.mxu0 }
 0x264   : > { %7591 = vmatpush3.xpose.msk.msra.mxu0 %vm1620_vm1, %v1974_v47  ;;  %v6451_v47 = vld [vmem:[%s11674_s0 + $0x168] sm:$0xff]  ;;  %v6450_v48 = vld [vmem:[%s11674_s0 + $0x160] sm:$0xff] }
 0x265   : > { %7595 = vmatprep.subr.mxu0 %v8578_v4 }
 0x2e7   : > { %v1693_v49 = vpop.f32.mrf.mxu1 }
 0x2e8   : > { %v1697_v50 = vmul.f32 0.17677669, %v1693_v49  ;;  %v6449_v49 = vld [vmem:[%s11674_s0 + $0x158] sm:$0xff] }
 0x2e9   : > { %v7479_v51 = vpop.f32.mrf.mxu1 }
 0x2ea   : > { %v1699_v52 = vsel %vm1698_vm2, %v1697_v50, -inf  ;;  %v6447_v51 = vld [vmem:[%s11674_s0 + $0x148] sm:$0xff] }
 0x2eb   : > { %1700 = vmax.xlane.f32.xlu1 %v1699_v52  ;;  %v6446_v52 = vld [vmem:[%s11674_s0 + $0x140] sm:$0xff] }
 0x374   : > { %v1701_v53 = vpop.xlane.xlu1 %1700 }
 0x375   : > { %v1702_v54 = vsub.f32 %v1697_v50, %v1701_v53  ;;  %v6448_v50 = vld [vmem:[%s11674_s0 + $0x150] sm:$0xff]  ;;  %v6445_v53 = vld [vmem:[%s11674_s0 + $0x138] sm:$0xff] }
 0x377   : > { %v1703_v56 = vmul.f32 1.442695, %v1702_v54  ;;  %v6444_v54 = vld [vmem:[%s11674_s0 + $0x130] sm:$0xff] }
 0x379   : > { %8441 = vpow2.f32 %v1703_v56  ;;  %v6443_v56 = vld [vmem:[%s11674_s0 + $0x128] sm:$0xff] }
 0x386   : > { %v8442_v57 = vpop.eup %8441 }
 0x387   : > { %v1705_v58 = vsel %vm1698_vm2, %v8442_v57, 0.0 }
 0x388   : > { %1706 = vadd.xlane.f32.xlu1 %v1705_v58  ;;  %v6441_v58 = vld [vmem:[%s11674_s0 + $0x118] sm:$0xff] }
 0x411   : > { %v1707_v59 = vpop.xlane.xlu1 %1706 }
 0x412   : > { %8443 = vrcp.f32 %v1707_v59  ;;  %v6440_v59 = vld [vmem:[%s11674_s0 + $0x110] sm:$0xff] }
 0x41f   : > { %v8444_v60 = vpop.eup %8443 }
 0x420   : > { %v1709_v61 = vmul.f32 %v8444_v60, %v8442_v57  ;;  %v6442_v57 = vld [vmem:[%s11674_s0 + $0x120] sm:$0xff]  ;;  %v6439_v60 = vld [vmem:[%s11674_s0 + $0x108] sm:$0xff] }
 0x422   : > { %7483 = vmatmul.mubr.msk.f32.vlgmr.msra.gmra.mxu1 %vm1698_vm2, %v1709_v61  ;;  %v6438_v61 = vld [vmem:[%s11674_s0 + $0x100] sm:$0xff] }
 0x423   : > { %7486 = vmatpush3.msra.mxu1 %v6372_v62  ;;  %7517 = vmatprep.mubr.msk.f32.mxu1 %vm8579_vm0, %v8578_v4  ;;  %v6374_v62 = vld [vmem:[%s11679_s10 + $0x1] ss:$0 sm:$0xff] }
 0x424   : > { %7487 = vmatprep.subr.mxu1 %v8578_v4 }
 0x425   : > { %7488 = vmatpush3.msra.mxu1 %v6371_v0 }
 0x426   : > { %7489 = vmatprep.subr.mxu1 %v8578_v4 }
 0x427   : > { %7490 = vmatpush3.msra.mxu1 %v6370_v1 }
 0x428   : > { %7491 = vmatprep.subr.mxu1 %v8578_v4 }
 0x429   : > { %7492 = vmatpush3.msra.mxu1 %v6369_v63 }
 0x42a   : > { %7493 = vmatprep.subr.mxu1 %v8578_v4 }
 0x42b   : > { %7494 = vmatpush3.msra.mxu1 %v6368_v2  ;;  %v6410_v2 = vld [vmem:[%s11681_s11 + $0x1] ss:$0 sm:$0xff] }
 0x42c   : > { %7495 = vmatprep.subr.mxu1 %v8578_v4 }
 0x42d   : > { %7496 = vmatpush3.msra.mxu1 %v6367_v3 }
 0x42e   : > { %7497 = vmatprep.subr.mxu1 %v8578_v4 }
 0x42f   : > { %7498 = vmatpush3.msra.mxu1 %v6366_v5 }
 0x430   : > { %7499 = vmatprep.subr.mxu1 %v8578_v4 }
 0x431   : > { %7500 = vmatpush3.msra.mxu1 %v6365_v6 }
 0x432   : > { %7501 = vmatprep.subr.mxu1 %v8578_v4 }
 0x433   : > { %7502 = vmatpush3.msra.mxu1 %v6364_v7 }
 0x434   : > { %7503 = vmatprep.subr.mxu1 %v8578_v4 }
 0x435   : > { %7504 = vmatpush3.msra.mxu1 %v6363_v8 }
 0x436   : > { %7505 = vmatprep.subr.mxu1 %v8578_v4 }
 0x437   : > { %7506 = vmatpush3.msra.mxu1 %v6362_v9  ;;  %v6455_v9 = vld [vmem:[%s11678_s1 + $0x2] ss:$0 sm:$0xff] }
 0x438   : > { %7507 = vmatprep.subr.mxu1 %v8578_v4 }
 0x439   : > { %7508 = vmatpush3.msra.mxu1 %v6361_v10 }
 0x43a   : > { %7509 = vmatprep.subr.mxu1 %v8578_v4 }
 0x43b   : > { %7510 = vmatpush3.msra.mxu1 %v6360_v11 }
 0x43c   : > { %7511 = vmatprep.subr.mxu1 %v8578_v4 }
 0x43d   : > { %7512 = vmatpush3.msra.mxu1 %v6359_v12 }
 0x43e   : > { %7513 = vmatprep.subr.mxu1 %v8578_v4 }
 0x43f   : > { %7514 = vmatpush3.msra.mxu1 %v6358_v13 }
 0x440   : > { %7515 = vmatprep.subr.mxu1 %v8578_v4 }
 0x441   : > { %7516 = vmatpush3.msra.mxu1 %v6357_v14 }
 0x442   : > { %7518 = vmatmul.mubr.f32.vlgmr.msra.gmra.mxu1 %v9319_v55  ;;  %7555 = vmatprep.subr.mxu1 %v8578_v4 }
 0x443   : > { %7556 = vmatpush3.msra.mxu1 %v6408_v15  ;;  %7587 = vmatprep.mubr.msk.f32.mxu1 %vm8579_vm0, %v8578_v4 }
 0x444   : > { %7557 = vmatprep.subr.mxu1 %v8578_v4 }
 0x445   : > { %7558 = vmatpush3.msra.mxu1 %v6407_v16 }
 0x446   : > { %7559 = vmatprep.subr.mxu1 %v8578_v4 }
 0x447   : > { %7560 = vmatpush3.msra.mxu1 %v6406_v17 }
 0x448   : > { %7561 = vmatprep.subr.mxu1 %v8578_v4 }
 0x449   : > { %7562 = vmatpush3.msra.mxu1 %v6405_v18 }
 0x44a   : > { %7563 = vmatprep.subr.mxu1 %v8578_v4 }
 0x44b   : > { %7564 = vmatpush3.msra.mxu1 %v6404_v19 }
 0x44c   : > { %7565 = vmatprep.subr.mxu1 %v8578_v4 }
 0x44d   : > { %7566 = vmatpush3.msra.mxu1 %v6403_v20 }
 0x44e   : > { %7567 = vmatprep.subr.mxu1 %v8578_v4 }
 0x44f   : > { %7568 = vmatpush3.msra.mxu1 %v6402_v21 }
 0x450   : > { %7569 = vmatprep.subr.mxu1 %v8578_v4 }
 0x451   : > { %7570 = vmatpush3.msra.mxu1 %v6401_v22 }
 0x452   : > { %7571 = vmatprep.subr.mxu1 %v8578_v4 }
 0x453   : > { %7572 = vmatpush3.msra.mxu1 %v6400_v23 }
 0x454   : > { %7573 = vmatprep.subr.mxu1 %v8578_v4 }
 0x455   : > { %7574 = vmatpush3.msra.mxu1 %v6399_v24 }
 0x456   : > { %7575 = vmatprep.subr.mxu1 %v8578_v4 }
 0x457   : > { %7576 = vmatpush3.msra.mxu1 %v6398_v27  ;;  %v6417_v27 = vld [vmem:[%s11682_s3 + $0x38] sm:$0xff] }
 0x458   : > { %7577 = vmatprep.subr.mxu1 %v8578_v4 }
 0x459   : > { %7578 = vmatpush3.msra.mxu1 %v6397_v28  ;;  %v6416_v28 = vld [vmem:[%s11682_s3 + $0x30] sm:$0xff] }
 0x45a   : > { %7579 = vmatprep.subr.mxu1 %v8578_v4 }
 0x45b   : > { %7580 = vmatpush3.msra.mxu1 %v6396_v29  ;;  %v6415_v29 = vld [vmem:[%s11682_s3 + $0x28] sm:$0xff] }
 0x45c   : > { %7581 = vmatprep.subr.mxu1 %v8578_v4 }
 0x45d   : > { %7582 = vmatpush3.msra.mxu1 %v6395_v30  ;;  %v6414_v30 = vld [vmem:[%s11682_s3 + $0x20] sm:$0xff] }
 0x45e   : > { %7583 = vmatprep.subr.mxu1 %v8578_v4 }
 0x45f   : > { %7584 = vmatpush3.msra.mxu1 %v6394_v34  ;;  %v6435_v34 = vld [vmem:[%s11672_s2 + $0x178] sm:$0xff] }
 0x460   : > { %7585 = vmatprep.subr.mxu1 %v8578_v4 }
 0x461   : > { %7586 = vmatpush3.msra.mxu1 %v6393_v35 }
 0x462   : > { %7588 = vmatmul.mubr.f32.vlgmr.msra.gmra.mxu1 %v9319_v55  ;;  %7611 = vmatprep.subr.mxu1 %v8578_v4 }
 0x463   : > { %7612 = vmatpush3.msra.mxu1 %v1786_v37  ;;  %7619 = vmatprep.mubr.msk.f32.mxu1 %vm8579_vm0, %v8578_v4  ;;  %v6434_v37 = vld [vmem:[%s11672_s2 + $0x170] sm:$0xff] }
 0x464   : > { %7613 = vmatprep.subr.mxu1 %v8578_v4 }
 0x465   : > { %7614 = vmatpush3.msra.mxu1 %v1785_v38 }
 0x466   : > { %7615 = vmatprep.subr.mxu1 %v8578_v4 }
 0x467   : > { %7616 = vmatpush3.msra.mxu1 %v1784_v39  ;;  %v6433_v39 = vld [vmem:[%s11672_s2 + $0x168] sm:$0xff] }
 0x468   : > { %7617 = vmatprep.subr.mxu1 %v8578_v4 }
 0x469   : > { %7618 = vmatpush3.msra.mxu1 %v1783_v41  ;;  %v6432_v41 = vld [vmem:[%s11672_s2 + $0x160] sm:$0xff] }
 0x46a   : > { %7657 = vmatprep.subr.mxu1 %v8578_v4 }
 0x4e2   : > { %v1779_v43 = vpop.f32.mrf.mxu1 }
 0x4e3   : > { %7620 = vmatmul.mubr.msk.f32.vlgmr.msra.gmra.mxu1 %vm1620_vm1, %v1779_v43  ;;  %v6430_v43 = vld [vmem:[%s11672_s2 + $0x150] sm:$0xff] }
 0x4e4   : > { %7658 = vmatpush3.msra.mxu1 %v6453_v42  ;;  %v7484_v46 = vpop.f32.mrf.mxu1  ;;  %7689 = vmatprep.mubr.msk.f32.mxu1 %vm8579_vm0, %v8578_v4  ;;  %v6431_v42 = vld [vmem:[%s11672_s2 + $0x158] sm:$0xff] }
 0x4e5   : > { %7659 = vmatprep.subr.mxu1 %v8578_v4  ;;  %v6428_v46 = vld [vmem:[%s11672_s2 + $0x140] sm:$0xff] }
 0x4e6   : > { %7660 = vmatpush3.msra.mxu1 %v6452_v44  ;;  %v6429_v44 = vld [vmem:[%s11672_s2 + $0x148] sm:$0xff] }
 0x4e7   : > { %7661 = vmatprep.subr.mxu1 %v8578_v4 }
 0x4e8   : > { %7662 = vmatpush3.msra.mxu1 %v6451_v47  ;;  %v6427_v47 = vld [vmem:[%s11672_s2 + $0x138] sm:$0xff] }
 0x4e9   : > { %7663 = vmatprep.subr.mxu1 %v8578_v4 }
 0x4ea   : > { %7664 = vmatpush3.msra.mxu1 %v6450_v48  ;;  %v6426_v48 = vld [vmem:[%s11672_s2 + $0x130] sm:$0xff] }
 0x4eb   : > { %7665 = vmatprep.subr.mxu1 %v8578_v4 }
 0x4ec   : > { %7666 = vmatpush3.msra.mxu1 %v6449_v49  ;;  %v6425_v49 = vld [vmem:[%s11672_s2 + $0x128] sm:$0xff] }
 0x4ed   : > { %7667 = vmatprep.subr.mxu1 %v8578_v4 }
 0x4ee   : > { %7668 = vmatpush3.msra.mxu1 %v6448_v50  ;;  %v6424_v50 = vld [vmem:[%s11672_s2 + $0x120] sm:$0xff] }
 0x4ef   : > { %7669 = vmatprep.subr.mxu1 %v8578_v4 }
 0x4f0   : > { %7670 = vmatpush3.msra.mxu1 %v6447_v51  ;;  %v6423_v51 = vld [vmem:[%s11672_s2 + $0x118] sm:$0xff] }
 0x4f1   : > { %7671 = vmatprep.subr.mxu1 %v8578_v4 }
 0x4f2   : > { %7672 = vmatpush3.msra.mxu1 %v6446_v52  ;;  %v6422_v52 = vld [vmem:[%s11672_s2 + $0x110] sm:$0xff] }
 0x4f3   : > { %7673 = vmatprep.subr.mxu1 %v8578_v4 }
 0x4f4   : > { %7674 = vmatpush3.msra.mxu1 %v6445_v53  ;;  %v6421_v53 = vld [vmem:[%s11672_s2 + $0x108] sm:$0xff] }
 0x4f5   : > { %7675 = vmatprep.subr.mxu1 %v8578_v4 }
 0x4f6   : > { %7676 = vmatpush3.msra.mxu1 %v6444_v54  ;;  %v6420_v54 = vld [vmem:[%s11672_s2 + $0x100] sm:$0xff] }
 0x4f7   : > { %7677 = vmatprep.subr.mxu1 %v8578_v4 }
 0x4f8   : > { %7678 = vmatpush3.msra.mxu1 %v6443_v56  ;;  %v6471_v56 = vld [vmem:[%s11677_s12 + $0x178] sm:$0xff] }
 0x4f9   : > { %7679 = vmatprep.subr.mxu1 %v8578_v4 }
 0x4fa   : > { %7680 = vmatpush3.msra.mxu1 %v6442_v57  ;;  %v6470_v57 = vld [vmem:[%s11677_s12 + $0x170] sm:$0xff] }
 0x4fb   : > { %7681 = vmatprep.subr.mxu1 %v8578_v4 }
 0x4fc   : > { %7682 = vmatpush3.msra.mxu1 %v6441_v58  ;;  %v6469_v58 = vld [vmem:[%s11677_s12 + $0x168] sm:$0xff] }
 0x4fd   : > { %7683 = vmatprep.subr.mxu1 %v8578_v4 }
 0x4fe   : > { %7684 = vmatpush3.msra.mxu1 %v6440_v59  ;;  %v6468_v59 = vld [vmem:[%s11677_s12 + $0x160] sm:$0xff] }
 0x4ff   : > { %7685 = vmatprep.subr.mxu1 %v8578_v4 }
 0x500   : > { %7686 = vmatpush3.msra.mxu1 %v6439_v60  ;;  %v6467_v60 = vld [vmem:[%s11677_s12 + $0x158] sm:$0xff] }
 0x501   : > { %7687 = vmatprep.subr.mxu1 %v8578_v4 }
 0x502   : > { %v1878_v0 = vpop.f32.mrf.mxu1  ;;  %7688 = vmatpush3.msra.mxu1 %v6438_v61  ;;  %v6466_v61 = vld [vmem:[%s11677_s12 + $0x150] sm:$0xff] }
 0x503   : > { %v1879_v1 = vadd.f32 %v6374_v62, %v1878_v0  ;;  %7690 = vmatmul.mubr.f32.vlgmr.msra.gmra.mxu1 %v9319_v55  ;;  %7727 = vmatprep.subr.mxu1 %v8578_v4  ;;  %v6465_v62 = vld [vmem:[%s11677_s12 + $0x148] sm:$0xff]  ;;  %v6464_v0 = vld [vmem:[%s11677_s12 + $0x140] sm:$0xff] }
 0x504   : > { %v7519_v63 = vpop.f32.mrf.mxu1  ;;  %7729 = vmatprep.mubr.msk.f32.mxu1 %vm8579_vm0, %v8578_v4 }
 0x505   : > { %7593 = vmatmul.mubr.msk.f32.vlgmr.msra.gmra.mxu0 %vm1620_vm1, %v1879_v1  ;;  %v6463_v1 = vld [vmem:[%s11677_s12 + $0x138] sm:$0xff]  ;;  %v6462_v63 = vld [vmem:[%s11677_s12 + $0x130] sm:$0xff] }
 0x506   : > { %7597 = vmatprep.mubr.msk.f32.mxu0 %vm8579_vm0, %v8578_v4 }
 0x522   : > { %v2068_v3 = vpop.f32.mrf.mxu1 }
 0x523   : > { %v2069_v5 = vadd.f32 %v6410_v2, %v2068_v3  ;;  %v6461_v2 = vld [vmem:[%s11677_s12 + $0x128] sm:$0xff]  ;;  %v6460_v3 = vld [vmem:[%s11677_s12 + $0x120] sm:$0xff] }
 0x524   : > { %v7589_v6 = vpop.f32.mrf.mxu1 }
 0x525   : > { %7596 = vmatpush3.msra.mxu0 %v2069_v5  ;;  %v6459_v5 = vld [vmem:[%s11677_s12 + $0x118] sm:$0xff]  ;;  %v6458_v6 = vld [vmem:[%s11677_s12 + $0x110] sm:$0xff] }
 0x526   : > { %7600 = vmatprep.subr.mxu0 %v8578_v4 }
 0x5a3   : > { %v9720_v7 = vpop.f32.mrf.mxu1 }
 0x5a5   : > { %v7621_v8 = vpop.f32.mrf.mxu1 }
 0x5a6   : > { %v6457_v8 = vld [vmem:[%s11677_s12 + $0x108] sm:$0xff] }
 0x5c3   : > { %v2570_v10 = vpop.f32.mrf.mxu1 }
 0x5c4   : > { %v2571_v11 = vadd.f32 %v6455_v9, %v2570_v10  ;;  %v6456_v9 = vld [vmem:[%s11677_s12 + $0x100] sm:$0xff]  ;;  %v6515_v10 = vld [vmem:[%s11674_s0 + $0x1f8] sm:$0xff] }
 0x5c5   : > { %v2144_v12 = vpop.f32.mrf.mxu0  ;;  %v7691_v13 = vpop.f32.mrf.mxu1 }
 0x5c6   : > { %v2148_v14 = vmul.f32 0.17677669, %v2144_v12  ;;  %7728 = vmatpush3.xpose.msk.msra.mxu1 %vm1620_vm1, %v2571_v11  ;;  %v6514_v11 = vld [vmem:[%s11674_s0 + $0x1f0] sm:$0xff]  ;;  %v6513_v12 = vld [vmem:[%s11674_s0 + $0x1e8] sm:$0xff]  ;;  %v6512_v13 = vld [vmem:[%s11674_s0 + $0x1e0] sm:$0xff] }
 0x5c7   : > { %v7594_v15 = vpop.f32.mrf.mxu0  ;;  %7732 = vmatprep.subr.mxu1 %v8578_v4 }
 0x5c8   : > { %v2149_v16 = vsel %vm1698_vm2, %v2148_v14, -inf  ;;  %v6510_v15 = vld [vmem:[%s11674_s0 + $0x1d0] sm:$0xff] }
 0x5c9   : > { %2150 = vmax.xlane.f32.xlu0 %v2149_v16  ;;  %v6509_v16 = vld [vmem:[%s11674_s0 + $0x1c8] sm:$0xff] }
 0x652   : > { %v2151_v17 = vpop.xlane.xlu0 %2150 }
 0x653   : > { %v2152_v18 = vsub.f32 %v2148_v14, %v2151_v17  ;;  %v6511_v14 = vld [vmem:[%s11674_s0 + $0x1d8] sm:$0xff]  ;;  %v6508_v17 = vld [vmem:[%s11674_s0 + $0x1c0] sm:$0xff] }
 0x655   : > { %v2153_v19 = vmul.f32 1.442695, %v2152_v18  ;;  %v6507_v18 = vld [vmem:[%s11674_s0 + $0x1b8] sm:$0xff] }
 0x657   : > { %8445 = vpow2.f32 %v2153_v19  ;;  %v6506_v19 = vld [vmem:[%s11674_s0 + $0x1b0] sm:$0xff] }
 0x664   : > { %v8446_v20 = vpop.eup %8445 }
 0x665   : > { %v2155_v21 = vsel %vm1698_vm2, %v8446_v20, 0.0 }
 0x666   : > { %2156 = vadd.xlane.f32.xlu1 %v2155_v21  ;;  %v6504_v21 = vld [vmem:[%s11674_s0 + $0x1a0] sm:$0xff] }
 0x6ef   : > { %v2157_v22 = vpop.xlane.xlu1 %2156 }
 0x6f0   : > { %8447 = vrcp.f32 %v2157_v22  ;;  %v6503_v22 = vld [vmem:[%s11674_s0 + $0x198] sm:$0xff] }
 0x6fd   : > { %v8448_v23 = vpop.eup %8447 }
 0x6fe   : > { %v2159_v24 = vmul.f32 %v8448_v23, %v8446_v20  ;;  %v6505_v20 = vld [vmem:[%s11674_s0 + $0x1a8] sm:$0xff]  ;;  %v6502_v23 = vld [vmem:[%s11674_s0 + $0x190] sm:$0xff] }
 0x700   : > { %7598 = vmatmul.mubr.msk.f32.vlgmr.msra.gmra.mxu0 %vm1698_vm2, %v2159_v24  ;;  %v6501_v24 = vld [vmem:[%s11674_s0 + $0x188] sm:$0xff] }
 0x701   : > { %7601 = vmatpush3.msra.mxu0 %v6417_v27  ;;  %7608 = vmatprep.mubr.msk.f32.mxu0 %vm8579_vm0, %v8578_v4  ;;  %v6500_v27 = vld [vmem:[%s11674_s0 + $0x180] sm:$0xff]  ;;  %s11687_s0 = sld [smem:[#allocation9_spill]] }
 0x702   : > { %7602 = vmatprep.subr.mxu0 %v8578_v4 }
 0x703   : > { %7603 = vmatpush3.msra.mxu0 %v6416_v28 }
 0x704   : > { %7604 = vmatprep.subr.mxu0 %v8578_v4 }
 0x705   : > { %7605 = vmatpush3.msra.mxu0 %v6415_v29 }
 0x706   : > { %7606 = vmatprep.subr.mxu0 %v8578_v4 }
 0x707   : > { %7607 = vmatpush3.msra.mxu0 %v6414_v30  ;;  %v6437_v30 = vld [vmem:[%s11679_s10 + $0x2] ss:$0 sm:$0xff]  ;;  %s6748_s25 = sshll.u32 %s11687_s0, 7 }
 0x708   : > { %7622 = vmatprep.subr.mxu0 %v8578_v4 }
 0x7c0   : > { %v2229_v35 = vpop.f32.mrf.mxu0 }
 0x7c1   : > { %7609 = vmatmul.mubr.msk.f32.vlgmr.msra.gmra.mxu0 %vm1620_vm1, %v2229_v35 }
 0x7c2   : > { %7623 = vmatpush3.msra.mxu0 %v6435_v34  ;;  %v7599_v38 = vpop.f32.mrf.mxu0  ;;  %7654 = vmatprep.mubr.msk.f32.mxu0 %vm8579_vm0, %v8578_v4 }
 0x7c3   : > { %7624 = vmatprep.subr.mxu0 %v8578_v4  ;;  %v6473_v38 = vld [vmem:[%s11681_s11 + $0x2] ss:$0 sm:$0xff] }
 0x7c4   : > { %7625 = vmatpush3.msra.mxu0 %v6434_v37 }
 0x7c5   : > { %7626 = vmatprep.subr.mxu0 %v8578_v4 }
 0x7c6   : > { %7627 = vmatpush3.msra.mxu0 %v6433_v39 }
 0x7c7   : > { %7628 = vmatprep.subr.mxu0 %v8578_v4 }
 0x7c8   : > { %7629 = vmatpush3.msra.mxu0 %v6432_v41 }
 0x7c9   : > { %7630 = vmatprep.subr.mxu0 %v8578_v4 }
 0x7ca   : > { %7631 = vmatpush3.msra.mxu0 %v6431_v42 }
 0x7cb   : > { %7632 = vmatprep.subr.mxu0 %v8578_v4 }
 0x7cc   : > { %7633 = vmatpush3.msra.mxu0 %v6430_v43  ;;  %v6517_v43 = vld [vmem:[%s11678_s1 + $0x3] ss:$0 sm:$0xff]  ;;  %s11683_s1 = sld [smem:[#allocation16_spill]] }
 0x7cd   : > { %7634 = vmatprep.subr.mxu0 %v8578_v4 }
 0x7ce   : > { %7635 = vmatpush3.msra.mxu0 %v6429_v44 }
 0x7cf   : > { %7636 = vmatprep.subr.mxu0 %v8578_v4 }
 0x7d0   : > { %7637 = vmatpush3.msra.mxu0 %v6428_v46 }
 0x7d1   : > { %7638 = vmatprep.subr.mxu0 %v8578_v4 }
 0x7d2   : > { %7639 = vmatpush3.msra.mxu0 %v6427_v47  ;;  %s10122_s4 = scalar_lea.vmem %s11683_s1, %s6751_s8  ;;  %s860_s1 = sand.u32 1, %s11686_s6  }
 0x7d3   : > { %7640 = vmatprep.subr.mxu0 %v8578_v4  ;;  %s6346_s5 = sshll.u32 %s860_s1, 3  ;;  %s11690_s8 = sld [smem:[#allocation29_spill]] }
 0x7d4   : > { %7641 = vmatpush3.msra.mxu0 %v6426_v48 }
 0x7d5   : > { %7642 = vmatprep.subr.mxu0 %v8578_v4 }
 0x7d6   : > { %7643 = vmatpush3.msra.mxu0 %v6425_v49 }
 0x7d7   : > { %7644 = vmatprep.subr.mxu0 %v8578_v4 }
 0x7d8   : > { %7645 = vmatpush3.msra.mxu0 %v6424_v50 }
 0x7d9   : > { %7646 = vmatprep.subr.mxu0 %v8578_v4 }
 0x7da   : > { %7647 = vmatpush3.msra.mxu0 %v6423_v51 }
 0x7db   : > { %7648 = vmatprep.subr.mxu0 %v8578_v4 }
 0x7dc   : > { %7649 = vmatpush3.msra.mxu0 %v6422_v52 }
 0x7dd   : > { %7650 = vmatprep.subr.mxu0 %v8578_v4 }
 0x7de   : > { %7651 = vmatpush3.msra.mxu0 %v6421_v53 }
 0x7df   : > { %7652 = vmatprep.subr.mxu0 %v8578_v4 }
 0x7e0   : > { %7653 = vmatpush3.msra.mxu0 %v6420_v54 }
 0x7e1   : > { %7655 = vmatmul.mubr.f32.vlgmr.msra.gmra.mxu0 %v9319_v55  ;;  %7692 = vmatprep.subr.mxu0 %v8578_v4 }
 0x7e2   : > { %7693 = vmatpush3.msra.mxu0 %v6471_v56  ;;  %7724 = vmatprep.mubr.msk.f32.mxu0 %vm8579_vm0, %v8578_v4 }
 0x7e3   : > { %7694 = vmatprep.subr.mxu0 %v8578_v4 }
 0x7e4   : > { %7695 = vmatpush3.msra.mxu0 %v6470_v57 }
 0x7e5   : > { %7696 = vmatprep.subr.mxu0 %v8578_v4 }
 0x7e6   : > { %7697 = vmatpush3.msra.mxu0 %v6469_v58 }
 0x7e7   : > { %7698 = vmatprep.subr.mxu0 %v8578_v4 }
 0x7e8   : > { %7699 = vmatpush3.msra.mxu0 %v6468_v59 }
 0x7e9   : > { %7700 = vmatprep.subr.mxu0 %v8578_v4 }
 0x7ea   : > { %7701 = vmatpush3.msra.mxu0 %v6467_v60 }
 0x7eb   : > { %7702 = vmatprep.subr.mxu0 %v8578_v4 }
 0x7ec   : > { %7703 = vmatpush3.msra.mxu0 %v6466_v61  ;;  %v6480_v61 = vld [vmem:[%s11682_s3 + $0x58] sm:$0xff] }
 0x7ed   : > { %7704 = vmatprep.subr.mxu0 %v8578_v4 }
 0x7ee   : > { %7705 = vmatpush3.msra.mxu0 %v6465_v62  ;;  %v6479_v62 = vld [vmem:[%s11682_s3 + $0x50] sm:$0xff] }
 0x7ef   : > { %7706 = vmatprep.subr.mxu0 %v8578_v4 }
 0x7f0   : > { %7707 = vmatpush3.msra.mxu0 %v6464_v0  ;;  %v6478_v0 = vld [vmem:[%s11682_s3 + $0x48] sm:$0xff] }
 0x7f1   : > { %7708 = vmatprep.subr.mxu0 %v8578_v4 }
 0x7f2   : > { %7709 = vmatpush3.msra.mxu0 %v6463_v1  ;;  %v6477_v1 = vld [vmem:[%s11682_s3 + $0x40] sm:$0xff] }
 0x7f3   : > { %7710 = vmatprep.subr.mxu0 %v8578_v4 }
 0x7f4   : > { %7711 = vmatpush3.msra.mxu0 %v6462_v63  ;;  %v6497_v63 = vld [vmem:[%s11672_s2 + $0x1f8] sm:$0xff] }
 0x7f5   : > { %7712 = vmatprep.subr.mxu0 %v8578_v4 }
 0x7f6   : > { %7713 = vmatpush3.msra.mxu0 %v6461_v2 }
 0x7f7   : > { %7714 = vmatprep.subr.mxu0 %v8578_v4 }
 0x7f8   : > { %7715 = vmatpush3.msra.mxu0 %v6460_v3  ;;  %v6496_v3 = vld [vmem:[%s11672_s2 + $0x1f0] sm:$0xff] }
 0x7f9   : > { %7716 = vmatprep.subr.mxu0 %v8578_v4 }
 0x7fa   : > { %7717 = vmatpush3.msra.mxu0 %v6459_v5 }
 0x7fb   : > { %7718 = vmatprep.subr.mxu0 %v8578_v4 }
 0x7fc   : > { %7719 = vmatpush3.msra.mxu0 %v6458_v6  ;;  %v6495_v6 = vld [vmem:[%s11672_s2 + $0x1e8] sm:$0xff] }
 0x7fd   : > { %7720 = vmatprep.subr.mxu0 %v8578_v4 }
 0x7fe   : > { %7721 = vmatpush3.msra.mxu0 %v6457_v8  ;;  %v6494_v8 = vld [vmem:[%s11672_s2 + $0x1e0] sm:$0xff] }
 0x7ff   : > { %7722 = vmatprep.subr.mxu0 %v8578_v4 }
 0x800   : > { %7723 = vmatpush3.msra.mxu0 %v6456_v9  ;;  %v6493_v9 = vld [vmem:[%s11672_s2 + $0x1d8] sm:$0xff] }
 0x801   : > { %7725 = vmatmul.mubr.f32.vlgmr.msra.gmra.mxu0 %v9319_v55  ;;  %7783 = vmatprep.subr.mxu0 %v8578_v4 }
 0x802   : > { %7784 = vmatpush3.msra.mxu0 %v6515_v10  ;;  %7815 = vmatprep.mubr.msk.f32.mxu0 %vm8579_vm0, %v8578_v4  ;;  %v6492_v10 = vld [vmem:[%s11672_s2 + $0x1d0] sm:$0xff] }
 0x803   : > { %7785 = vmatprep.subr.mxu0 %v8578_v4 }
 0x804   : > { %7786 = vmatpush3.msra.mxu0 %v6514_v11  ;;  %v6491_v11 = vld [vmem:[%s11672_s2 + $0x1c8] sm:$0xff] }
 0x805   : > { %7787 = vmatprep.subr.mxu0 %v8578_v4 }
 0x806   : > { %7788 = vmatpush3.msra.mxu0 %v6513_v12  ;;  %v6490_v12 = vld [vmem:[%s11672_s2 + $0x1c0] sm:$0xff] }
 0x807   : > { %7789 = vmatprep.subr.mxu0 %v8578_v4 }
 0x808   : > { %7790 = vmatpush3.msra.mxu0 %v6512_v13  ;;  %v6489_v13 = vld [vmem:[%s11672_s2 + $0x1b8] sm:$0xff] }
 0x809   : > { %7791 = vmatprep.subr.mxu0 %v8578_v4 }
 0x80a   : > { %7792 = vmatpush3.msra.mxu0 %v6511_v14  ;;  %v6488_v14 = vld [vmem:[%s11672_s2 + $0x1b0] sm:$0xff] }
 0x80b   : > { %7793 = vmatprep.subr.mxu0 %v8578_v4 }
 0x80c   : > { %7794 = vmatpush3.msra.mxu0 %v6510_v15  ;;  %v6487_v15 = vld [vmem:[%s11672_s2 + $0x1a8] sm:$0xff] }
 0x80d   : > { %7795 = vmatprep.subr.mxu0 %v8578_v4 }
 0x80e   : > { %7796 = vmatpush3.msra.mxu0 %v6509_v16  ;;  %v6486_v16 = vld [vmem:[%s11672_s2 + $0x1a0] sm:$0xff] }
 0x80f   : > { %7797 = vmatprep.subr.mxu0 %v8578_v4 }
 0x810   : > { %7798 = vmatpush3.msra.mxu0 %v6508_v17  ;;  %v6485_v17 = vld [vmem:[%s11672_s2 + $0x198] sm:$0xff] }
 0x811   : > { %7799 = vmatprep.subr.mxu0 %v8578_v4 }
 0x812   : > { %7800 = vmatpush3.msra.mxu0 %v6507_v18  ;;  %v6484_v18 = vld [vmem:[%s11672_s2 + $0x190] sm:$0xff] }
 0x813   : > { %7801 = vmatprep.subr.mxu0 %v8578_v4 }
 0x814   : > { %7802 = vmatpush3.msra.mxu0 %v6506_v19  ;;  %v6483_v19 = vld [vmem:[%s11672_s2 + $0x188] sm:$0xff] }
 0x815   : > { %7803 = vmatprep.subr.mxu0 %v8578_v4 }
 0x816   : > { %7804 = vmatpush3.msra.mxu0 %v6505_v20  ;;  %v6482_v20 = vld [vmem:[%s11672_s2 + $0x180] sm:$0xff]  ;;  %s6249_s2 = scalar_lea.sflag [#allocation3], %s860_s1 }
 0x817   : > { %7805 = vmatprep.subr.mxu0 %v8578_v4 }
 0x818   : > { %7806 = vmatpush3.msra.mxu0 %v6504_v21  ;;  %v6533_v21 = vld [vmem:[%s11677_s12 + $0x1f8] sm:$0xff] }
 0x819   : > { %7807 = vmatprep.subr.mxu0 %v8578_v4 }
 0x81a   : > { %7808 = vmatpush3.msra.mxu0 %v6503_v22  ;;  %v6532_v22 = vld [vmem:[%s11677_s12 + $0x1f0] sm:$0xff] }
 0x81b   : > { %7809 = vmatprep.subr.mxu0 %v8578_v4 }
 0x81c   : > { %7810 = vmatpush3.msra.mxu0 %v6502_v23  ;;  %v6531_v23 = vld [vmem:[%s11677_s12 + $0x1e8] sm:$0xff] }
 0x81d   : > { %7811 = vmatprep.subr.mxu0 %v8578_v4 }
 0x81e   : > { %7812 = vmatpush3.msra.mxu0 %v6501_v24  ;;  %v6530_v24 = vld [vmem:[%s11677_s12 + $0x1e0] sm:$0xff] }
 0x81f   : > { %7813 = vmatprep.subr.mxu0 %v8578_v4 }
 0x820   : > { %7814 = vmatpush3.msra.mxu0 %v6500_v27  ;;  %v6529_v27 = vld [vmem:[%s11677_s12 + $0x1d8] sm:$0xff] }
 0x821   : > { %7816 = vmatmul.mubr.f32.vlgmr.msra.gmra.mxu0 %v9319_v55  ;;  %7853 = vmatprep.subr.mxu0 %v8578_v4 }
 0x822   : > { %7855 = vmatprep.mubr.msk.f32.mxu0 %vm8579_vm0, %v8578_v4 }
 0x881   : > { %v9952_v28 = vpop.f32.mrf.mxu0 }
 0x883   : > { %v7610_v29 = vpop.f32.mrf.mxu0 }
 0x884   : > { %v6528_v29 = vld [vmem:[%s11677_s12 + $0x1d0] sm:$0xff] }
 0x8a1   : > { %v2475_v34 = vpop.f32.mrf.mxu0 }
 0x8a2   : > { %v2476_v35 = vadd.f32 %v6437_v30, %v2475_v34  ;;  %v6527_v30 = vld [vmem:[%s11677_s12 + $0x1c8] sm:$0xff]  ;;  %v6526_v34 = vld [vmem:[%s11677_s12 + $0x1c0] sm:$0xff] }
 0x8a3   : > { %v7656_v37 = vpop.f32.mrf.mxu0 }
 0x8a4   : > { %7730 = vmatmul.mubr.msk.f32.vlgmr.msra.gmra.mxu1 %vm1620_vm1, %v2476_v35  ;;  %v6525_v35 = vld [vmem:[%s11677_s12 + $0x1b8] sm:$0xff]  ;;  %v6524_v37 = vld [vmem:[%s11677_s12 + $0x1b0] sm:$0xff] }
 0x8a5   : > { %7734 = vmatprep.mubr.msk.f32.mxu1 %vm8579_vm0, %v8578_v4 }
 0x8c1   : > { %v2665_v39 = vpop.f32.mrf.mxu0 }
 0x8c2   : > { %v2666_v41 = vadd.f32 %v6473_v38, %v2665_v39  ;;  %v6523_v38 = vld [vmem:[%s11677_s12 + $0x1a8] sm:$0xff]  ;;  %v6522_v39 = vld [vmem:[%s11677_s12 + $0x1a0] sm:$0xff] }
 0x8c3   : > { %v7726_v42 = vpop.f32.mrf.mxu0 }
 0x8c4   : > { %7733 = vmatpush3.msra.mxu1 %v2666_v41  ;;  %v6521_v41 = vld [vmem:[%s11677_s12 + $0x198] sm:$0xff]  ;;  %v6520_v42 = vld [vmem:[%s11677_s12 + $0x190] sm:$0xff] }
 0x8c5   : > { %7737 = vmatprep.subr.mxu1 %v8578_v4 }
 0x8e1   : > { %v3095_v44 = vpop.f32.mrf.mxu0 }
 0x8e2   : > { %v3096_v46 = vadd.f32 %v6517_v43, %v3095_v44  ;;  %v6519_v43 = vld [vmem:[%s11677_s12 + $0x188] sm:$0xff]  ;;  %v6518_v44 = vld [vmem:[%s11677_s12 + $0x180] sm:$0xff] }
 0x8e3   : > { %v7817_v47 = vpop.f32.mrf.mxu0 }
 0x8e4   : > { %7854 = vmatpush3.xpose.msk.msra.mxu0 %vm1620_vm1, %v3096_v46  ;;  %v10129_v46 = vld [vmem:[%s10122_s4] sm:$0xff]  ;;  %v2381_v47 = vadd.f32 %v9720_v7, %v9952_v28 }
 0x8e5   : > { %7858 = vmatprep.subr.mxu0 %v8578_v4 }
 0x964   : > { %v2741_v48 = vpop.f32.mrf.mxu1 }
 0x965   : > { %v2745_v49 = vmul.f32 0.17677669, %v2741_v48 }
 0x966   : > { %v7731_v50 = vpop.f32.mrf.mxu1 }
 0x967   : > { %v2746_v51 = vsel %vm1698_vm2, %v2745_v49, -inf }
 0x968   : > { %2747 = vmax.xlane.f32.xlu0 %v2746_v51  ;;  %v6499_v51 = vld [vmem:[%s11679_s10 + $0x3] ss:$0 sm:$0xff]  ;;  %s8580_s10 = smov [#allocation2]  }
 0x9f1   : > { %v2748_v52 = vpop.xlane.xlu0 %2747 }
 0x9f2   : > { %v2749_v53 = vsub.f32 %v2745_v49, %v2748_v52 }
 0x9f4   : > { %v2750_v54 = vmul.f32 1.442695, %v2749_v53 }
 0x9f6   : > { %8449 = vpow2.f32 %v2750_v54 }
 0xa03   : > { %v8450_v56 = vpop.eup %8449 }
 0xa04   : > { %v2752_v57 = vsel %vm1698_vm2, %v8450_v56, 0.0 }
 0xa05   : > { %2753 = vadd.xlane.f32.xlu1 %v2752_v57 }
 0xa8e   : > { %v2754_v58 = vpop.xlane.xlu1 %2753 }
 0xa8f   : > { %8451 = vrcp.f32 %v2754_v58 }
 0xa9c   : > { %v8452_v59 = vpop.eup %8451 }
 0xa9d   : > { %v2756_v60 = vmul.f32 %v8452_v59, %v8450_v56 }
 0xa9f   : > { %7735 = vmatmul.mubr.msk.f32.vlgmr.msra.gmra.mxu1 %vm1698_vm2, %v2756_v60 }
 0xaa0   : > { %7738 = vmatpush3.msra.mxu1 %v6480_v61  ;;  %7745 = vmatprep.mubr.msk.f32.mxu1 %vm8579_vm0, %v8578_v4 }
 0xaa1   : > { %7739 = vmatprep.subr.mxu1 %v8578_v4 }
 0xaa2   : > { %7740 = vmatpush3.msra.mxu1 %v6479_v62 }
 0xaa3   : > { %7741 = vmatprep.subr.mxu1 %v8578_v4 }
 0xaa4   : > { %7742 = vmatpush3.msra.mxu1 %v6478_v0 }
 0xaa5   : > { %7743 = vmatprep.subr.mxu1 %v8578_v4 }
 0xaa6   : > { %7744 = vmatpush3.msra.mxu1 %v6477_v1 }
 0xaa7   : > { %7748 = vmatprep.subr.mxu1 %v8578_v4 }
 0xb5f   : > { %v2826_v2 = vpop.f32.mrf.mxu1 }
 0xb60   : > { %7746 = vmatmul.mubr.msk.f32.vlgmr.msra.gmra.mxu1 %vm1620_vm1, %v2826_v2 }
 0xb61   : > { %7749 = vmatpush3.msra.mxu1 %v6497_v63  ;;  %v7736_v5 = vpop.f32.mrf.mxu1  ;;  %7780 = vmatprep.mubr.msk.f32.mxu1 %vm8579_vm0, %v8578_v4 }
 0xb62   : > { %7750 = vmatprep.subr.mxu1 %v8578_v4 }
 0xb63   : > { %7751 = vmatpush3.msra.mxu1 %v6496_v3 }
 0xb64   : > { %7752 = vmatprep.subr.mxu1 %v8578_v4 }
 0xb65   : > { %7753 = vmatpush3.msra.mxu1 %v6495_v6  ;;  %v6542_v6 = vld [vmem:[%s11682_s3 + $0x78] sm:$0xff] }
 0xb66   : > { %7754 = vmatprep.subr.mxu1 %v8578_v4 }
 0xb67   : > { %7755 = vmatpush3.msra.mxu1 %v6494_v8  ;;  %v6541_v8 = vld [vmem:[%s11682_s3 + $0x70] sm:$0xff] }
 0xb68   : > { %7756 = vmatprep.subr.mxu1 %v8578_v4 }
 0xb69   : > { %7757 = vmatpush3.msra.mxu1 %v6493_v9  ;;  %v6540_v9 = vld [vmem:[%s11682_s3 + $0x68] sm:$0xff] }
 0xb6a   : > { %7758 = vmatprep.subr.mxu1 %v8578_v4 }
 0xb6b   : > { %7759 = vmatpush3.msra.mxu1 %v6492_v10  ;;  %v6539_v10 = vld [vmem:[%s11682_s3 + $0x60] sm:$0xff] }
 0xb6c   : > { %7760 = vmatprep.subr.mxu1 %v8578_v4 }
 0xb6d   : > { %7761 = vmatpush3.msra.mxu1 %v6491_v11  ;;  %v3571_v11 = vld [vmem:[%s11602_s16 + $0x78] sm:$0xff] }
 0xb6e   : > { %7762 = vmatprep.subr.mxu1 %v8578_v4 }
 0xb6f   : > { %7763 = vmatpush3.msra.mxu1 %v6490_v12  ;;  %v3570_v12 = vld [vmem:[%s11602_s16 + $0x70] sm:$0xff] }
 0xb70   : > { %7764 = vmatprep.subr.mxu1 %v8578_v4 }
 0xb71   : > { %7765 = vmatpush3.msra.mxu1 %v6489_v13  ;;  %v3569_v13 = vld [vmem:[%s11602_s16 + $0x68] sm:$0xff] }
 0xb72   : > { %7766 = vmatprep.subr.mxu1 %v8578_v4 }
 0xb73   : > { %7767 = vmatpush3.msra.mxu1 %v6488_v14  ;;  %v3568_v14 = vld [vmem:[%s11602_s16 + $0x60] sm:$0xff] }
 0xb74   : > { %7768 = vmatprep.subr.mxu1 %v8578_v4 }
 0xb75   : > { %7769 = vmatpush3.msra.mxu1 %v6487_v15  ;;  %v3567_v15 = vld [vmem:[%s11602_s16 + $0x58] sm:$0xff] }
 0xb76   : > { %7770 = vmatprep.subr.mxu1 %v8578_v4 }
 0xb77   : > { %7771 = vmatpush3.msra.mxu1 %v6486_v16  ;;  %v3566_v16 = vld [vmem:[%s11602_s16 + $0x50] sm:$0xff] }
 0xb78   : > { %7772 = vmatprep.subr.mxu1 %v8578_v4 }
 0xb79   : > { %7773 = vmatpush3.msra.mxu1 %v6485_v17  ;;  %v3565_v17 = vld [vmem:[%s11602_s16 + $0x48] sm:$0xff] }
 0xb7a   : > { %7774 = vmatprep.subr.mxu1 %v8578_v4 }
 0xb7b   : > { %7775 = vmatpush3.msra.mxu1 %v6484_v18  ;;  %v3564_v18 = vld [vmem:[%s11602_s16 + $0x40] sm:$0xff] }
 0xb7c   : > { %7776 = vmatprep.subr.mxu1 %v8578_v4 }
 0xb7d   : > { %7777 = vmatpush3.msra.mxu1 %v6483_v19  ;;  %v3563_v19 = vld [vmem:[%s11602_s16 + $0x38] sm:$0xff] }
 0xb7e   : > { %7778 = vmatprep.subr.mxu1 %v8578_v4 }
 0xb7f   : > { %7779 = vmatpush3.msra.mxu1 %v6482_v20  ;;  %v3562_v20 = vld [vmem:[%s11602_s16 + $0x30] sm:$0xff] }
 0xb80   : > { %7781 = vmatmul.mubr.f32.vlgmr.msra.gmra.mxu1 %v9319_v55  ;;  %7818 = vmatprep.subr.mxu1 %v8578_v4 }
 0xb81   : > { %7819 = vmatpush3.msra.mxu1 %v6533_v21  ;;  %7850 = vmatprep.mubr.msk.f32.mxu1 %vm8579_vm0, %v8578_v4  ;;  %v3561_v21 = vld [vmem:[%s11602_s16 + $0x28] sm:$0xff] }
 0xb82   : > { %7820 = vmatprep.subr.mxu1 %v8578_v4 }
 0xb83   : > { %7821 = vmatpush3.msra.mxu1 %v6532_v22  ;;  %v3560_v22 = vld [vmem:[%s11602_s16 + $0x20] sm:$0xff] }
 0xb84   : > { %7822 = vmatprep.subr.mxu1 %v8578_v4 }
 0xb85   : > { %7823 = vmatpush3.msra.mxu1 %v6531_v23  ;;  %v3559_v23 = vld [vmem:[%s11602_s16 + $0x18] sm:$0xff] }
 0xb86   : > { %7824 = vmatprep.subr.mxu1 %v8578_v4 }
 0xb87   : > { %7825 = vmatpush3.msra.mxu1 %v6530_v24  ;;  %v3558_v24 = vld [vmem:[%s11602_s16 + $0x10] sm:$0xff] }
 0xb88   : > { %7826 = vmatprep.subr.mxu1 %v8578_v4 }
 0xb89   : > { %7827 = vmatpush3.msra.mxu1 %v6529_v27  ;;  %v3557_v27 = vld [vmem:[%s11602_s16 + $0x8] sm:$0xff] }
 0xb8a   : > { %7828 = vmatprep.subr.mxu1 %v8578_v4 }
 0xb8b   : > { %7829 = vmatpush3.msra.mxu1 %v6528_v29 }
 0xb8c   : > { %7830 = vmatprep.subr.mxu1 %v8578_v4 }
 0xb8d   : > { %7831 = vmatpush3.msra.mxu1 %v6527_v30 }
 0xb8e   : > { %7832 = vmatprep.subr.mxu1 %v8578_v4 }
 0xb8f   : > { %7833 = vmatpush3.msra.mxu1 %v6526_v34  ;;  %v10218_v34 = vld [vmem:[%s10122_s4 + $0x8] sm:$0xff] }
 0xb90   : > { %7834 = vmatprep.subr.mxu1 %v8578_v4 }
 0xb91   : > { %7835 = vmatpush3.msra.mxu1 %v6525_v35  ;;  %v3556_v35 = vld [vmem:[%s11602_s16] sm:$0xff] }
 0xb92   : > { %7836 = vmatprep.subr.mxu1 %v8578_v4 }
 0xb93   : > { %7837 = vmatpush3.msra.mxu1 %v6524_v37  ;;  %v3478_v37 = vld [vmem:[%s11600_s14 + $0x78] sm:$0xff] }
 0xb94   : > { %7838 = vmatprep.subr.mxu1 %v8578_v4 }
 0xb95   : > { %7839 = vmatpush3.msra.mxu1 %v6523_v38  ;;  %v3477_v38 = vld [vmem:[%s11600_s14 + $0x70] sm:$0xff] }
 0xb96   : > { %7840 = vmatprep.subr.mxu1 %v8578_v4 }
 0xb97   : > { %7841 = vmatpush3.msra.mxu1 %v6522_v39  ;;  %v3476_v39 = vld [vmem:[%s11600_s14 + $0x68] sm:$0xff] }
 0xb98   : > { %7842 = vmatprep.subr.mxu1 %v8578_v4 }
 0xb99   : > { %7843 = vmatpush3.msra.mxu1 %v6521_v41  ;;  %v3475_v41 = vld [vmem:[%s11600_s14 + $0x60] sm:$0xff] }
 0xb9a   : > { %7844 = vmatprep.subr.mxu1 %v8578_v4 }
 0xb9b   : > { %7845 = vmatpush3.msra.mxu1 %v6520_v42  ;;  %v3474_v42 = vld [vmem:[%s11600_s14 + $0x58] sm:$0xff] }
 0xb9c   : > { %7846 = vmatprep.subr.mxu1 %v8578_v4 }
 0xb9d   : > { %7847 = vmatpush3.msra.mxu1 %v6519_v43  ;;  %v1010_v43 = vsub.s32 2, %v9304_v36 }
 0xb9e   : > { %7848 = vmatprep.subr.mxu1 %v8578_v4 }
 0xb9f   : > { %7849 = vmatpush3.msra.mxu1 %v6518_v44  ;;  %v8509_v44 = vld [vmem:[%s11676_s27] sm:$0xff] }
 0xba0   : > { %7851 = vmatmul.mubr.f32.vlgmr.msra.gmra.mxu1 %v9319_v55  ;;  %v6535_v55 = vld [vmem:[%s11681_s11 + $0x3] ss:$0 sm:$0xff]  ;;  %7909 = vmatprep.subr.mxu1 %v3571_v11  ;;  %s8520_s11 = sshll.u32 %s8580_s10, 4  ;;  %s8521_s11 = int_to_ptr.vmem [resolvable:$false] %s8520_s11 }
 0xba1   : > { %7941 = vmatprep.mubr.f32.mxu1 %v10129_v46  ;;  %7910 = vmatpush3.msra.mxu1 %v3571_v11  ;;  %s8522_s0 = scalar_lea.vmem %s8521_s11, 256 }
 0xba2   : > { %7911 = vmatprep.subr.mxu1 %v3570_v12 }
 0xba3   : > { %7912 = vmatpush3.msra.mxu1 %v3570_v12 }
 0xba4   : > { %7913 = vmatprep.subr.mxu1 %v3569_v13 }
 0xba5   : > { %7914 = vmatpush3.msra.mxu1 %v3569_v13 }
 0xba6   : > { %7915 = vmatprep.subr.mxu1 %v3568_v14 }
 0xba7   : > { %7916 = vmatpush3.msra.mxu1 %v3568_v14 }
 0xba8   : > { %7917 = vmatprep.subr.mxu1 %v3567_v15 }
 0xba9   : > { %7918 = vmatpush3.msra.mxu1 %v3567_v15 }
 0xbaa   : > { %7919 = vmatprep.subr.mxu1 %v3566_v16 }
 0xbab   : > { %7920 = vmatpush3.msra.mxu1 %v3566_v16 }
 0xbac   : > { %7921 = vmatprep.subr.mxu1 %v3565_v17 }
 0xbad   : > { %7922 = vmatpush3.msra.mxu1 %v3565_v17 }
 0xbae   : > { %7923 = vmatprep.subr.mxu1 %v3564_v18 }
 0xbaf   : > { %7924 = vmatpush3.msra.mxu1 %v3564_v18  ;;  %v6545_v18 = vld [vmem:[%s11599_s13] ss:$0 sm:$0xff] }
 0xbb0   : > { %7925 = vmatprep.subr.mxu1 %v3563_v19 }
 0xbb1   : > { %7926 = vmatpush3.msra.mxu1 %v3563_v19 }
 0xbb2   : > { %7927 = vmatprep.subr.mxu1 %v3562_v20 }
 0xbb3   : > { %7928 = vmatpush3.msra.mxu1 %v3562_v20 }
 0xbb4   : > { %7929 = vmatprep.subr.mxu1 %v3561_v21 }
 0xbb5   : > { %7930 = vmatpush3.msra.mxu1 %v3561_v21 }
 0xbb6   : > { %7931 = vmatprep.subr.mxu1 %v3560_v22 }
 0xbb7   : > { %7932 = vmatpush3.msra.mxu1 %v3560_v22 }
 0xbb8   : > { %7933 = vmatprep.subr.mxu1 %v3559_v23 }
 0xbb9   : > { %7934 = vmatpush3.msra.mxu1 %v3559_v23 }
 0xbba   : > { %7935 = vmatprep.subr.mxu1 %v3558_v24 }
 0xbbb   : > { %7936 = vmatpush3.msra.mxu1 %v3558_v24 }
 0xbbc   : > { %7937 = vmatprep.subr.mxu1 %v3557_v27 }
 0xbbd   : > { %7938 = vmatpush3.msra.mxu1 %v3557_v27 }
 0xbbe   : > { %7939 = vmatprep.subr.mxu1 %v3556_v35 }
 0xbbf   : > { %7940 = vmatpush3.msra.mxu1 %v3556_v35  ;;  %v10323_v35 = vld [vmem:[%s11609_s23] ss:$0 sm:$0xff] }
 0xbc0   : > { %7942 = vmatmul.mubr.f32.vlgmr.msra.gmra.mxu1 %v10218_v34  ;;  %7979 = vmatprep.subr.mxu1 %v8578_v4 }
 0xbc1   : > { %7983 = vmatprep.mubr.msk.f32.mxu1 %vm8579_vm0, %v8578_v4 }
 0xc20   : > { %v2904_v48 = vpop.f32.mrf.mxu1 }
 0xc21   : > { %v10136_v49 = vadd.f32 %v2904_v48, %v2381_v47  ;;  %v1011_v47 = vrot.slane %v8509_v44, %v1010_v43  ;;  %v6546_v44 = vld [vmem:[%s11601_s15] ss:$0 sm:$0xff] }
 0xc22   : > { %v7747_v50 = vpop.f32.mrf.mxu1 }
 0xc23   : > { %v1173_v48 = vadd.f32 %v9298_v31, %v1011_v47  ;;  %v3473_v31 = vld [vmem:[%s11600_s14 + $0x50] sm:$0xff] }
 0xc40   : > { %v3000_v52 = vpop.f32.mrf.mxu1 }
 0xc41   : > { %v3001_v53 = vadd.f32 %v6499_v51, %v3000_v52  ;;  %v6544_v51 = vld [vmem:[%s11684_s7] ss:$0 sm:$0xff]  ;;  %s11685_s7 = sld [smem:[#allocation27_spill]] }
 0xc42   : > { %v7782_v54 = vpop.f32.mrf.mxu1 }
 0xc43   : > { %7856 = vmatmul.mubr.msk.f32.vlgmr.msra.gmra.mxu0 %vm1620_vm1, %v3001_v53  ;;  %v3445_v54 = vrot.slane %v1173_v48, %v9313_v45 }
 0xc44   : > { %7860 = vmatprep.mubr.msk.f32.mxu0 %vm8579_vm0, %v8578_v4 }
 0xc60   : > { %v3190_v7 = vpop.f32.mrf.mxu1 }
 0xc61   : > { %v3191_v28 = vadd.f32 %v6535_v55, %v3190_v7 }
 0xc62   : > { %v7852_v56 = vpop.f32.mrf.mxu1 }
 0xc63   : > { %7859 = vmatpush3.msra.mxu0 %v3191_v28  ;;  %v8510_v28 = vld [vmem:[%s8805_s28] sm:$0xff]  ;;  %s11691_s28 = smov %s11690_s8 }
 0xc64   : > { %7863 = vmatprep.subr.mxu0 %v8578_v4 }
 0xd03   : > { %v3266_v57 = vpop.f32.mrf.mxu0 }
 0xd04   : > { %v3270_v58 = vmul.f32 0.17677669, %v3266_v57 }
 0xd05   : > { %v7857_v59 = vpop.f32.mrf.mxu0 }
 0xd06   : > { %v3271_v60 = vsel %vm1698_vm2, %v3270_v58, -inf  ;;  %v3470_v59 = vld [vmem:[%s11600_s14 + $0x38] sm:$0xff] }
 0xd07   : > { %3272 = vmax.xlane.f32.xlu0 %v3271_v60  ;;  %v3469_v60 = vld [vmem:[%s11600_s14 + $0x30] sm:$0xff] }
 0xd90   : > { %v3273_v61 = vpop.xlane.xlu0 %3272 }
 0xd91   : > { %v3274_v62 = vsub.f32 %v3270_v58, %v3273_v61  ;;  %v3471_v58 = vld [vmem:[%s11600_s14 + $0x40] sm:$0xff]  ;;  %v3468_v61 = vld [vmem:[%s11600_s14 + $0x28] sm:$0xff] }
 0xd93   : > { %v3275_v0 = vmul.f32 1.442695, %v3274_v62  ;;  %v3467_v62 = vld [vmem:[%s11600_s14 + $0x20] sm:$0xff] }
 0xd95   : > { %8453 = vpow2.f32 %v3275_v0  ;;  %v3466_v0 = vld [vmem:[%s11600_s14 + $0x18] sm:$0xff] }
 0xda2   : > { %v8454_v1 = vpop.eup %8453 }
 0xda3   : > { %v3277_v63 = vsel %vm1698_vm2, %v8454_v1, 0.0 }
 0xda4   : > { %3278 = vadd.xlane.f32.xlu1 %v3277_v63  ;;  %v3464_v63 = vld [vmem:[%s11600_s14 + $0x8] sm:$0xff] }
 0xe2d   : > { %v3279_v2 = vpop.xlane.xlu1 %3278 }
 0xe2e   : > { %8455 = vrcp.f32 %v3279_v2  ;;  %v3463_v2 = vld [vmem:[%s11600_s14] sm:$0xff] }
 0xe3b   : > { %v8456_v3 = vpop.eup %8455 }
 0xe3c   : > { %v3281_v5 = vmul.f32 %v8456_v3, %v8454_v1  ;;  %v3465_v1 = vld [vmem:[%s11600_s14 + $0x10] sm:$0xff]  ;;  %v6547_v3 = vld [vmem:[%s11603_s17] ss:$0 sm:$0xff] }
 0xe3e   : > { %7861 = vmatmul.mubr.msk.f32.vlgmr.msra.gmra.mxu0 %vm1698_vm2, %v3281_v5  ;;  %v7943_v5 = vpop.f32.mrf.mxu1 }
 0xe3f   : > { %7864 = vmatpush3.msra.mxu0 %v6542_v6  ;;  %7871 = vmatprep.mubr.msk.f32.mxu0 %vm8579_vm0, %v8578_v4  ;;  %v3651_v6 = vadd.f32 %v7943_v5, %v6547_v3  ;;  %v3658_v5 = vld [vmem:[%s11604_s18 + $0x20] sm:$0xff] }
 0xe40   : > { %7865 = vmatprep.subr.mxu0 %v8578_v4 }
 0xe41   : > { %7866 = vmatpush3.msra.mxu0 %v6541_v8  ;;  %v3645_v8 = vpop.f32.mrf.mxu1 }
 0xe42   : > { %7867 = vmatprep.subr.mxu0 %v8578_v4 }
 0xe43   : > { %7868 = vmatpush3.msra.mxu0 %v6540_v9  ;;  %v3646_v9 = vadd.f32 %v6547_v3, %v3645_v8  ;;  %v3659_v3 = vld [vmem:[%s11604_s18 + $0x28] sm:$0xff]  ;;  %v3656_v8 = vld [vmem:[%s11604_s18 + $0x10] sm:$0xff] }
 0xe44   : > { %7869 = vmatprep.subr.mxu0 %v8578_v4 }
 0xe45   : > { %7870 = vmatpush3.msra.mxu0 %v6539_v10  ;;  %v3771_v10 = vmul.f32 %v3651_v6, %v3651_v6  ;;  %v3770_v12 = vmul.f32 %v3646_v9, %v3646_v9 }
 0xe46   : > { %7874 = vmatprep.subr.mxu0 %v8578_v4 }
 0xe47   : > { %v3775_v11 = vsel %vm1620_vm1, %v3771_v10, 0.0  ;;  %v3772_v13 = vsel %vm1620_vm1, %v3770_v12, 0.0  ;;  %v3654_v10 = vld [vmem:[%s11604_s18] sm:$0xff] }
 0xe48   : > { %3776 = vadd.xlane.f32.xlu1 %v3775_v11 }
 0xed1   : > { %v3777_v21 = vpop.xlane.xlu1 %3776 }
 0xed2   : > { %v3779_v22 = vmul.f32 0.03125, %v3777_v21  ;;  %v6583_v21 = vld [vmem:[%s11602_s16 + $0xd0] sm:$0xff] }
 0xed4   : > { %v3781_v24 = vadd.f32 1e-06, %v3779_v22  ;;  %v6582_v22 = vld [vmem:[%s11602_s16 + $0xc8] sm:$0xff] }
 0xefe   : > { %v3351_v29 = vpop.f32.mrf.mxu0 }
 0xeff   : > { %7872 = vmatmul.mubr.msk.f32.vlgmr.msra.gmra.mxu0 %vm1620_vm1, %v3351_v29 }
 0xf00   : > { %v7862_v30 = vpop.f32.mrf.mxu0  ;;  %7906 = vmatprep.mubr.msk.f32.mxu0 %vm8579_vm0, %v8578_v4  ;;  %7875 = vmatpush3.msra.mxu0 %v3478_v37 }
 0xf01   : > { %7876 = vmatprep.subr.mxu0 %v8578_v4 }
 0xf02   : > { %7877 = vmatpush3.msra.mxu0 %v3477_v38 }
 0xf03   : > { %7878 = vmatprep.subr.mxu0 %v8578_v4 }
 0xf04   : > { %7879 = vmatpush3.msra.mxu0 %v3476_v39 }
 0xf05   : > { %7880 = vmatprep.subr.mxu0 %v8578_v4 }
 0xf06   : > { %7881 = vmatpush3.msra.mxu0 %v3475_v41 }
 0xf07   : > { %7882 = vmatprep.subr.mxu0 %v8578_v4 }
 0xf08   : > { %7883 = vmatpush3.msra.mxu0 %v3474_v42 }
 0xf09   : > { %7884 = vmatprep.subr.mxu0 %v8578_v4 }
 0xf0a   : > { %7885 = vmatpush3.msra.mxu0 %v3473_v31 }
 0xf0b   : > { %7886 = vmatprep.subr.mxu0 %v8578_v4 }
 0xfbf   : > { %v3429_v50 = vpop.f32.mrf.mxu0 }
 0xfc0   : > { %v3433_v52 = vadd.f32 %v3429_v50, %v10136_v49  ;;  %v3472_v49 = vld [vmem:[%s11600_s14 + $0x48] sm:$0xff] }
 0xfc1   : > { %v7873_v53 = vpop.f32.mrf.mxu0  ;;  %7887 = vmatpush3.msra.mxu0 %v3472_v49  ;;  %v3669_v49 = vld [vmem:[%s11604_s18 + $0x78] sm:$0xff] }
 0xfc2   : > { %v3441_v55 = vadd.f32 %v6544_v51, %v3433_v52  ;;  %7888 = vmatprep.subr.mxu0 %v8578_v4 }
 0xfc3   : > { %7889 = vmatpush3.msra.mxu0 %v3471_v58  ;;  %v3668_v58 = vld [vmem:[%s11604_s18 + $0x70] sm:$0xff] }
 0xfc4   : > { %v3446_v7 = vmul.f32 %v3445_v54, %v3441_v55  ;;  %7890 = vmatprep.subr.mxu0 %v8578_v4 }
 0xfc5   : > { %7891 = vmatpush3.msra.mxu0 %v3470_v59  ;;  %v3667_v59 = vld [vmem:[%s11604_s18 + $0x68] sm:$0xff] }
 0xfc6   : > { %v10260_v56 = vadd.f32 %v8510_v28, %v3446_v7  ;;  %7892 = vmatprep.subr.mxu0 %v8578_v4  ;;  %v10338_v28 = vld [vmem:[%s11608_s22] ss:$0 sm:$0xff] }
 0xfc7   : > { %7893 = vmatpush3.msra.mxu0 %v3469_v60  ;;  %v3666_v60 = vld [vmem:[%s11604_s18 + $0x60] sm:$0xff] }
 0xfc8   : > { %v3449_v57 = vmul.f32 %v10260_v56, %v10260_v56  ;;  %7894 = vmatprep.subr.mxu0 %v8578_v4 }
 0xfc9   : > { %7895 = vmatpush3.msra.mxu0 %v3468_v61  ;;  %v3665_v61 = vld [vmem:[%s11604_s18 + $0x58] sm:$0xff] }
 0xfca   : > { %3450 = vadd.xlane.f32.xlu0 %v3449_v57  ;;  %7896 = vmatprep.subr.mxu0 %v8578_v4 }
 0xfcb   : > { %7897 = vmatpush3.msra.mxu0 %v3467_v62  ;;  %v3664_v62 = vld [vmem:[%s11604_s18 + $0x50] sm:$0xff] }
 0xfcc   : > { %7898 = vmatprep.subr.mxu0 %v8578_v4 }
 0xfcd   : > { %7899 = vmatpush3.msra.mxu0 %v3466_v0  ;;  %v3663_v0 = vld [vmem:[%s11604_s18 + $0x48] sm:$0xff] }
 0xfce   : > { %7900 = vmatprep.subr.mxu0 %v8578_v4  ;;  %3773 = vadd.xlane.f32.xlu0 %v3772_v13 }
 0xfcf   : > { %7901 = vmatpush3.msra.mxu0 %v3465_v1  ;;  %v3662_v1 = vld [vmem:[%s11604_s18 + $0x40] sm:$0xff] }
 0xfd0   : > { %7902 = vmatprep.subr.mxu0 %v8578_v4 }
 0xfd1   : > { %7903 = vmatpush3.msra.mxu0 %v3464_v63  ;;  %v3661_v63 = vld [vmem:[%s11604_s18 + $0x38] sm:$0xff] }
 0xfd2   : > { %7904 = vmatprep.subr.mxu0 %v8578_v4 }
 0xfd3   : > { %7905 = vmatpush3.msra.mxu0 %v3463_v2  ;;  %v3660_v2 = vld [vmem:[%s11604_s18 + $0x30] sm:$0xff] }
 0xfd4   : > { %7944 = vmatprep.subr.mxu0 %v3669_v49 }
0x1053   : > { %v3451_v14 = vpop.xlane.xlu0 %3450 }
0x1054   : > { %v3452_v15 = vmul.f32 0.0078125, %v3451_v14 }
0x1056   : > { %v3453_v16 = vadd.f32 1e-06, %v3452_v15  ;;  %v6588_v15 = vld [vmem:[%s11602_s16 + $0xf8] sm:$0xff] }
0x1057   : > { %v3774_v23 = vpop.xlane.xlu0 %3773 }
0x1058   : > { %8457 = vrsqrt.f32 %v3453_v16  ;;  %v3778_v27 = vmul.f32 0.03125, %v3774_v23  ;;  %v6587_v16 = vld [vmem:[%s11602_s16 + $0xf0] sm:$0xff]  ;;  %v6581_v23 = vld [vmem:[%s11602_s16 + $0xc0] sm:$0xff] }
0x1059   : > { %8459 = vrsqrt.f32 %v3781_v24  ;;  %v6580_v24 = vld [vmem:[%s11602_s16 + $0xb8] sm:$0xff] }
0x105a   : > { %v3780_v29 = vadd.f32 1e-06, %v3778_v27  ;;  %v6579_v27 = vld [vmem:[%s11602_s16 + $0xb0] sm:$0xff] }
0x105c   : > { %8461 = vrsqrt.f32 %v3780_v29  ;;  %v6578_v29 = vld [vmem:[%s11602_s16 + $0xa8] sm:$0xff] }
0x1065   : > { %v8458_v17 = vpop.eup %8457 }
0x1066   : > { %v3455_v19 = vmul.f32 %v8458_v17, %v10260_v56  ;;  %v8460_v30 = vpop.eup %8459  ;;  %v6586_v17 = vld [vmem:[%s11602_s16 + $0xe8] sm:$0xff] }
0x1067   : > { %v3785_v37 = vmul.f32 %v8460_v30, %v3651_v6  ;;  %v3657_v6 = vld [vmem:[%s11604_s18 + $0x18] sm:$0xff]  ;;  %v6577_v30 = vld [vmem:[%s11602_s16 + $0xa0] sm:$0xff] }
0x1068   : > { %v10316_v20 = vmul.f32 %v6545_v18, %v3455_v19  ;;  %v6585_v18 = vld [vmem:[%s11602_s16 + $0xe0] sm:$0xff]  ;;  %v6584_v19 = vld [vmem:[%s11602_s16 + $0xd8] sm:$0xff] }
0x1069   : > { %v8462_v38 = vpop.eup %8461  ;;  %v3793_v39 = vmul.f32 %v10323_v35, %v3785_v37  ;;  %v6576_v37 = vld [vmem:[%s11602_s16 + $0x98] sm:$0xff] }
0x106a   : > { %7907 = vmatmul.mubr.f32.vlgmr.msra.gmra.mxu0 %v10316_v20  ;;  %v3784_v41 = vmul.f32 %v8462_v38, %v3646_v9  ;;  %v3655_v9 = vld [vmem:[%s11604_s18 + $0x8] sm:$0xff]  ;;  %v6575_v38 = vld [vmem:[%s11602_s16 + $0x90] sm:$0xff] }
0x106b   : > { %7976 = vmatprep.mubr.f32.mxu0 %v10129_v46  ;;  %7980 = vmatpush3.xpose.msk.msra.mxu1 %vm1620_vm1, %v3793_v39  ;;  %v6574_v39 = vld [vmem:[%s11602_s16 + $0x88] sm:$0xff] }
0x106c   : > { %7981 = vmatprep.subr.mxu1 %v8578_v4  ;;  %v3792_v42 = vmul.f32 %v10323_v35, %v3784_v41  ;;  %7945 = vmatpush3.msra.mxu0 %v3669_v49  ;;  %v6573_v41 = vld [vmem:[%s11602_s16 + $0x80] sm:$0xff] }
0x106d   : > { %7946 = vmatprep.subr.mxu0 %v3668_v58 }
0x106e   : > { %7947 = vmatpush3.msra.mxu0 %v3668_v58 }
0x106f   : > { %7982 = vmatpush3.xpose.msk.msra.mxu1 %vm1620_vm1, %v3792_v42  ;;  %7948 = vmatprep.subr.mxu0 %v3667_v59 }
0x1070   : > { %7986 = vmatprep.subr.mxu1 %v8578_v4  ;;  %7949 = vmatpush3.msra.mxu0 %v3667_v59 }
0x1071   : > { %7950 = vmatprep.subr.mxu0 %v3666_v60 }
0x1072   : > { %7951 = vmatpush3.msra.mxu0 %v3666_v60 }
0x1073   : > { %7952 = vmatprep.subr.mxu0 %v3665_v61 }
0x1074   : > { %7953 = vmatpush3.msra.mxu0 %v3665_v61 }
0x1075   : > { %7954 = vmatprep.subr.mxu0 %v3664_v62 }
0x1076   : > { %7955 = vmatpush3.msra.mxu0 %v3664_v62 }
0x1077   : > { %7956 = vmatprep.subr.mxu0 %v3663_v0 }
0x1078   : > { %7957 = vmatpush3.msra.mxu0 %v3663_v0 }
0x1079   : > { %7958 = vmatprep.subr.mxu0 %v3662_v1 }
0x107a   : > { %7959 = vmatpush3.msra.mxu0 %v3662_v1 }
0x107b   : > { %7960 = vmatprep.subr.mxu0 %v3661_v63 }
0x107c   : > { %7961 = vmatpush3.msra.mxu0 %v3661_v63 }
0x107d   : > { %7962 = vmatprep.subr.mxu0 %v3660_v2 }
0x107e   : > { %7963 = vmatpush3.msra.mxu0 %v3660_v2  ;;  %v6570_v2 = vld [vmem:[%s11600_s14 + $0xf8] sm:$0xff] }
0x107f   : > { %7964 = vmatprep.subr.mxu0 %v3659_v3 }
0x1080   : > { %7965 = vmatpush3.msra.mxu0 %v3659_v3  ;;  %v6569_v3 = vld [vmem:[%s11600_s14 + $0xf0] sm:$0xff] }
0x1081   : > { %7966 = vmatprep.subr.mxu0 %v3658_v5 }
0x1082   : > { %7967 = vmatpush3.msra.mxu0 %v3658_v5  ;;  %v6568_v5 = vld [vmem:[%s11600_s14 + $0xe8] sm:$0xff] }
0x1083   : > { %7968 = vmatprep.subr.mxu0 %v3657_v6 }
0x1084   : > { %7969 = vmatpush3.msra.mxu0 %v3657_v6  ;;  %v6567_v6 = vld [vmem:[%s11600_s14 + $0xe0] sm:$0xff] }
0x1085   : > { %7970 = vmatprep.subr.mxu0 %v3656_v8 }
0x1086   : > { %7971 = vmatpush3.msra.mxu0 %v3656_v8  ;;  %v6566_v8 = vld [vmem:[%s11600_s14 + $0xd8] sm:$0xff] }
0x1087   : > { %7972 = vmatprep.subr.mxu0 %v3655_v9 }
0x1088   : > { %7973 = vmatpush3.msra.mxu0 %v3655_v9  ;;  %v6565_v9 = vld [vmem:[%s11600_s14 + $0xd0] sm:$0xff] }
0x1089   : > { %7974 = vmatprep.subr.mxu0 %v3654_v10 }
0x108a   : > { %7975 = vmatpush3.msra.mxu0 %v3654_v10  ;;  %v6564_v10 = vld [vmem:[%s11600_s14 + $0xc8] sm:$0xff] }
0x108b   : > { %7977 = vmatmul.mubr.f32.vlgmr.msra.gmra.mxu0 %v10218_v34  ;;  %8028 = vmatprep.subr.mxu0 %v6588_v15 }
0x108c   : > { %8060 = vmatprep.mubr.f32.mxu0 %v10129_v46  ;;  %8029 = vmatpush3.msra.mxu0 %v6588_v15  ;;  %v6559_v15 = vld [vmem:[%s11600_s14 + $0xa0] sm:$0xff] }
0x108d   : > { %8030 = vmatprep.subr.mxu0 %v6587_v16 }
0x108e   : > { %8031 = vmatpush3.msra.mxu0 %v6587_v16  ;;  %v6558_v16 = vld [vmem:[%s11600_s14 + $0x98] sm:$0xff] }
0x108f   : > { %8032 = vmatprep.subr.mxu0 %v6586_v17 }
0x1090   : > { %8033 = vmatpush3.msra.mxu0 %v6586_v17  ;;  %v6557_v17 = vld [vmem:[%s11600_s14 + $0x90] sm:$0xff] }
0x1091   : > { %8034 = vmatprep.subr.mxu0 %v6585_v18 }
0x1092   : > { %8035 = vmatpush3.msra.mxu0 %v6585_v18  ;;  %v6556_v18 = vld [vmem:[%s11600_s14 + $0x88] sm:$0xff] }
0x1093   : > { %8036 = vmatprep.subr.mxu0 %v6584_v19 }
0x1094   : > { %8037 = vmatpush3.msra.mxu0 %v6584_v19  ;;  %v6555_v19 = vld [vmem:[%s11600_s14 + $0x80] sm:$0xff] }
0x1095   : > { %8038 = vmatprep.subr.mxu0 %v6583_v21 }
0x1096   : > { %8039 = vmatpush3.msra.mxu0 %v6583_v21  ;;  %v6606_v21 = vld [vmem:[%s11604_s18 + $0xf8] sm:$0xff] }
0x1097   : > { %8040 = vmatprep.subr.mxu0 %v6582_v22 }
0x1098   : > { %8041 = vmatpush3.msra.mxu0 %v6582_v22  ;;  %v6605_v22 = vld [vmem:[%s11604_s18 + $0xf0] sm:$0xff] }
0x1099   : > { %8042 = vmatprep.subr.mxu0 %v6581_v23 }
0x109a   : > { %8043 = vmatpush3.msra.mxu0 %v6581_v23  ;;  %v6604_v23 = vld [vmem:[%s11604_s18 + $0xe8] sm:$0xff] }
0x109b   : > { %8044 = vmatprep.subr.mxu0 %v6580_v24 }
0x109c   : > { %8045 = vmatpush3.msra.mxu0 %v6580_v24  ;;  %v6603_v24 = vld [vmem:[%s11604_s18 + $0xe0] sm:$0xff] }
0x109d   : > { %8046 = vmatprep.subr.mxu0 %v6579_v27 }
0x109e   : > { %8047 = vmatpush3.msra.mxu0 %v6579_v27  ;;  %v6602_v27 = vld [vmem:[%s11604_s18 + $0xd8] sm:$0xff] }
0x109f   : > { %8048 = vmatprep.subr.mxu0 %v6578_v29 }
0x10a0   : > { %8049 = vmatpush3.msra.mxu0 %v6578_v29  ;;  %v6601_v29 = vld [vmem:[%s11604_s18 + $0xd0] sm:$0xff] }
0x10a1   : > { %8050 = vmatprep.subr.mxu0 %v6577_v30 }
0x10a2   : > { %8051 = vmatpush3.msra.mxu0 %v6577_v30  ;;  %v6600_v30 = vld [vmem:[%s11604_s18 + $0xc8] sm:$0xff] }
0x10a3   : > { %8052 = vmatprep.subr.mxu0 %v6576_v37 }
0x10a4   : > { %8053 = vmatpush3.msra.mxu0 %v6576_v37  ;;  %v6599_v37 = vld [vmem:[%s11604_s18 + $0xc0] sm:$0xff] }
0x10a5   : > { %8054 = vmatprep.subr.mxu0 %v6575_v38 }
0x10a6   : > { %8055 = vmatpush3.msra.mxu0 %v6575_v38  ;;  %v6598_v38 = vld [vmem:[%s11604_s18 + $0xb8] sm:$0xff] }
0x10a7   : > { %8056 = vmatprep.subr.mxu0 %v6574_v39 }
0x10a8   : > { %8057 = vmatpush3.msra.mxu0 %v6574_v39  ;;  %v6597_v39 = vld [vmem:[%s11604_s18 + $0xb0] sm:$0xff] }
0x10a9   : > { %8058 = vmatprep.subr.mxu0 %v6573_v41 }
0x10aa   : > { %8059 = vmatpush3.msra.mxu0 %v6573_v41  ;;  %v6596_v41 = vld [vmem:[%s11604_s18 + $0xa8] sm:$0xff] }
0x10ab   : > { %8061 = vmatmul.mubr.f32.vlgmr.msra.gmra.mxu0 %v10218_v34  ;;  %8098 = vmatprep.subr.mxu0 %v8578_v4 }
0x10ac   : > { %8102 = vmatprep.mubr.msk.f32.mxu0 %vm8579_vm0, %v8578_v4 }
0x112a   : > { %v3552_v47 = vpop.f32.mrf.mxu0 }
0x112b   : > { %v3553_v48 = vadd.f32 %v6546_v44, %v3552_v47 }
0x112c   : > { %v7908_v50 = vpop.f32.mrf.mxu0 }
0x112d   : > { %v3753_v51 = vmul.f32 %v3553_v48, %v3553_v48 }
0x112f   : > { %v3754_v52 = vsel %vm1620_vm1, %v3753_v51, 0.0 }
0x1130   : > { %3755 = vadd.xlane.f32.xlu1 %v3754_v52  ;;  %v6548_v52 = vld [vmem:[%s11605_s19] ss:$0 sm:$0xff] }
0x114b   : > { %v7978_v51 = vpop.f32.mrf.mxu0 }
0x11b9   : > { %v3756_v53 = vpop.xlane.xlu1 %3755 }
0x11ba   : > { %v3758_v54 = vmul.f32 0.03125, %v3756_v53  ;;  %v3749_v53 = vadd.f32 %v7978_v51, %v6548_v52  ;;  %v3962_v51 = vld [vmem:[%s11606_s20 + $0x18] sm:$0xff] }
0x11bc   : > { %v3759_v55 = vadd.f32 1e-06, %v3758_v54  ;;  %v3743_v54 = vpop.f32.mrf.mxu0 }
0x11be   : > { %8463 = vrsqrt.f32 %v3759_v55  ;;  %v3744_v55 = vadd.f32 %v6548_v52, %v3743_v54  ;;  %v3961_v52 = vld [vmem:[%s11606_s20 + $0x10] sm:$0xff]  ;;  %v3959_v54 = vld [vmem:[%s11606_s20] sm:$0xff] }
0x11cb   : > { %v8464_v7 = vpop.eup %8463 }
0x11cc   : > { %v3761_v57 = vmul.f32 %v8464_v7, %v3553_v48  ;;  %v6590_v7 = vld [vmem:[%s11603_s17 + $0x1] ss:$0 sm:$0xff] }
0x11ce   : > { %v3768_v31 = vmul.f32 %v10338_v28, %v3761_v57  ;;  %v8062_v57 = vpop.f32.mrf.mxu0 }
0x11d0   : > { %7984 = vmatmul.mubr.msk.f32.vlgmr.msra.gmra.mxu1 %vm1620_vm1, %v3768_v31  ;;  %v10456_v31 = vadd.f32 %v8062_v57, %v6590_v7  ;;  %v4149_v49 = vpop.f32.mrf.mxu0 }
0x11d1   : > { %7990 = vmatprep.mubr.msk.f32.mxu1 %vm8579_vm0, %v8578_v4  ;;  %7987 = vmatpush3.msra.mxu1 %v3749_v53  ;;  %v10458_v58 = vadd.f32 %v6590_v7, %v4149_v49  ;;  %v3960_v53 = vld [vmem:[%s11606_s20 + $0x8] sm:$0xff] }
0x11d2   : > { %7988 = vmatprep.subr.mxu1 %v8578_v4  ;;  %v4268_v59 = vmul.f32 %v10456_v31, %v10456_v31 }
0x11d3   : > { %7989 = vmatpush3.msra.mxu1 %v3744_v55  ;;  %v4267_v61 = vmul.f32 %v10458_v58, %v10458_v58 }
0x11d4   : > { %7993 = vmatprep.subr.mxu1 %v8578_v4  ;;  %v4272_v60 = vsel %vm1620_vm1, %v4268_v59, 0.0 }
0x11d5   : > { %v4269_v62 = vsel %vm1620_vm1, %v4267_v61, 0.0 }
0x1290   : > { %v3869_v11 = vpop.f32.mrf.mxu1 }
0x1291   : > { %v3873_v12 = vmul.f32 0.17677669, %v3869_v11  ;;  %v6563_v11 = vld [vmem:[%s11600_s14 + $0xc0] sm:$0xff] }
0x1292   : > { %v7985_v13 = vpop.f32.mrf.mxu1 }
0x1293   : > { %v3875_v14 = vsel %vm3874_vm3, %v3873_v12, -inf  ;;  %v6561_v13 = vld [vmem:[%s11600_s14 + $0xb0] sm:$0xff] }
0x1294   : > { %3876 = vmax.xlane.f32.xlu0 %v3875_v14  ;;  %v6560_v14 = vld [vmem:[%s11600_s14 + $0xa8] sm:$0xff] }
0x1298   : > { %4273 = vadd.xlane.f32.xlu0 %v4272_v60 }
0x131d   : > { %v3877_v42 = vpop.xlane.xlu0 %3876 }
0x131e   : > { %v3878_v44 = vsub.f32 %v3873_v12, %v3877_v42  ;;  %v6562_v12 = vld [vmem:[%s11600_s14 + $0xb8] sm:$0xff]  ;;  %v6595_v42 = vld [vmem:[%s11604_s18 + $0xa0] sm:$0xff] }
0x1320   : > { %v3879_v47 = vmul.f32 1.442695, %v3878_v44  ;;  %v6594_v44 = vld [vmem:[%s11604_s18 + $0x98] sm:$0xff] }
0x1321   : > { %v4274_v55 = vpop.xlane.xlu0 %4273 }
0x1322   : > { %8465 = vpow2.f32 %v3879_v47  ;;  %v6593_v47 = vld [vmem:[%s11604_s18 + $0x90] sm:$0xff]  ;;  %v4276_v7 = vmul.f32 0.03125, %v4274_v55  ;;  %v6644_v55 = vld [vmem:[%s11602_s16 + $0x138] sm:$0xff] }
0x1324   : > { %v4278_v49 = vadd.f32 1e-06, %v4276_v7  ;;  %v6643_v7 = vld [vmem:[%s11602_s16 + $0x130] sm:$0xff] }
0x132f   : > { %v8466_v48 = vpop.eup %8465 }
0x1330   : > { %v3881_v50 = vsel %vm3874_vm3, %v8466_v48, 0.0 }
0x1331   : > { %3882 = vadd.xlane.f32.xlu1 %v3881_v50  ;;  %v6591_v50 = vld [vmem:[%s11604_s18 + $0x80] sm:$0xff] }
0x1335   : > { %4270 = vadd.xlane.f32.xlu1 %v4269_v62 }
0x13ba   : > { %v3883_v0 = vpop.xlane.xlu1 %3882 }
0x13bb   : > { %8467 = vrcp.f32 %v3883_v0 }
0x13bc   : > { %8469 = vrsqrt.f32 %v4278_v49  ;;  %v6641_v49 = vld [vmem:[%s11602_s16 + $0x120] sm:$0xff] }
0x13be   : > { %v4271_v57 = vpop.xlane.xlu1 %4270 }
0x13bf   : > { %v4275_v59 = vmul.f32 0.03125, %v4271_v57  ;;  %v6642_v57 = vld [vmem:[%s11602_s16 + $0x128] sm:$0xff] }
0x13c1   : > { %v4277_v60 = vadd.f32 1e-06, %v4275_v59  ;;  %v6640_v59 = vld [vmem:[%s11602_s16 + $0x118] sm:$0xff] }
0x13c3   : > { %8471 = vrsqrt.f32 %v4277_v60  ;;  %v6639_v60 = vld [vmem:[%s11602_s16 + $0x110] sm:$0xff] }
0x13c8   : > { %v8468_v1 = vpop.eup %8467 }
0x13c9   : > { %v3885_v63 = vmul.f32 %v8468_v1, %v8466_v48  ;;  %v6592_v48 = vld [vmem:[%s11604_s18 + $0x88] sm:$0xff]  ;;  %v8470_v61 = vpop.eup %8469 }
0x13ca   : > { %v4282_v62 = vmul.f32 %v8470_v61, %v10456_v31  ;;  %v6572_v31 = vld [vmem:[%s11601_s15 + $0x1] ss:$0 sm:$0xff]  ;;  %v6638_v61 = vld [vmem:[%s11602_s16 + $0x108] sm:$0xff] }
0x13cb   : > { %7991 = vmatmul.mubr.msk.f32.vlgmr.msra.gmra.mxu1 %vm3874_vm3, %v3885_v63 }
0x13cc   : > { %7994 = vmatpush3.msra.mxu1 %v6570_v2  ;;  %8025 = vmatprep.mubr.msk.f32.mxu1 %vm8579_vm0, %v8578_v4  ;;  %v4284_v1 = vmul.f32 %v10323_v35, %v4282_v62  ;;  %v6637_v62 = vld [vmem:[%s11602_s16 + $0x100] sm:$0xff] }
0x13cd   : > { %7995 = vmatprep.subr.mxu1 %v8578_v4 }
0x13ce   : > { %7996 = vmatpush3.msra.mxu1 %v6569_v3  ;;  %8099 = vmatpush3.xpose.msk.msra.mxu0 %vm1620_vm1, %v4284_v1 }
0x13cf   : > { %7997 = vmatprep.subr.mxu1 %v8578_v4  ;;  %8100 = vmatprep.subr.mxu0 %v8578_v4 }
0x13d0   : > { %7998 = vmatpush3.msra.mxu1 %v6568_v5  ;;  %v8472_v0 = vpop.eup %8471 }
0x13d1   : > { %7999 = vmatprep.subr.mxu1 %v8578_v4  ;;  %v4281_v63 = vmul.f32 %v8472_v0, %v10458_v58 }
0x13d2   : > { %8000 = vmatpush3.msra.mxu1 %v6567_v6 }
0x13d3   : > { %8001 = vmatprep.subr.mxu1 %v8578_v4  ;;  %v4283_v2 = vmul.f32 %v10323_v35, %v4281_v63 }
0x13d4   : > { %8002 = vmatpush3.msra.mxu1 %v6566_v8 }
0x13d5   : > { %8003 = vmatprep.subr.mxu1 %v8578_v4  ;;  %8101 = vmatpush3.xpose.msk.msra.mxu0 %vm1620_vm1, %v4283_v2  ;;  %v6616_v2 = vld [vmem:[%s11606_s20 + $0x38] sm:$0xff] }
0x13d6   : > { %8004 = vmatpush3.msra.mxu1 %v6565_v9  ;;  %8105 = vmatprep.subr.mxu0 %v8578_v4 }
0x13d7   : > { %8005 = vmatprep.subr.mxu1 %v8578_v4 }
0x13d8   : > { %8006 = vmatpush3.msra.mxu1 %v6564_v10 }
0x13d9   : > { %8007 = vmatprep.subr.mxu1 %v8578_v4 }
0x13da   : > { %8008 = vmatpush3.msra.mxu1 %v6563_v11 }
0x13db   : > { %8009 = vmatprep.subr.mxu1 %v8578_v4 }
0x13dc   : > { %8010 = vmatpush3.msra.mxu1 %v6562_v12 }
0x13dd   : > { %8011 = vmatprep.subr.mxu1 %v8578_v4 }
0x13de   : > { %8012 = vmatpush3.msra.mxu1 %v6561_v13 }
0x13df   : > { %8013 = vmatprep.subr.mxu1 %v8578_v4 }
0x13e0   : > { %8014 = vmatpush3.msra.mxu1 %v6560_v14 }
0x13e1   : > { %8015 = vmatprep.subr.mxu1 %v8578_v4 }
0x13e2   : > { %8016 = vmatpush3.msra.mxu1 %v6559_v15 }
0x13e3   : > { %8017 = vmatprep.subr.mxu1 %v8578_v4 }
0x13e4   : > { %8018 = vmatpush3.msra.mxu1 %v6558_v16 }
0x13e5   : > { %8019 = vmatprep.subr.mxu1 %v8578_v4 }
0x13e6   : > { %8020 = vmatpush3.msra.mxu1 %v6557_v17 }
0x13e7   : > { %8021 = vmatprep.subr.mxu1 %v8578_v4 }
0x13e8   : > { %8022 = vmatpush3.msra.mxu1 %v6556_v18 }
0x13e9   : > { %8023 = vmatprep.subr.mxu1 %v8578_v4 }
0x13ea   : > { %8024 = vmatpush3.msra.mxu1 %v6555_v19 }
0x13eb   : > { %8026 = vmatmul.mubr.f32.vlgmr.msra.gmra.mxu1 %v10316_v20  ;;  %8063 = vmatprep.subr.mxu1 %v6606_v21 }
0x13ec   : > { %8064 = vmatpush3.msra.mxu1 %v6606_v21  ;;  %8095 = vmatprep.mubr.f32.mxu1 %v10129_v46 }
0x13ed   : > { %8065 = vmatprep.subr.mxu1 %v6605_v22 }
0x13ee   : > { %8066 = vmatpush3.msra.mxu1 %v6605_v22 }
0x13ef   : > { %8067 = vmatprep.subr.mxu1 %v6604_v23 }
0x13f0   : > { %8068 = vmatpush3.msra.mxu1 %v6604_v23 }
0x13f1   : > { %8069 = vmatprep.subr.mxu1 %v6603_v24 }
0x13f2   : > { %8070 = vmatpush3.msra.mxu1 %v6603_v24 }
0x13f3   : > { %8071 = vmatprep.subr.mxu1 %v6602_v27 }
0x13f4   : > { %8072 = vmatpush3.msra.mxu1 %v6602_v27 }
0x13f5   : > { %8073 = vmatprep.subr.mxu1 %v6601_v29 }
0x13f6   : > { %8074 = vmatpush3.msra.mxu1 %v6601_v29 }
0x13f7   : > { %8075 = vmatprep.subr.mxu1 %v6600_v30 }
0x13f8   : > { %8076 = vmatpush3.msra.mxu1 %v6600_v30 }
0x13f9   : > { %8077 = vmatprep.subr.mxu1 %v6599_v37 }
0x13fa   : > { %8078 = vmatpush3.msra.mxu1 %v6599_v37 }
0x13fb   : > { %8079 = vmatprep.subr.mxu1 %v6598_v38 }
0x13fc   : > { %8080 = vmatpush3.msra.mxu1 %v6598_v38 }
0x13fd   : > { %8081 = vmatprep.subr.mxu1 %v6597_v39 }
0x13fe   : > { %8082 = vmatpush3.msra.mxu1 %v6597_v39 }
0x13ff   : > { %8083 = vmatprep.subr.mxu1 %v6596_v41 }
0x1400   : > { %8084 = vmatpush3.msra.mxu1 %v6596_v41 }
0x1401   : > { %8085 = vmatprep.subr.mxu1 %v6595_v42 }
0x1402   : > { %8086 = vmatpush3.msra.mxu1 %v6595_v42 }
0x1403   : > { %8087 = vmatprep.subr.mxu1 %v6594_v44 }
0x1404   : > { %8088 = vmatpush3.msra.mxu1 %v6594_v44  ;;  %v6652_v44 = vld [vmem:[%s11602_s16 + $0x178] sm:$0xff] }
0x1405   : > { %8089 = vmatprep.subr.mxu1 %v6593_v47 }
0x1406   : > { %8090 = vmatpush3.msra.mxu1 %v6593_v47  ;;  %v6651_v47 = vld [vmem:[%s11602_s16 + $0x170] sm:$0xff] }
0x1407   : > { %8091 = vmatprep.subr.mxu1 %v6592_v48 }
0x1408   : > { %8092 = vmatpush3.msra.mxu1 %v6592_v48  ;;  %v6650_v48 = vld [vmem:[%s11602_s16 + $0x168] sm:$0xff] }
0x1409   : > { %8093 = vmatprep.subr.mxu1 %v6591_v50 }
0x140a   : > { %8094 = vmatpush3.msra.mxu1 %v6591_v50  ;;  %v6649_v50 = vld [vmem:[%s11602_s16 + $0x160] sm:$0xff] }
0x140b   : > { %8123 = vmatprep.subr.mxu1 %v8578_v4  ;;  %8096 = vmatmul.mubr.f32.vlgmr.msra.gmra.mxu1 %v10218_v34 }
0x140c   : > { %8124 = vmatpush3.msra.mxu1 %v3962_v51  ;;  %8131 = vmatprep.mubr.msk.f32.mxu1 %vm8579_vm0, %v8578_v4  ;;  %v6648_v51 = vld [vmem:[%s11602_s16 + $0x158] sm:$0xff] }
0x140d   : > { %8125 = vmatprep.subr.mxu1 %v8578_v4 }
0x140e   : > { %8126 = vmatpush3.msra.mxu1 %v3961_v52  ;;  %v6647_v52 = vld [vmem:[%s11602_s16 + $0x150] sm:$0xff] }
0x140f   : > { %8127 = vmatprep.subr.mxu1 %v8578_v4 }
0x1410   : > { %8128 = vmatpush3.msra.mxu1 %v3960_v53  ;;  %v6646_v53 = vld [vmem:[%s11602_s16 + $0x148] sm:$0xff] }
0x1411   : > { %8129 = vmatprep.subr.mxu1 %v8578_v4 }
0x1412   : > { %8130 = vmatpush3.msra.mxu1 %v3959_v54  ;;  %v6645_v54 = vld [vmem:[%s11602_s16 + $0x140] sm:$0xff] }
0x1413   : > { %8169 = vmatprep.subr.mxu1 %v6652_v44 }
0x148b   : > { %v3955_v3 = vpop.f32.mrf.mxu1 }
0x148c   : > { %8132 = vmatmul.mubr.msk.f32.vlgmr.msra.gmra.mxu1 %vm1620_vm1, %v3955_v3  ;;  %v6615_v3 = vld [vmem:[%s11606_s20 + $0x30] sm:$0xff] }
0x148d   : > { %v7992_v5 = vpop.f32.mrf.mxu1  ;;  %8201 = vmatprep.mubr.f32.mxu1 %v10129_v46  ;;  %v6608_v46 = vld [vmem:[%s11605_s19 + $0x1] ss:$0 sm:$0xff]  ;;  %8170 = vmatpush3.msra.mxu1 %v6652_v44 }
0x148e   : > { %8171 = vmatprep.subr.mxu1 %v6651_v47  ;;  %v6613_v5 = vld [vmem:[%s11606_s20 + $0x20] sm:$0xff] }
0x148f   : > { %8172 = vmatpush3.msra.mxu1 %v6651_v47  ;;  %v10780_v44 = vld [vmem:[%s10122_s4] sm:$0xff] }
0x1490   : > { %8173 = vmatprep.subr.mxu1 %v6650_v48 }
0x1491   : > { %8174 = vmatpush3.msra.mxu1 %v6650_v48 }
0x1492   : > { %8175 = vmatprep.subr.mxu1 %v6649_v50 }
0x1493   : > { %8176 = vmatpush3.msra.mxu1 %v6649_v50 }
0x1494   : > { %8177 = vmatprep.subr.mxu1 %v6648_v51 }
0x1495   : > { %8178 = vmatpush3.msra.mxu1 %v6648_v51 }
0x1496   : > { %8179 = vmatprep.subr.mxu1 %v6647_v52 }
0x1497   : > { %8180 = vmatpush3.msra.mxu1 %v6647_v52 }
0x1498   : > { %8181 = vmatprep.subr.mxu1 %v6646_v53 }
0x1499   : > { %8182 = vmatpush3.msra.mxu1 %v6646_v53 }
0x149a   : > { %8183 = vmatprep.subr.mxu1 %v6645_v54 }
0x149b   : > { %8184 = vmatpush3.msra.mxu1 %v6645_v54 }
0x149c   : > { %8185 = vmatprep.subr.mxu1 %v6644_v55 }
0x149d   : > { %8186 = vmatpush3.msra.mxu1 %v6644_v55 }
0x149e   : > { %8187 = vmatprep.subr.mxu1 %v6643_v7 }
0x149f   : > { %8188 = vmatpush3.msra.mxu1 %v6643_v7 }
0x14a0   : > { %8189 = vmatprep.subr.mxu1 %v6642_v57 }
0x14a1   : > { %8190 = vmatpush3.msra.mxu1 %v6642_v57 }
0x14a2   : > { %8191 = vmatprep.subr.mxu1 %v6641_v49 }
0x14a3   : > { %8192 = vmatpush3.msra.mxu1 %v6641_v49 }
0x14a4   : > { %8193 = vmatprep.subr.mxu1 %v6640_v59 }
0x14a5   : > { %8194 = vmatpush3.msra.mxu1 %v6640_v59 }
0x14a6   : > { %8195 = vmatprep.subr.mxu1 %v6639_v60 }
0x14a7   : > { %8196 = vmatpush3.msra.mxu1 %v6639_v60 }
0x14a8   : > { %8197 = vmatprep.subr.mxu1 %v6638_v61 }
0x14a9   : > { %8198 = vmatpush3.msra.mxu1 %v6638_v61 }
0x14aa   : > { %8199 = vmatprep.subr.mxu1 %v6637_v62 }
0x14ab   : > { %v4054_v6 = vpop.f32.mrf.mxu1  ;;  %8200 = vmatpush3.msra.mxu1 %v6637_v62  ;;  %v6636_v62 = vld [vmem:[%s11601_s15 + $0x2] ss:$0 sm:$0xff] }
0x14ac   : > { %v4055_v8 = vadd.f32 %v6572_v31, %v4054_v6  ;;  %8202 = vmatmul.mubr.f32.vlgmr.msra.gmra.mxu1 %v10218_v34  ;;  %8239 = vmatprep.subr.mxu1 %v8578_v4  ;;  %v6614_v34 = vld [vmem:[%s11606_s20 + $0x28] sm:$0xff]  ;;  %v6654_v6 = vld [vmem:[%s11603_s17 + $0x2] ss:$0 sm:$0xff] }
0x14ad   : > { %v8027_v9 = vpop.f32.mrf.mxu1  ;;  %8243 = vmatprep.mubr.msk.f32.mxu1 %vm8579_vm0, %v8578_v4 }
0x14ae   : > { %v4258_v58 = vmul.f32 %v4055_v8, %v4055_v8 }
0x14b0   : > { %v4259_v10 = vsel %vm1620_vm1, %v4258_v58, 0.0 }
0x14b1   : > { %4260 = vadd.xlane.f32.xlu0 %v4259_v10 }
0x14cb   : > { %v8097_v14 = vpop.f32.mrf.mxu1 }
0x14cc   : > { %v4255_v19 = vadd.f32 %v8097_v14, %v6608_v46  ;;  %v6634_v14 = vld [vmem:[%s11600_s14 + $0x178] sm:$0xff] }
0x14cd   : > { %v4249_v15 = vpop.f32.mrf.mxu1 }
0x14ce   : > { %v4250_v23 = vadd.f32 %v6608_v46, %v4249_v15  ;;  %v6633_v46 = vld [vmem:[%s11600_s14 + $0x170] sm:$0xff] }
0x153a   : > { %v4261_v11 = vpop.xlane.xlu0 %4260 }
0x153b   : > { %v4262_v12 = vmul.f32 0.03125, %v4261_v11 }
0x153d   : > { %v4263_v13 = vadd.f32 1e-06, %v4262_v12 }
0x153f   : > { %8473 = vrsqrt.f32 %v4263_v13 }
0x154c   : > { %v8474_v16 = vpop.eup %8473  ;;  %v10618_v17 = vpop.f32.mrf.mxu1 }
0x154d   : > { %v4265_v18 = vmul.f32 %v8474_v16, %v4055_v8 }
0x154e   : > { %v8133_v21 = vpop.f32.mrf.mxu1 }
0x154f   : > { %v4266_v22 = vmul.f32 %v10338_v28, %v4265_v18  ;;  %v6632_v18 = vld [vmem:[%s11600_s14 + $0x168] sm:$0xff]  ;;  %v6630_v21 = vld [vmem:[%s11600_s14 + $0x158] sm:$0xff] }
0x1551   : > { %8103 = vmatmul.mubr.msk.f32.vlgmr.msra.gmra.mxu0 %vm1620_vm1, %v4266_v22  ;;  %v6629_v22 = vld [vmem:[%s11600_s14 + $0x150] sm:$0xff] }
0x1552   : > { %8106 = vmatpush3.msra.mxu0 %v4255_v19  ;;  %8109 = vmatprep.mubr.msk.f32.mxu0 %vm8579_vm0, %v8578_v4  ;;  %v6631_v19 = vld [vmem:[%s11600_s14 + $0x160] sm:$0xff] }
0x1553   : > { %8107 = vmatprep.subr.mxu0 %v8578_v4 }
0x1554   : > { %8108 = vmatpush3.msra.mxu0 %v4250_v23  ;;  %v6628_v23 = vld [vmem:[%s11600_s14 + $0x148] sm:$0xff] }
0x1555   : > { %8112 = vmatprep.subr.mxu0 %v8578_v4 }
0x156c   : > { %v8203_v31 = vpop.f32.mrf.mxu1 }
0x156d   : > { %v10702_v8 = vadd.f32 %v8203_v31, %v6654_v6 }
0x156e   : > { %v4786_v9 = vpop.f32.mrf.mxu1 }
0x156f   : > { %v10704_v58 = vadd.f32 %v6654_v6, %v4786_v9  ;;  %v4905_v10 = vmul.f32 %v10702_v8, %v10702_v8  ;;  %v6670_v9 = vld [vmem:[%s11604_s18 + $0x178] sm:$0xff] }
0x1571   : > { %v4909_v11 = vsel %vm1620_vm1, %v4905_v10, 0.0  ;;  %v4904_v12 = vmul.f32 %v10704_v58, %v10704_v58  ;;  %v6668_v10 = vld [vmem:[%s11604_s18 + $0x168] sm:$0xff] }
0x1573   : > { %v4906_v13 = vsel %vm1620_vm1, %v4904_v12, 0.0  ;;  %v6665_v12 = vld [vmem:[%s11604_s18 + $0x150] sm:$0xff] }
0x1611   : > { %v4360_v24 = vpop.f32.mrf.mxu0 }
0x1612   : > { %v4364_v27 = vmul.f32 0.17677669, %v4360_v24  ;;  %v6627_v24 = vld [vmem:[%s11600_s14 + $0x140] sm:$0xff] }
0x1613   : > { %v8104_v29 = vpop.f32.mrf.mxu0 }
0x1614   : > { %v4365_v30 = vsel %vm3874_vm3, %v4364_v27, -inf  ;;  %v6625_v29 = vld [vmem:[%s11600_s14 + $0x130] sm:$0xff] }
0x1615   : > { %4366 = vmax.xlane.f32.xlu1 %v4365_v30  ;;  %v6624_v30 = vld [vmem:[%s11600_s14 + $0x128] sm:$0xff] }
0x1619   : > { %4910 = vadd.xlane.f32.xlu1 %v4909_v11  ;;  %v6666_v11 = vld [vmem:[%s11604_s18 + $0x158] sm:$0xff] }
0x169e   : > { %v4367_v37 = vpop.xlane.xlu1 %4366 }
0x169f   : > { %v4368_v38 = vsub.f32 %v4364_v27, %v4367_v37  ;;  %v6626_v27 = vld [vmem:[%s11600_s14 + $0x138] sm:$0xff]  ;;  %v6623_v37 = vld [vmem:[%s11600_s14 + $0x120] sm:$0xff] }
0x16a1   : > { %v4369_v39 = vmul.f32 1.442695, %v4368_v38  ;;  %v6622_v38 = vld [vmem:[%s11600_s14 + $0x118] sm:$0xff] }
0x16a2   : > { %v4911_v47 = vpop.xlane.xlu1 %4910 }
0x16a3   : > { %8475 = vpow2.f32 %v4369_v39  ;;  %v6621_v39 = vld [vmem:[%s11600_s14 + $0x110] sm:$0xff]  ;;  %v4913_v50 = vmul.f32 0.03125, %v4911_v47 }
0x16a5   : > { %v4915_v52 = vadd.f32 1e-06, %v4913_v50  ;;  %v6672_v50 = vld [vmem:[%s11605_s19 + $0x2] ss:$0 sm:$0xff] }
0x16b0   : > { %v8476_v41 = vpop.eup %8475 }
0x16b1   : > { %v4371_v42 = vsel %vm3874_vm3, %v8476_v41, 0.0 }
0x16b2   : > { %4372 = vadd.xlane.f32.xlu0 %v4371_v42  ;;  %v6619_v42 = vld [vmem:[%s11600_s14 + $0x100] sm:$0xff] }
0x16b6   : > { %4907 = vadd.xlane.f32.xlu0 %v4906_v13  ;;  %v6664_v13 = vld [vmem:[%s11604_s18 + $0x148] sm:$0xff] }
0x173b   : > { %v4373_v0 = vpop.xlane.xlu0 %4372 }
0x173c   : > { %8477 = vrcp.f32 %v4373_v0 }
0x173d   : > { %8479 = vrsqrt.f32 %v4915_v52 }
0x173f   : > { %v4908_v48 = vpop.xlane.xlu0 %4907 }
0x1740   : > { %v4912_v51 = vmul.f32 0.03125, %v4908_v48 }
0x1742   : > { %v4914_v53 = vadd.f32 1e-06, %v4912_v51 }
0x1744   : > { %8481 = vrsqrt.f32 %v4914_v53 }
0x1749   : > { %v8478_v1 = vpop.eup %8477 }
0x174a   : > { %v4375_v63 = vmul.f32 %v8478_v1, %v8476_v41  ;;  %v6620_v41 = vld [vmem:[%s11600_s14 + $0x108] sm:$0xff]  ;;  %v8480_v54 = vpop.eup %8479 }
0x174b   : > { %v4919_v55 = vmul.f32 %v8480_v54, %v10702_v8  ;;  %v6715_v54 = vld [vmem:[%s11602_s16 + $0x1f8] sm:$0xff] }
0x174c   : > { %8110 = vmatmul.mubr.msk.f32.vlgmr.msra.gmra.mxu0 %vm3874_vm3, %v4375_v63 }
0x174d   : > { %8113 = vmatpush3.msra.mxu0 %v6616_v2  ;;  %8120 = vmatprep.mubr.msk.f32.mxu0 %vm8579_vm0, %v8578_v4  ;;  %v4921_v7 = vmul.f32 %v10323_v35, %v4919_v55  ;;  %v6714_v55 = vld [vmem:[%s11602_s16 + $0x1f0] sm:$0xff] }
0x174e   : > { %8114 = vmatprep.subr.mxu0 %v8578_v4 }
0x174f   : > { %8115 = vmatpush3.msra.mxu0 %v6615_v3  ;;  %8240 = vmatpush3.xpose.msk.msra.mxu1 %vm1620_vm1, %v4921_v7  ;;  %v6713_v7 = vld [vmem:[%s11602_s16 + $0x1e8] sm:$0xff] }
0x1750   : > { %8116 = vmatprep.subr.mxu0 %v8578_v4  ;;  %8241 = vmatprep.subr.mxu1 %v8578_v4 }
0x1751   : > { %8117 = vmatpush3.msra.mxu0 %v6614_v34  ;;  %v8482_v57 = vpop.eup %8481 }
0x1752   : > { %8118 = vmatprep.subr.mxu0 %v8578_v4  ;;  %v4918_v49 = vmul.f32 %v8482_v57, %v10704_v58  ;;  %v6669_v58 = vld [vmem:[%s11604_s18 + $0x170] sm:$0xff]  ;;  %v6712_v57 = vld [vmem:[%s11602_s16 + $0x1e0] sm:$0xff] }
0x1753   : > { %8119 = vmatpush3.msra.mxu0 %v6613_v5 }
0x1754   : > { %8134 = vmatprep.subr.mxu0 %v8578_v4  ;;  %v4920_v59 = vmul.f32 %v10323_v35, %v4918_v49  ;;  %v6711_v49 = vld [vmem:[%s11602_s16 + $0x1d8] sm:$0xff] }
0x1756   : > { %8242 = vmatpush3.xpose.msk.msra.mxu1 %vm1620_vm1, %v4920_v59  ;;  %v6710_v59 = vld [vmem:[%s11602_s16 + $0x1d0] sm:$0xff] }
0x1757   : > { %8246 = vmatprep.subr.mxu1 %v8578_v4 }
0x180c   : > { %v4445_v15 = vpop.f32.mrf.mxu0 }
0x180d   : > { %8121 = vmatmul.mubr.msk.f32.vlgmr.msra.gmra.mxu0 %vm1620_vm1, %v4445_v15  ;;  %v6662_v15 = vld [vmem:[%s11604_s18 + $0x138] sm:$0xff] }
0x180e   : > { %8135 = vmatpush3.msra.mxu0 %v6634_v14  ;;  %v8111_v16 = vpop.f32.mrf.mxu0  ;;  %8166 = vmatprep.mubr.msk.f32.mxu0 %vm8579_vm0, %v8578_v4  ;;  %v6663_v14 = vld [vmem:[%s11604_s18 + $0x140] sm:$0xff] }
0x180f   : > { %8136 = vmatprep.subr.mxu0 %v8578_v4  ;;  %v6660_v16 = vld [vmem:[%s11604_s18 + $0x128] sm:$0xff] }
0x1810   : > { %8137 = vmatpush3.msra.mxu0 %v6633_v46  ;;  %v6661_v46 = vld [vmem:[%s11604_s18 + $0x130] sm:$0xff] }
0x1811   : > { %8138 = vmatprep.subr.mxu0 %v8578_v4 }
0x1812   : > { %8139 = vmatpush3.msra.mxu0 %v6632_v18  ;;  %v6659_v18 = vld [vmem:[%s11604_s18 + $0x120] sm:$0xff] }
0x1813   : > { %8140 = vmatprep.subr.mxu0 %v8578_v4 }
0x1814   : > { %8141 = vmatpush3.msra.mxu0 %v6631_v19  ;;  %v6658_v19 = vld [vmem:[%s11604_s18 + $0x118] sm:$0xff] }
0x1815   : > { %8142 = vmatprep.subr.mxu0 %v8578_v4 }
0x1816   : > { %8143 = vmatpush3.msra.mxu0 %v6630_v21  ;;  %v6657_v21 = vld [vmem:[%s11604_s18 + $0x110] sm:$0xff] }
0x1817   : > { %8144 = vmatprep.subr.mxu0 %v8578_v4 }
0x1818   : > { %8145 = vmatpush3.msra.mxu0 %v6629_v22  ;;  %v6656_v22 = vld [vmem:[%s11604_s18 + $0x108] sm:$0xff] }
0x1819   : > { %8146 = vmatprep.subr.mxu0 %v8578_v4 }
0x181a   : > { %8147 = vmatpush3.msra.mxu0 %v6628_v23  ;;  %v6655_v23 = vld [vmem:[%s11604_s18 + $0x100] sm:$0xff] }
0x181b   : > { %8148 = vmatprep.subr.mxu0 %v8578_v4 }
0x181c   : > { %8149 = vmatpush3.msra.mxu0 %v6627_v24  ;;  %v10850_v24 = vld [vmem:[%s10122_s4 + $0x8] sm:$0xff]  ;;  %s862_s4 = scalar_lea.vmem [#allocation2], %s6346_s5 }
0x181d   : > { %8150 = vmatprep.subr.mxu0 %v8578_v4  ;;  %s6262_s29 = sshll.u32 %s862_s4, 4  ;;  %s6263_s29 = int_to_ptr.vmem [resolvable:$true] %s6262_s29 }
0x181e   : > { %8151 = vmatpush3.msra.mxu0 %v6626_v27  ;;  %s8516_s3 = scalar_lea.vmem %s6263_s29, 128  ;;  %p8523_p0 = scmp.lt.s32.totalorder %s6263_s29, %s8521_s11 }
0x181f   : > { %8152 = vmatprep.subr.mxu0 %v8578_v4  ;;  %p8517_p11 = scmp.ne.s32.totalorder %s6263_s29, %s8516_s3  ;;  %p8524_p1 = scmp.lt.s32.totalorder %s8522_s0, %s8516_s3 }
0x1820   : > { %8153 = vmatpush3.msra.mxu0 %v6625_v29 }
0x1821   : > { %8154 = vmatprep.subr.mxu0 %v8578_v4  ;;  %p8518_p12 = pnand %p8517_p11, %p8764_p5  ;;  %p8525_p2 = por %p8524_p1, %p8523_p0 }
0x1822   : > { %8155 = vmatpush3.msra.mxu0 %v6624_v30 }
0x1823   : > { %8156 = vmatprep.subr.mxu0 %v8578_v4  ;;  %p8519_p13 = pneg %p8518_p12 }
0x1824   : > { %8157 = vmatpush3.msra.mxu0 %v6623_v37 }
0x1825   : > { %8158 = vmatprep.subr.mxu0 %v8578_v4  ;;  %p8526_p3 = pnand %p8525_p2, %p8519_p13 }
0x1826   : > { %8159 = vmatpush3.msra.mxu0 %v6622_v38 }
0x1827   : > { %8160 = vmatprep.subr.mxu0 %v8578_v4 }
0x1828   : > { %8161 = vmatpush3.msra.mxu0 %v6621_v39 }
0x1829   : > { %8162 = vmatprep.subr.mxu0 %v8578_v4 }
0x182a   : > { %8163 = vmatpush3.msra.mxu0 %v6620_v41 }
0x182b   : > { %8164 = vmatprep.subr.mxu0 %v8578_v4 }
0x182c   : > { %8165 = vmatpush3.msra.mxu0 %v6619_v42 }
0x182d   : > { %8167 = vmatmul.mubr.f32.vlgmr.msra.gmra.mxu0 %v10316_v20  ;;  %8204 = vmatprep.subr.mxu0 %v6670_v9 }
0x182e   : > { %8236 = vmatprep.mubr.f32.mxu0 %v10780_v44  ;;  %8205 = vmatpush3.msra.mxu0 %v6670_v9  ;;  %v6680_v9 = vld [vmem:[%s11606_s20 + $0x58] sm:$0xff] }
0x182f   : > { %8206 = vmatprep.subr.mxu0 %v6669_v58 }
0x1830   : > { %8207 = vmatpush3.msra.mxu0 %v6669_v58  ;;  %v6679_v58 = vld [vmem:[%s11606_s20 + $0x50] sm:$0xff] }
0x1831   : > { %8208 = vmatprep.subr.mxu0 %v6668_v10 }
0x1832   : > { %8209 = vmatpush3.msra.mxu0 %v6668_v10  ;;  %v6678_v10 = vld [vmem:[%s11606_s20 + $0x48] sm:$0xff] }
0x18cd   : > { %v10791_v60 = vpop.f32.mrf.mxu0 }
0x18cf   : > { %v8122_v61 = vpop.f32.mrf.mxu0 }
0x18d0   : > { %v6709_v61 = vld [vmem:[%s11602_s16 + $0x1c8] sm:$0xff] }
0x18ed   : > { %v4691_v0 = vpop.f32.mrf.mxu0 }
0x18ee   : > { %v4692_v1 = vadd.f32 %v6636_v62, %v4691_v0  ;;  %v6708_v62 = vld [vmem:[%s11602_s16 + $0x1c0] sm:$0xff]  ;;  %v6707_v0 = vld [vmem:[%s11602_s16 + $0x1b8] sm:$0xff] }
0x18ef   : > { %v8168_v63 = vpop.f32.mrf.mxu0 }
0x18f0   : > { %v4895_v2 = vmul.f32 %v4692_v1, %v4692_v1  ;;  %v6705_v63 = vld [vmem:[%s11602_s16 + $0x1a8] sm:$0xff] }
0x18f2   : > { %v4896_v3 = vsel %vm1620_vm1, %v4895_v2, 0.0  ;;  %v6704_v2 = vld [vmem:[%s11602_s16 + $0x1a0] sm:$0xff] }
0x18f3   : > { %4897 = vadd.xlane.f32.xlu1 %v4896_v3  ;;  %v6703_v3 = vld [vmem:[%s11602_s16 + $0x198] sm:$0xff] }
0x197c   : > { %v4898_v34 = vpop.xlane.xlu1 %4897 }
0x197d   : > { %v4899_v35 = vmul.f32 0.03125, %v4898_v34  ;;  %v6702_v34 = vld [vmem:[%s11602_s16 + $0x190] sm:$0xff] }
0x197f   : > { %v4900_v5 = vadd.f32 1e-06, %v4899_v35  ;;  %v6701_v35 = vld [vmem:[%s11602_s16 + $0x188] sm:$0xff] }
0x1981   : > { %8483 = vrsqrt.f32 %v4900_v5  ;;  %v6700_v5 = vld [vmem:[%s11602_s16 + $0x180] sm:$0xff] }
0x198e   : > { %v8484_v31 = vpop.eup %8483 }
0x198f   : > { %v4902_v6 = vmul.f32 %v8484_v31, %v4692_v1  ;;  %v6706_v1 = vld [vmem:[%s11602_s16 + $0x1b0] sm:$0xff] }
0x1991   : > { %v4903_v8 = vmul.f32 %v10338_v28, %v4902_v6  ;;  %v6667_v28 = vld [vmem:[%s11604_s18 + $0x160] sm:$0xff] }
0x1992   : > { %8210 = vmatprep.subr.mxu0 %v6667_v28 }
0x1993   : > { %8244 = vmatmul.mubr.msk.f32.vlgmr.msra.gmra.mxu1 %vm1620_vm1, %v4903_v8  ;;  %8211 = vmatpush3.msra.mxu0 %v6667_v28  ;;  %v6677_v28 = vld [vmem:[%s11606_s20 + $0x40] sm:$0xff] }
0x1994   : > { %8250 = vmatprep.mubr.msk.f32.mxu1 %vm8579_vm0, %v8578_v4  ;;  %8212 = vmatprep.subr.mxu0 %v6666_v11 }
0x1995   : > { %8213 = vmatpush3.msra.mxu0 %v6666_v11 }
0x1996   : > { %8214 = vmatprep.subr.mxu0 %v6665_v12 }
0x1997   : > { %8215 = vmatpush3.msra.mxu0 %v6665_v12  ;;  %v6717_v12 = vld [vmem:[%s11603_s17 + $0x3] ss:$0 sm:$0xff] }
0x1998   : > { %8216 = vmatprep.subr.mxu0 %v6664_v13 }
0x1999   : > { %8217 = vmatpush3.msra.mxu0 %v6664_v13 }
0x199a   : > { %8218 = vmatprep.subr.mxu0 %v6663_v14 }
0x199b   : > { %8219 = vmatpush3.msra.mxu0 %v6663_v14 }
0x199c   : > { %8220 = vmatprep.subr.mxu0 %v6662_v15 }
0x199d   : > { %8221 = vmatpush3.msra.mxu0 %v6662_v15 }
0x199e   : > { %8222 = vmatprep.subr.mxu0 %v6661_v46 }
0x199f   : > { %8223 = vmatpush3.msra.mxu0 %v6661_v46 }
0x19a0   : > { %8224 = vmatprep.subr.mxu0 %v6660_v16 }
0x19a1   : > { %8225 = vmatpush3.msra.mxu0 %v6660_v16 }
0x19a2   : > { %8226 = vmatprep.subr.mxu0 %v6659_v18 }
0x19a3   : > { %8227 = vmatpush3.msra.mxu0 %v6659_v18 }
0x19a4   : > { %8228 = vmatprep.subr.mxu0 %v6658_v19 }
0x19a5   : > { %8229 = vmatpush3.msra.mxu0 %v6658_v19 }
0x19a6   : > { %8230 = vmatprep.subr.mxu0 %v6657_v21 }
0x19a7   : > { %8231 = vmatpush3.msra.mxu0 %v6657_v21  ;;  %v6697_v21 = vld [vmem:[%s11600_s14 + $0x1f8] sm:$0xff] }
0x19a8   : > { %8232 = vmatprep.subr.mxu0 %v6656_v22 }
0x19a9   : > { %8233 = vmatpush3.msra.mxu0 %v6656_v22 }
0x19aa   : > { %8234 = vmatprep.subr.mxu0 %v6655_v23 }
0x19ab   : > { %8235 = vmatpush3.msra.mxu0 %v6655_v23  ;;  %v6696_v23 = vld [vmem:[%s11600_s14 + $0x1f0] sm:$0xff] }
0x19ac   : > { %8237 = vmatmul.mubr.f32.vlgmr.msra.gmra.mxu0 %v10850_v24  ;;  %8299 = vmatprep.subr.mxu0 %v6715_v54 }
0x19ad   : > { %8331 = vmatprep.mubr.f32.mxu0 %v10780_v44  ;;  %8300 = vmatpush3.msra.mxu0 %v6715_v54  ;;  %v6682_v54 = vld [vmem:[%s11600_s14 + $0x180] sm:$0xff] }
0x19ae   : > { %8301 = vmatprep.subr.mxu0 %v6714_v55 }
0x19af   : > { %8302 = vmatpush3.msra.mxu0 %v6714_v55 }
0x19b0   : > { %8303 = vmatprep.subr.mxu0 %v6713_v7 }
0x19b1   : > { %8304 = vmatpush3.msra.mxu0 %v6713_v7 }
0x19b2   : > { %8305 = vmatprep.subr.mxu0 %v6712_v57 }
0x19b3   : > { %8306 = vmatpush3.msra.mxu0 %v6712_v57 }
0x19b4   : > { %8307 = vmatprep.subr.mxu0 %v6711_v49 }
0x19b5   : > { %8308 = vmatpush3.msra.mxu0 %v6711_v49 }
0x19b6   : > { %8309 = vmatprep.subr.mxu0 %v6710_v59 }
0x19b7   : > { %8310 = vmatpush3.msra.mxu0 %v6710_v59 }
0x19b8   : > { %8311 = vmatprep.subr.mxu0 %v6709_v61 }
0x19b9   : > { %8312 = vmatpush3.msra.mxu0 %v6709_v61 }
0x19ba   : > { %8313 = vmatprep.subr.mxu0 %v6708_v62 }
0x19bb   : > { %8314 = vmatpush3.msra.mxu0 %v6708_v62 }
0x19bc   : > { %8315 = vmatprep.subr.mxu0 %v6707_v0 }
0x19bd   : > { %8316 = vmatpush3.msra.mxu0 %v6707_v0 }
0x19be   : > { %8317 = vmatprep.subr.mxu0 %v6706_v1 }
0x19bf   : > { %8318 = vmatpush3.msra.mxu0 %v6706_v1  ;;  %v8513_v1 = vld [vmem:[%s11609_s23] ss:$0 sm:$0xff] }
0x19c0   : > { %8319 = vmatprep.subr.mxu0 %v6705_v63 }
0x19c1   : > { %8320 = vmatpush3.msra.mxu0 %v6705_v63 }
0x19c2   : > { %8321 = vmatprep.subr.mxu0 %v6704_v2 }
0x19c3   : > { %8322 = vmatpush3.msra.mxu0 %v6704_v2 }
0x19c4   : > { %8323 = vmatprep.subr.mxu0 %v6703_v3 }
0x19c5   : > { %8324 = vmatpush3.msra.mxu0 %v6703_v3  ;;  %v4597_v3 = vadd.f32 %v10618_v17, %v10791_v60 }
0x19c6   : > { %8325 = vmatprep.subr.mxu0 %v6702_v34 }
0x19c7   : > { %8326 = vmatpush3.msra.mxu0 %v6702_v34 }
0x19c8   : > { %8327 = vmatprep.subr.mxu0 %v6701_v35 }
0x19c9   : > { %8328 = vmatpush3.msra.mxu0 %v6701_v35 }
0x19ca   : > { %8329 = vmatprep.subr.mxu0 %v6700_v5 }
0x19cb   : > { %8330 = vmatpush3.msra.mxu0 %v6700_v5 }
0x19cc   : > { %8332 = vmatmul.mubr.f32.vlgmr.msra.gmra.mxu0 %v10850_v24  ;;  %8369 = vmatprep.subr.mxu0 %v8578_v4 }
0x19cd   : > { %8373 = vmatprep.mubr.msk.f32.mxu0 %vm8579_vm0, %v8578_v4 }
0x1a53   : > { %v4997_v27 = vpop.f32.mrf.mxu1 }
0x1a54   : > { %v5001_v29 = vmul.f32 0.17677669, %v4997_v27 }
0x1a55   : > { %v8245_v30 = vpop.f32.mrf.mxu1 }
0x1a56   : > { %v5002_v37 = vsel %vm3874_vm3, %v5001_v29, -inf  ;;  %v6694_v30 = vld [vmem:[%s11600_s14 + $0x1e0] sm:$0xff] }
0x1a57   : > { %5003 = vmax.xlane.f32.xlu0 %v5002_v37  ;;  %v6693_v37 = vld [vmem:[%s11600_s14 + $0x1d8] sm:$0xff] }
0x1a6c   : > { %v8238_v48 = vpop.f32.mrf.mxu0 }
0x1a6d   : > { %v4892_v51 = vadd.f32 %v8238_v48, %v6672_v50  ;;  %v6687_v48 = vld [vmem:[%s11600_s14 + $0x1a8] sm:$0xff] }
0x1a6e   : > { %v4886_v52 = vpop.f32.mrf.mxu0 }
0x1a6f   : > { %v4887_v53 = vadd.f32 %v6672_v50, %v4886_v52  ;;  %8247 = vmatpush3.msra.mxu1 %v4892_v51  ;;  %v6686_v50 = vld [vmem:[%s11600_s14 + $0x1a0] sm:$0xff]  ;;  %v6685_v51 = vld [vmem:[%s11600_s14 + $0x198] sm:$0xff]  ;;  %v6684_v52 = vld [vmem:[%s11600_s14 + $0x190] sm:$0xff] }
0x1a70   : > { %8248 = vmatprep.subr.mxu1 %v8578_v4 }
0x1a71   : > { %8249 = vmatpush3.msra.mxu1 %v4887_v53  ;;  %v6683_v53 = vld [vmem:[%s11600_s14 + $0x188] sm:$0xff] }
0x1a72   : > { %8253 = vmatprep.subr.mxu1 %v8578_v4 }
0x1a8c   : > { %v8333_v11 = vpop.f32.mrf.mxu0 }
0x1a8d   : > { %v10939_v13 = vadd.f32 %v8333_v11, %v6717_v12 }
0x1a8e   : > { %v5351_v14 = vpop.f32.mrf.mxu0 }
0x1a8f   : > { %v10941_v15 = vadd.f32 %v6717_v12, %v5351_v14  ;;  %v5470_v46 = vmul.f32 %v10939_v13, %v10939_v13 }
0x1a91   : > { %v5474_v16 = vsel %vm1620_vm1, %v5470_v46, 0.0  ;;  %v5469_v18 = vmul.f32 %v10941_v15, %v10941_v15  ;;  %v6732_v46 = vld [vmem:[%s11604_s18 + $0x1f0] sm:$0xff] }
0x1a92   : > { %5475 = vadd.xlane.f32.xlu0 %v5474_v16  ;;  %v6731_v16 = vld [vmem:[%s11604_s18 + $0x1e8] sm:$0xff] }
0x1a93   : > { %v5471_v19 = vsel %vm1620_vm1, %v5469_v18, 0.0  ;;  %v6730_v18 = vld [vmem:[%s11604_s18 + $0x1e0] sm:$0xff] }
0x1ae0   : > { %v5004_v38 = vpop.xlane.xlu0 %5003 }
0x1ae1   : > { %v5005_v39 = vsub.f32 %v5001_v29, %v5004_v38  ;;  %v6695_v29 = vld [vmem:[%s11600_s14 + $0x1e8] sm:$0xff]  ;;  %v6692_v38 = vld [vmem:[%s11600_s14 + $0x1d0] sm:$0xff] }
0x1ae3   : > { %v5006_v41 = vmul.f32 1.442695, %v5005_v39  ;;  %v6691_v39 = vld [vmem:[%s11600_s14 + $0x1c8] sm:$0xff] }
0x1ae5   : > { %8485 = vpow2.f32 %v5006_v41  ;;  %v6690_v41 = vld [vmem:[%s11600_s14 + $0x1c0] sm:$0xff] }
0x1af2   : > { %v10855_v42 = vpop.eup %8485 }
0x1af3   : > { %v5008_v47 = vsel %vm3874_vm3, %v10855_v42, 0.0 }
0x1af4   : > { %5009 = vadd.xlane.f32.xlu1 %v5008_v47  ;;  %v6688_v47 = vld [vmem:[%s11600_s14 + $0x1b0] sm:$0xff] }
0x1af8   : > { %5472 = vadd.xlane.f32.xlu1 %v5471_v19  ;;  %v6729_v19 = vld [vmem:[%s11604_s18 + $0x1d8] sm:$0xff] }
0x1b1b   : > { %v5476_v55 = vpop.xlane.xlu0 %5475 }
0x1b1c   : > { %v5478_v57 = vmul.f32 0.03125, %v5476_v55 }
0x1b1e   : > { %v5480_v59 = vadd.f32 1e-06, %v5478_v57 }
0x1b7d   : > { %v5010_v31 = vpop.xlane.xlu1 %5009 }
0x1b7e   : > { %8487 = vrcp.f32 %v5010_v31  ;;  %v6699_v31 = vld [vmem:[%s11601_s15 + $0x3] ss:$0 sm:$0xff] }
0x1b7f   : > { %8489 = vrsqrt.f32 %v5480_v59 }
0x1b81   : > { %v5473_v7 = vpop.xlane.xlu1 %5472 }
0x1b82   : > { %v5477_v49 = vmul.f32 0.03125, %v5473_v7 }
0x1b84   : > { %v5479_v61 = vadd.f32 1e-06, %v5477_v49 }
0x1b86   : > { %8491 = vrsqrt.f32 %v5479_v61 }
0x1b8b   : > { %v8488_v6 = vpop.eup %8487 }
0x1b8c   : > { %v5012_v8 = vmul.f32 %v8488_v6, %v10855_v42  ;;  %v6689_v42 = vld [vmem:[%s11600_s14 + $0x1b8] sm:$0xff]  ;;  %v8490_v62 = vpop.eup %8489 }
0x1b8d   : > { %v5484_v0 = vmul.f32 %v8490_v62, %v10939_v13  ;;  %v8514_v13 = vld [vmem:[%s11608_s22] ss:$0 sm:$0xff] }
0x1b8e   : > { %8251 = vmatmul.mubr.msk.f32.vlgmr.msra.gmra.mxu1 %vm3874_vm3, %v5012_v8 }
0x1b8f   : > { %8254 = vmatpush3.msra.mxu1 %v6680_v9  ;;  %8261 = vmatprep.mubr.msk.f32.mxu1 %vm8579_vm0, %v8578_v4  ;;  %v5486_v63 = vmul.f32 %v8513_v1, %v5484_v0 }
0x1b90   : > { %8255 = vmatprep.subr.mxu1 %v8578_v4 }
0x1b91   : > { %8256 = vmatpush3.msra.mxu1 %v6679_v58  ;;  %8370 = vmatpush3.xpose.msk.msra.mxu0 %vm1620_vm1, %v5486_v63  ;;  %v6743_v63 = vld [vmem:[%s11606_s20 + $0x78] sm:$0xff] }
0x1b92   : > { %8257 = vmatprep.subr.mxu1 %v8578_v4  ;;  %8371 = vmatprep.subr.mxu0 %v8578_v4 }
0x1b93   : > { %8258 = vmatpush3.msra.mxu1 %v6678_v10  ;;  %v8492_v2 = vpop.eup %8491 }
0x1b94   : > { %8259 = vmatprep.subr.mxu1 %v8578_v4 }
0x1b95   : > { %8260 = vmatpush3.msra.mxu1 %v6677_v28 }
0x1b96   : > { %8264 = vmatprep.subr.mxu1 %v8578_v4 }
0x1c4e   : > { %v5082_v22 = vpop.f32.mrf.mxu1 }
0x1c4f   : > { %8262 = vmatmul.mubr.msk.f32.vlgmr.msra.gmra.mxu1 %vm1620_vm1, %v5082_v22  ;;  %v6727_v22 = vld [vmem:[%s11604_s18 + $0x1c8] sm:$0xff] }
0x1c50   : > { %8265 = vmatpush3.msra.mxu1 %v6697_v21  ;;  %v8252_v27 = vpop.f32.mrf.mxu1  ;;  %8296 = vmatprep.mubr.msk.f32.mxu1 %vm8579_vm0, %v8578_v4  ;;  %v6728_v21 = vld [vmem:[%s11604_s18 + $0x1d0] sm:$0xff] }
0x1c51   : > { %8266 = vmatprep.subr.mxu1 %v8578_v4  ;;  %v6725_v27 = vld [vmem:[%s11604_s18 + $0x1b8] sm:$0xff] }
0x1c52   : > { %8267 = vmatpush3.msra.mxu1 %v6696_v23  ;;  %v6726_v23 = vld [vmem:[%s11604_s18 + $0x1c0] sm:$0xff] }
0x1c53   : > { %8268 = vmatprep.subr.mxu1 %v8578_v4 }
0x1c54   : > { %8269 = vmatpush3.msra.mxu1 %v6695_v29  ;;  %v6724_v29 = vld [vmem:[%s11604_s18 + $0x1b0] sm:$0xff] }
0x1c55   : > { %8270 = vmatprep.subr.mxu1 %v8578_v4 }
0x1c56   : > { %8271 = vmatpush3.msra.mxu1 %v6694_v30  ;;  %v6723_v30 = vld [vmem:[%s11604_s18 + $0x1a8] sm:$0xff] }
0x1c57   : > { %8272 = vmatprep.subr.mxu1 %v8578_v4 }
0x1c58   : > { %8273 = vmatpush3.msra.mxu1 %v6693_v37  ;;  %v6722_v37 = vld [vmem:[%s11604_s18 + $0x1a0] sm:$0xff] }
0x1c59   : > { %8274 = vmatprep.subr.mxu1 %v8578_v4 }
0x1c5a   : > { %8275 = vmatpush3.msra.mxu1 %v6692_v38  ;;  %v6721_v38 = vld [vmem:[%s11604_s18 + $0x198] sm:$0xff] }
0x1c5b   : > { %8276 = vmatprep.subr.mxu1 %v8578_v4 }
0x1c5c   : > { %8277 = vmatpush3.msra.mxu1 %v6691_v39  ;;  %v6720_v39 = vld [vmem:[%s11604_s18 + $0x190] sm:$0xff] }
0x1c5d   : > { %8278 = vmatprep.subr.mxu1 %v8578_v4 }
0x1c5e   : > { %8279 = vmatpush3.msra.mxu1 %v6690_v41  ;;  %v6719_v41 = vld [vmem:[%s11604_s18 + $0x188] sm:$0xff] }
0x1c5f   : > { %8280 = vmatprep.subr.mxu1 %v8578_v4 }
0x1c60   : > { %8281 = vmatpush3.msra.mxu1 %v6689_v42  ;;  %v6718_v42 = vld [vmem:[%s11604_s18 + $0x180] sm:$0xff] }
0x1c61   : > { %8282 = vmatprep.subr.mxu1 %v8578_v4 }
0x1c62   : > { %8283 = vmatpush3.msra.mxu1 %v6688_v47 }
0x1c63   : > { %8284 = vmatprep.subr.mxu1 %v8578_v4 }
0x1c64   : > { %8285 = vmatpush3.msra.mxu1 %v6687_v48 }
0x1c65   : > { %8286 = vmatprep.subr.mxu1 %v8578_v4 }
0x1c66   : > { %8287 = vmatpush3.msra.mxu1 %v6686_v50 }
0x1c67   : > { %8288 = vmatprep.subr.mxu1 %v8578_v4 }
0x1c68   : > { %8289 = vmatpush3.msra.mxu1 %v6685_v51 }
0x1c69   : > { %8290 = vmatprep.subr.mxu1 %v8578_v4 }
0x1c6a   : > { %8291 = vmatpush3.msra.mxu1 %v6684_v52 }
0x1c6b   : > { %8292 = vmatprep.subr.mxu1 %v8578_v4 }
0x1c6c   : > { %8293 = vmatpush3.msra.mxu1 %v6683_v53 }
0x1c6d   : > { %8294 = vmatprep.subr.mxu1 %v8578_v4 }
0x1c6e   : > { %8295 = vmatpush3.msra.mxu1 %v6682_v54 }
0x1c6f   : > { %8297 = vmatmul.mubr.f32.vlgmr.msra.gmra.mxu1 %v10316_v20  ;;  %v5483_v20 = vmul.f32 %v8492_v2, %v10941_v15  ;;  %v6733_v15 = vld [vmem:[%s11604_s18 + $0x1f8] sm:$0xff]  ;;  %v6742_v2 = vld [vmem:[%s11606_s20 + $0x70] sm:$0xff] }
0x1c70   : > { %8366 = vmatprep.mubr.f32.mxu1 %v10780_v44  ;;  %8334 = vmatprep.subr.mxu1 %v6733_v15 }
0x1c71   : > { %v5485_v44 = vmul.f32 %v8513_v1, %v5483_v20  ;;  %8335 = vmatpush3.msra.mxu1 %v6733_v15  ;;  %v6741_v20 = vld [vmem:[%s11606_s20 + $0x68] sm:$0xff]  ;;  %v5822_v15 = vld [vmem:[%s11610_s24 + $0x1c0] sm:$0xff] }
0x1c72   : > { %8336 = vmatprep.subr.mxu1 %v6732_v46 }
0x1c73   : > { %8372 = vmatpush3.xpose.msk.msra.mxu0 %vm1620_vm1, %v5485_v44  ;;  %8337 = vmatpush3.msra.mxu1 %v6732_v46  ;;  %v6740_v44 = vld [vmem:[%s11606_s20 + $0x60] sm:$0xff]  ;;  %v5824_v46 = vld [vmem:[%s11610_s24 + $0x1d0] sm:$0xff] }
0x1c74   : > { %8376 = vmatprep.subr.mxu0 %v8578_v4  ;;  %8338 = vmatprep.subr.mxu1 %v6731_v16 }
0x1c75   : > { %8339 = vmatpush3.msra.mxu1 %v6731_v16  ;;  %v5819_v16 = vld [vmem:[%s11610_s24 + $0x1a8] sm:$0xff] }
0x1c76   : > { %8340 = vmatprep.subr.mxu1 %v6730_v18 }
0x1c77   : > { %8341 = vmatpush3.msra.mxu1 %v6730_v18  ;;  %v5821_v18 = vld [vmem:[%s11610_s24 + $0x1b8] sm:$0xff] }
0x1c78   : > { %8342 = vmatprep.subr.mxu1 %v6729_v19 }
0x1c79   : > { %8343 = vmatpush3.msra.mxu1 %v6729_v19  ;;  %v5818_v19 = vld [vmem:[%s11610_s24 + $0x1a0] sm:$0xff] }
0x1c7a   : > { %8344 = vmatprep.subr.mxu1 %v6728_v21 }
0x1c7b   : > { %8345 = vmatpush3.msra.mxu1 %v6728_v21  ;;  %v5820_v21 = vld [vmem:[%s11610_s24 + $0x1b0] sm:$0xff] }
0x1c7c   : > { %8346 = vmatprep.subr.mxu1 %v6727_v22 }
0x1c7d   : > { %8347 = vmatpush3.msra.mxu1 %v6727_v22  ;;  %v5815_v22 = vld [vmem:[%s11610_s24 + $0x188] sm:$0xff] }
0x1c7e   : > { %8348 = vmatprep.subr.mxu1 %v6726_v23 }
0x1c7f   : > { %8349 = vmatpush3.msra.mxu1 %v6726_v23  ;;  %v5817_v23 = vld [vmem:[%s11610_s24 + $0x198] sm:$0xff] }
0x1c80   : > { %8350 = vmatprep.subr.mxu1 %v6725_v27 }
0x1c81   : > { %8351 = vmatpush3.msra.mxu1 %v6725_v27  ;;  %v5814_v27 = vld [vmem:[%s11610_s24 + $0x180] sm:$0xff] }
0x1c82   : > { %8352 = vmatprep.subr.mxu1 %v6724_v29 }
0x1c83   : > { %8353 = vmatpush3.msra.mxu1 %v6724_v29  ;;  %v5816_v29 = vld [vmem:[%s11610_s24 + $0x190] sm:$0xff] }
0x1c84   : > { %8354 = vmatprep.subr.mxu1 %v6723_v30 }
0x1c85   : > { %8355 = vmatpush3.msra.mxu1 %v6723_v30 }
0x1c86   : > { %8356 = vmatprep.subr.mxu1 %v6722_v37 }
0x1c87   : > { %8357 = vmatpush3.msra.mxu1 %v6722_v37 }
0x1c88   : > { %8358 = vmatprep.subr.mxu1 %v6721_v38 }
0x1c89   : > { %8359 = vmatpush3.msra.mxu1 %v6721_v38 }
0x1c8a   : > { %8360 = vmatprep.subr.mxu1 %v6720_v39 }
0x1c8b   : > { %8361 = vmatpush3.msra.mxu1 %v6720_v39 }
0x1c8c   : > { %8362 = vmatprep.subr.mxu1 %v6719_v41 }
0x1c8d   : > { %8363 = vmatpush3.msra.mxu1 %v6719_v41  ;;  %v5811_v41 = vld [vmem:[%s11610_s24 + $0x168] sm:$0xff] }
0x1c8e   : > { %8364 = vmatprep.subr.mxu1 %v6718_v42 }
0x1c8f   : > { %8365 = vmatpush3.msra.mxu1 %v6718_v42  ;;  %v5813_v42 = vld [vmem:[%s11610_s24 + $0x178] sm:$0xff] }
0x1c90   : > { %8367 = vmatmul.mubr.f32.vlgmr.msra.gmra.mxu1 %v10850_v24  ;;  %v6735_v24 = vld [vmem:[%s11605_s19 + $0x3] ss:$0 sm:$0xff] }
0x1c91   : > { %5987 = vmatprep.mubr.f32.mxu1 %v8578_v4 }
0x1d0f   : > { %v5160_v34 = vpop.f32.mrf.mxu1 }
0x1d10   : > { %v11028_v35 = vadd.f32 %v5160_v34, %v4597_v3 }
0x1d11   : > { %v8263_v5 = vpop.f32.mrf.mxu1 }
0x1d12   : > { %v1014_v5 = vsub.s32 3, %v9304_v36 }
0x1d2f   : > { %v5256_v6 = vpop.f32.mrf.mxu1 }
0x1d30   : > { %v5257_v8 = vadd.f32 %v6699_v31, %v5256_v6  ;;  %v11121_v31 = vld [vmem:[%s11676_s27] sm:$0xff] }
0x1d31   : > { %v8298_v9 = vpop.f32.mrf.mxu1  ;;  %v1015_v6 = vrot.slane %v11121_v31, %v1014_v5 }
0x1d32   : > { %v5460_v58 = vmul.f32 %v5257_v8, %v5257_v8 }
0x1d34   : > { %v5461_v10 = vsel %vm1620_vm1, %v5460_v58, 0.0  ;;  %v6745_v58 = vld [vmem:[%s11607_s21] ss:$0 sm:$0xff] }
0x1d35   : > { %5462 = vadd.xlane.f32.xlu0 %v5461_v10 }
0x1d50   : > { %v8368_v57 = vpop.f32.mrf.mxu1 }
0x1d51   : > { %v5457_v49 = vadd.f32 %v8368_v57, %v6735_v24  ;;  %v5804_v57 = vld [vmem:[%s11610_s24 + $0x130] sm:$0xff] }
0x1d52   : > { %v5451_v59 = vpop.f32.mrf.mxu1 }
0x1d53   : > { %v5452_v61 = vadd.f32 %v6735_v24, %v5451_v59  ;;  %v5799_v24 = vld [vmem:[%s11610_s24 + $0x108] sm:$0xff]  ;;  %v5798_v59 = vld [vmem:[%s11610_s24 + $0x100] sm:$0xff] }
0x1dbe   : > { %v5463_v28 = vpop.xlane.xlu0 %5462 }
0x1dbf   : > { %v5464_v11 = vmul.f32 0.03125, %v5463_v28 }
0x1dc1   : > { %v5465_v12 = vadd.f32 1e-06, %v5464_v11 }
0x1dc3   : > { %8493 = vrsqrt.f32 %v5465_v12 }
0x1dd0   : > { %v8494_v17 = vpop.eup %8493 }
0x1dd1   : > { %v5467_v60 = vmul.f32 %v8494_v17, %v5257_v8  ;;  %v1175_v8 = vadd.f32 %v9300_v32, %v1015_v6  ;;  %v5827_v32 = vld [vmem:[%s11610_s24 + $0x1e8] sm:$0xff]  ;;  %v5789_v6 = vld [vmem:[%s11610_s24 + $0xb8] sm:$0xff] }
0x1dd3   : > { %v5468_v14 = vmul.f32 %v8514_v13, %v5467_v60  ;;  %v5741_v28 = vrot.slane %v1175_v8, %v9313_v45  ;;  %v5829_v60 = vld [vmem:[%s11610_s24 + $0x1f8] sm:$0xff]  ;;  %v5823_v13 = vld [vmem:[%s11610_s24 + $0x1c8] sm:$0xff]  ;;  %v5786_v8 = vld [vmem:[%s11610_s24 + $0xa0] sm:$0xff] }
0x1dd4   : > { %5923 = vmatprep.subr.mxu1 %v5829_v60  ;;  %v5780_v60 = vld [vmem:[%s11610_s24 + $0x70] sm:$0xff] }
0x1dd5   : > { %8374 = vmatmul.mubr.msk.f32.vlgmr.msra.gmra.mxu0 %vm1620_vm1, %v5468_v14  ;;  %v5825_v14 = vld [vmem:[%s11610_s24 + $0x1d8] sm:$0xff] }
0x1dd6   : > { %8380 = vmatprep.mubr.msk.f32.mxu0 %vm8579_vm0, %v8578_v4  ;;  %8377 = vmatpush3.msra.mxu0 %v5457_v49  ;;  %v5801_v49 = vld [vmem:[%s11610_s24 + $0x118] sm:$0xff] }
0x1dd7   : > { %8378 = vmatprep.subr.mxu0 %v8578_v4 }
0x1dd8   : > { %8379 = vmatpush3.msra.mxu0 %v5452_v61  ;;  %v5800_v61 = vld [vmem:[%s11610_s24 + $0x110] sm:$0xff] }
0x1dd9   : > { %8383 = vmatprep.subr.mxu0 %v8578_v4 }
0x1e95   : > { %v5562_v47 = vpop.f32.mrf.mxu0 }
0x1e96   : > { %v5566_v48 = vmul.f32 0.17677669, %v5562_v47  ;;  %v5810_v47 = vld [vmem:[%s11610_s24 + $0x160] sm:$0xff] }
0x1e97   : > { %v8375_v50 = vpop.f32.mrf.mxu0 }
0x1e98   : > { %v5567_v51 = vsel %vm3874_vm3, %v5566_v48, -inf  ;;  %v5807_v50 = vld [vmem:[%s11610_s24 + $0x148] sm:$0xff] }
0x1e99   : > { %5568 = vmax.xlane.f32.xlu1 %v5567_v51  ;;  %v5809_v51 = vld [vmem:[%s11610_s24 + $0x158] sm:$0xff] }
0x1f22   : > { %v5569_v52 = vpop.xlane.xlu1 %5568 }
0x1f23   : > { %v5570_v53 = vsub.f32 %v5566_v48, %v5569_v52  ;;  %v5812_v48 = vld [vmem:[%s11610_s24 + $0x170] sm:$0xff]  ;;  %v5806_v52 = vld [vmem:[%s11610_s24 + $0x140] sm:$0xff] }
0x1f25   : > { %v5571_v54 = vmul.f32 1.442695, %v5570_v53  ;;  %v5808_v53 = vld [vmem:[%s11610_s24 + $0x150] sm:$0xff] }
0x1f27   : > { %8495 = vpow2.f32 %v5571_v54  ;;  %v5803_v54 = vld [vmem:[%s11610_s24 + $0x128] sm:$0xff] }
0x1f34   : > { %v8496_v55 = vpop.eup %8495 }
0x1f35   : > { %v5573_v7 = vsel %vm3874_vm3, %v8496_v55, 0.0 }
0x1f36   : > { %5574 = vadd.xlane.f32.xlu0 %v5573_v7  ;;  %v5802_v7 = vld [vmem:[%s11610_s24 + $0x120] sm:$0xff] }
0x1fbf   : > { %v5575_v62 = vpop.xlane.xlu0 %5574 }
0x1fc0   : > { %8497 = vrcp.f32 %v5575_v62  ;;  %v5795_v62 = vld [vmem:[%s11610_s24 + $0xe8] sm:$0xff] }
0x1fcd   : > { %v8498_v0 = vpop.eup %8497 }
0x1fce   : > { %v5577_v1 = vmul.f32 %v8498_v0, %v8496_v55  ;;  %v5805_v55 = vld [vmem:[%s11610_s24 + $0x138] sm:$0xff] }
0x1fcf   : > { %v5797_v0 = vld [vmem:[%s11610_s24 + $0xf8] sm:$0xff] }
0x1fd0   : > { %8381 = vmatmul.mubr.msk.f32.vlgmr.msra.gmra.mxu0 %vm3874_vm3, %v5577_v1  ;;  %v5794_v1 = vld [vmem:[%s11610_s24 + $0xe0] sm:$0xff] }
0x1fd1   : > { %8384 = vmatpush3.msra.mxu0 %v6743_v63  ;;  %8391 = vmatprep.mubr.msk.f32.mxu0 %vm8579_vm0, %v8578_v4  ;;  %v5796_v63 = vld [vmem:[%s11610_s24 + $0xf0] sm:$0xff] }
0x1fd2   : > { %8385 = vmatprep.subr.mxu0 %v8578_v4 }
0x1fd3   : > { %8386 = vmatpush3.msra.mxu0 %v6742_v2  ;;  %v5791_v2 = vld [vmem:[%s11610_s24 + $0xc8] sm:$0xff] }
0x1fd4   : > { %8387 = vmatprep.subr.mxu0 %v8578_v4 }
0x1fd5   : > { %8388 = vmatpush3.msra.mxu0 %v6741_v20  ;;  %v5793_v20 = vld [vmem:[%s11610_s24 + $0xd8] sm:$0xff] }
0x1fd6   : > { %8389 = vmatprep.subr.mxu0 %v8578_v4 }
0x1fd7   : > { %8390 = vmatpush3.msra.mxu0 %v6740_v44  ;;  %v5790_v44 = vld [vmem:[%s11610_s24 + $0xc0] sm:$0xff] }
0x1fd8   : > { %5852 = vmatprep.subr.mxu0 %v5827_v32  ;;  %v5778_v32 = vld [vmem:[%s11610_s24 + $0x60] sm:$0xff] }
0x2090   : > { %v5647_v3 = vpop.f32.mrf.mxu0 }
0x2091   : > { %8392 = vmatmul.mubr.msk.f32.vlgmr.msra.gmra.mxu0 %vm1620_vm1, %v5647_v3  ;;  %v5792_v3 = vld [vmem:[%s11610_s24 + $0xd0] sm:$0xff] }
0x2092   : > { %v8382_v34 = vpop.f32.mrf.mxu0  ;;  %5916 = vmatprep.mubr.f32.mxu0 %v8578_v4 }
0x2093   : > { %v5787_v34 = vld [vmem:[%s11610_s24 + $0xa8] sm:$0xff] }
0x2151   : > { %v5725_v9 = vpop.f32.mrf.mxu0 }
0x2152   : > { %v5729_v4 = vadd.f32 %v5725_v9, %v11028_v35  ;;  %v5826_v35 = vld [vmem:[%s11610_s24 + $0x1e0] sm:$0xff]  ;;  %v5788_v9 = vld [vmem:[%s11610_s24 + $0xb0] sm:$0xff] }
0x2153   : > { %v8393_v10 = vpop.f32.mrf.mxu0  ;;  %5853 = vmatpush1.msra.mxu0 %v5826_v35  ;;  %v5775_v35 = vld [vmem:[%s11610_s24 + $0x48] sm:$0xff] }
0x2154   : > { %v5737_v11 = vadd.f32 %v6745_v58, %v5729_v4  ;;  %5854 = vmatprep.subr.mxu0 %v5823_v13  ;;  %v5783_v58 = vld [vmem:[%s11610_s24 + $0x88] sm:$0xff]  ;;  %v5785_v4 = vld [vmem:[%s11610_s24 + $0x98] sm:$0xff]  ;;  %v5782_v10 = vld [vmem:[%s11610_s24 + $0x80] sm:$0xff] }
0x2155   : > { %5855 = vmatpush1.msra.mxu0 %v5822_v15  ;;  %v5774_v13 = vld [vmem:[%s11610_s24 + $0x40] sm:$0xff]  ;;  %v5771_v15 = vld [vmem:[%s11610_s24 + $0x28] sm:$0xff] }
0x2156   : > { %v5742_v12 = vmul.f32 %v5741_v28, %v5737_v11  ;;  %5856 = vmatprep.subr.mxu0 %v5819_v16  ;;  %v5784_v28 = vld [vmem:[%s11610_s24 + $0x90] sm:$0xff]  ;;  %v5779_v11 = vld [vmem:[%s11610_s24 + $0x68] sm:$0xff]  ;;  %v5770_v16 = vld [vmem:[%s11610_s24 + $0x20] sm:$0xff] }
0x2157   : > { %5857 = vmatpush1.msra.mxu0 %v5818_v19  ;;  %v5767_v19 = vld [vmem:[%s11610_s24 + $0x8] sm:$0xff] }
0x2158   : > { %v11133_v17 = vadd.f32 %v5742_v12, %v10260_v56  ;;  %v5828_v56 = vld [vmem:[%s11610_s24 + $0x1f0] sm:$0xff]  ;;  %5858 = vmatprep.subr.mxu0 %v5815_v22  ;;  %v5781_v12 = vld [vmem:[%s11610_s24 + $0x78] sm:$0xff]  ;;  %v5766_v22 = vld [vmem:[%s11610_s24] sm:$0xff] }
0x2159   : > { %5924 = vmatpush1.msra.mxu1 %v5828_v56  ;;  %5859 = vmatpush1.msra.mxu0 %v5814_v27  ;;  %v5777_v56 = vld [vmem:[%s11610_s24 + $0x58] sm:$0xff] }
0x215a   : > { %5744 = vadd.xlane.f32.xlu1 %v11133_v17  ;;  %5925 = vmatprep.subr.mxu1 %v5825_v14  ;;  %v5776_v14 = vld [vmem:[%s11610_s24 + $0x50] sm:$0xff] }
0x215b   : > { %5926 = vmatpush1.msra.mxu1 %v5824_v46  ;;  %5860 = vmatprep.subr.mxu0 %v5811_v41  ;;  %v5773_v46 = vld [vmem:[%s11610_s24 + $0x38] sm:$0xff]  ;;  %v1018_v41 = vsub.s32 4, %v9304_v36 }
0x215c   : > { %5927 = vmatprep.subr.mxu1 %v5821_v18  ;;  %5861 = vmatpush1.msra.mxu0 %v5810_v47  ;;  %v5772_v18 = vld [vmem:[%s11610_s24 + $0x30] sm:$0xff] }
0x215d   : > { %5928 = vmatpush1.msra.mxu1 %v5820_v21  ;;  %5862 = vmatprep.subr.mxu0 %v5807_v50  ;;  %v5769_v21 = vld [vmem:[%s11610_s24 + $0x18] sm:$0xff]  ;;  %v1019_v47 = vrot.slane %v11121_v31, %v1018_v41  ;;  %v6082_v41 = vld [vmem:[%s11612_s26 + $0x1a0] sm:$0xff] }
0x215e   : > { %5929 = vmatprep.subr.mxu1 %v5817_v23  ;;  %5863 = vmatpush1.msra.mxu0 %v5806_v52  ;;  %v5768_v23 = vld [vmem:[%s11610_s24 + $0x10] sm:$0xff] }
0x215f   : > { %5930 = vmatpush1.msra.mxu1 %v5816_v29  ;;  %5864 = vmatprep.subr.mxu0 %v5803_v54  ;;  %v1244_v50 = vadd.f32 %v9461_v25, %v1019_v47  ;;  %v6045_v25 = vld [vmem:[%s11612_s26 + $0x78] sm:$0xff]  ;;  %v6066_v47 = vld [vmem:[%s11612_s26 + $0x120] sm:$0xff] }
0x2160   : > { %5931 = vmatprep.subr.mxu1 %v5813_v42  ;;  %5865 = vmatpush1.msra.mxu0 %v5802_v7 }
0x2161   : > { %5932 = vmatpush1.msra.mxu1 %v5812_v48  ;;  %5866 = vmatprep.subr.mxu0 %v5799_v24  ;;  %v5764_v54 = vrot.slane %v1244_v50, %v9313_v45  ;;  %v6060_v24 = vld [vmem:[%s11612_s26 + $0xf0] sm:$0xff]  ;;  %v6081_v50 = vld [vmem:[%s11612_s26 + $0x198] sm:$0xff] }
0x2162   : > { %5933 = vmatprep.subr.mxu1 %v5809_v51  ;;  %5867 = vmatpush1.msra.mxu0 %v5798_v59  ;;  %v6044_v59 = vld [vmem:[%s11612_s26 + $0x70] sm:$0xff] }
0x2163   : > { %5934 = vmatpush1.msra.mxu1 %v5808_v53  ;;  %5868 = vmatprep.subr.mxu0 %v5795_v62  ;;  %v6059_v62 = vld [vmem:[%s11612_s26 + $0xe8] sm:$0xff] }
0x2164   : > { %5935 = vmatprep.subr.mxu1 %v5805_v55  ;;  %5869 = vmatpush1.msra.mxu0 %v5794_v1  ;;  %v6043_v1 = vld [vmem:[%s11612_s26 + $0x68] sm:$0xff] }
0x2165   : > { %5936 = vmatpush1.msra.mxu1 %v5804_v57  ;;  %5870 = vmatprep.subr.mxu0 %v5791_v2  ;;  %v6093_v57 = vld [vmem:[%s11612_s26 + $0x1f8] sm:$0xff]  ;;  %v6058_v2 = vld [vmem:[%s11612_s26 + $0xe0] sm:$0xff] }
0x2166   : > { %5937 = vmatprep.subr.mxu1 %v5801_v49  ;;  %5871 = vmatpush1.msra.mxu0 %v5790_v44  ;;  %v6092_v49 = vld [vmem:[%s11612_s26 + $0x1f0] sm:$0xff]  ;;  %v6042_v44 = vld [vmem:[%s11612_s26 + $0x60] sm:$0xff] }
0x2167   : > { %5938 = vmatpush1.msra.mxu1 %v5800_v61  ;;  %5872 = vmatprep.subr.mxu0 %v5787_v34  ;;  %v6076_v61 = vld [vmem:[%s11612_s26 + $0x170] sm:$0xff]  ;;  %v6057_v34 = vld [vmem:[%s11612_s26 + $0xd8] sm:$0xff] }
0x2168   : > { %5939 = vmatprep.subr.mxu1 %v5797_v0  ;;  %5873 = vmatpush1.msra.mxu0 %v5786_v8  ;;  %v6091_v0 = vld [vmem:[%s11612_s26 + $0x1e8] sm:$0xff]  ;;  %v6041_v8 = vld [vmem:[%s11612_s26 + $0x58] sm:$0xff] }
0x2169   : > { %5940 = vmatpush1.msra.mxu1 %v5796_v63  ;;  %5874 = vmatprep.subr.mxu0 %v5783_v58  ;;  %v6075_v63 = vld [vmem:[%s11612_s26 + $0x168] sm:$0xff]  ;;  %v6056_v58 = vld [vmem:[%s11612_s26 + $0xd0] sm:$0xff] }
0x216a   : > { %5941 = vmatprep.subr.mxu1 %v5793_v20  ;;  %5875 = vmatpush1.msra.mxu0 %v5782_v10  ;;  %v6090_v20 = vld [vmem:[%s11612_s26 + $0x1e0] sm:$0xff]  ;;  %v6040_v10 = vld [vmem:[%s11612_s26 + $0x50] sm:$0xff] }
0x216b   : > { %5942 = vmatpush1.msra.mxu1 %v5792_v3  ;;  %5876 = vmatprep.subr.mxu0 %v5779_v11  ;;  %v6074_v3 = vld [vmem:[%s11612_s26 + $0x160] sm:$0xff]  ;;  %v6055_v11 = vld [vmem:[%s11612_s26 + $0xc8] sm:$0xff] }
0x216c   : > { %5943 = vmatprep.subr.mxu1 %v5789_v6  ;;  %5877 = vmatpush1.msra.mxu0 %v5778_v32  ;;  %v6089_v6 = vld [vmem:[%s11612_s26 + $0x1d8] sm:$0xff]  ;;  %v6039_v32 = vld [vmem:[%s11612_s26 + $0x48] sm:$0xff] }
0x216d   : > { %5944 = vmatpush1.msra.mxu1 %v5788_v9  ;;  %5878 = vmatprep.subr.mxu0 %v5775_v35  ;;  %v6073_v9 = vld [vmem:[%s11612_s26 + $0x158] sm:$0xff]  ;;  %v6054_v35 = vld [vmem:[%s11612_s26 + $0xc0] sm:$0xff] }
0x216e   : > { %5945 = vmatprep.subr.mxu1 %v5785_v4  ;;  %5879 = vmatpush1.msra.mxu0 %v5774_v13  ;;  %v6088_v4 = vld [vmem:[%s11612_s26 + $0x1d0] sm:$0xff]  ;;  %v6038_v13 = vld [vmem:[%s11612_s26 + $0x40] sm:$0xff] }
0x216f   : > { %5946 = vmatpush1.msra.mxu1 %v5784_v28  ;;  %5880 = vmatprep.subr.mxu0 %v5771_v15  ;;  %v6072_v28 = vld [vmem:[%s11612_s26 + $0x150] sm:$0xff]  ;;  %v6053_v15 = vld [vmem:[%s11612_s26 + $0xb8] sm:$0xff] }
0x2170   : > { %5947 = vmatprep.subr.mxu1 %v5781_v12  ;;  %5881 = vmatpush1.msra.mxu0 %v5770_v16  ;;  %v6087_v12 = vld [vmem:[%s11612_s26 + $0x1c8] sm:$0xff]  ;;  %v6037_v16 = vld [vmem:[%s11612_s26 + $0x38] sm:$0xff] }
0x2171   : > { %5948 = vmatpush1.msra.mxu1 %v5780_v60  ;;  %5882 = vmatprep.subr.mxu0 %v5767_v19  ;;  %v6071_v60 = vld [vmem:[%s11612_s26 + $0x148] sm:$0xff]  ;;  %v6052_v19 = vld [vmem:[%s11612_s26 + $0xb0] sm:$0xff] }
0x2172   : > { %5949 = vmatprep.subr.mxu1 %v5777_v56  ;;  %5883 = vmatpush1.msra.mxu0 %v5766_v22  ;;  %v6086_v56 = vld [vmem:[%s11612_s26 + $0x1c0] sm:$0xff]  ;;  %v6036_v22 = vld [vmem:[%s11612_s26 + $0x30] sm:$0xff] }
0x2173   : > { %5950 = vmatpush1.msra.mxu1 %v5776_v14  ;;  %v6070_v14 = vld [vmem:[%s11612_s26 + $0x140] sm:$0xff] }
0x2174   : > { %5951 = vmatprep.subr.mxu1 %v5773_v46  ;;  %v6085_v46 = vld [vmem:[%s11612_s26 + $0x1b8] sm:$0xff] }
0x2175   : > { %5952 = vmatpush1.msra.mxu1 %v5772_v18  ;;  %v6069_v18 = vld [vmem:[%s11612_s26 + $0x138] sm:$0xff] }
0x2176   : > { %5953 = vmatprep.subr.mxu1 %v5769_v21  ;;  %v6084_v21 = vld [vmem:[%s11612_s26 + $0x1b0] sm:$0xff] }
0x2177   : > { %5954 = vmatpush1.msra.mxu1 %v5768_v23  ;;  %v6068_v23 = vld [vmem:[%s11612_s26 + $0x130] sm:$0xff] }
0x2178   : > { %7300 = vmatprep.subr.mxu1 %v6093_v57  ;;  %v6079_v57 = vld [vmem:[%s11612_s26 + $0x188] sm:$0xff] }
0x21e3   : > { %v5745_v30 = vpop.xlane.xlu1 %5744 }
0x21e4   : > { %v5746_v37 = vmul.f32 0.0078125, %v5745_v30  ;;  %v1022_v30 = vsub.s32 5, %v9304_v36 }
0x21e6   : > { %v11185_v38 = vsub.f32 %v11133_v17, %v5746_v37 }
0x21e8   : > { %v5748_v39 = vmul.f32 %v11185_v38, %v11185_v38 }
0x21ea   : > { %5749 = vadd.xlane.f32.xlu0 %v5748_v39  ;;  %v1023_v39 = vrot.slane %v11121_v31, %v1022_v30  ;;  %v6035_v30 = vld [vmem:[%s11612_s26 + $0x28] sm:$0xff] }
0x21ec   : > { %v1246_v42 = vadd.f32 %v9463_v26, %v1023_v39  ;;  %v6061_v26 = vld [vmem:[%s11612_s26 + $0xf8] sm:$0xff]  ;;  %v6050_v39 = vld [vmem:[%s11612_s26 + $0xa0] sm:$0xff] }
0x21ed   : > { %7265 = vmatprep.subr.mxu0 %v6061_v26  ;;  %v6047_v26 = vld [vmem:[%s11612_s26 + $0x88] sm:$0xff] }
0x21ee   : > { %v5755_v48 = vadd.f32 1.0, %v1246_v42  ;;  %v6034_v42 = vld [vmem:[%s11612_s26 + $0x20] sm:$0xff] }
0x21f0   : > { %v5759_v52 = vrot.slane %v5755_v48, %v9313_v45  ;;  %v6049_v48 = vld [vmem:[%s11612_s26 + $0x98] sm:$0xff] }
0x2273   : > { %v5750_v27 = vpop.xlane.xlu0 %5749 }
0x2274   : > { %v5751_v29 = vmul.f32 0.0078125, %v5750_v27  ;;  %v6051_v27 = vld [vmem:[%s11612_s26 + $0xa8] sm:$0xff] }
0x2276   : > { %v5752_v37 = vadd.f32 1e-06, %v5751_v29  ;;  %v6083_v29 = vld [vmem:[%s11612_s26 + $0x1a8] sm:$0xff] }
0x2278   : > { %8499 = vrsqrt.f32 %v5752_v37  ;;  %v6067_v37 = vld [vmem:[%s11612_s26 + $0x128] sm:$0xff] }
0x2285   : > { %v8500_v51 = vpop.eup %8499 }
0x2286   : > { %v5754_v53 = vmul.f32 %v8500_v51, %v11185_v38  ;;  %v6077_v38 = vld [vmem:[%s11612_s26 + $0x178] sm:$0xff] }
0x2287   : > { %v6033_v51 = vld [vmem:[%s11612_s26 + $0x18] sm:$0xff] }
0x2288   : > { %v5760_v55 = vmul.f32 %v5759_v52, %v5754_v53  ;;  %v6065_v52 = vld [vmem:[%s11612_s26 + $0x118] sm:$0xff]  ;;  %v6048_v53 = vld [vmem:[%s11612_s26 + $0x90] sm:$0xff] }
0x228a   : > { %v5765_v7 = vadd.f32 %v5764_v54, %v5760_v55  ;;  %v6080_v54 = vld [vmem:[%s11612_s26 + $0x190] sm:$0xff] }
0x228b   : > { %v6032_v55 = vld [vmem:[%s11612_s26 + $0x10] sm:$0xff] }
0x228c   : > { %5917 = vmatmul.mubr.f32.vlgmr.msra.gmra.mxu0 %v5765_v7  ;;  %5988 = vmatmul.mubr.f32.vlgmr.msra.gmra.mxu1 %v5765_v7  ;;  %v6064_v7 = vld [vmem:[%s11612_s26 + $0x110] sm:$0xff] }
0x228d   : > { %7266 = vmatpush3.msra.mxu0 %v6045_v25  ;;  %7301 = vmatpush3.msra.mxu1 %v6077_v38  ;;  %v6031_v25 = vld [vmem:[%s11612_s26 + $0x8] sm:$0xff] }
0x228e   : > { %7267 = vmatprep.subr.mxu0 %v6060_v24  ;;  %7302 = vmatprep.subr.mxu1 %v6092_v49  ;;  %v6063_v38 = vld [vmem:[%s11612_s26 + $0x108] sm:$0xff]  ;;  %v6046_v24 = vld [vmem:[%s11612_s26 + $0x80] sm:$0xff] }
0x228f   : > { %7268 = vmatpush3.msra.mxu0 %v6044_v59  ;;  %7303 = vmatpush3.msra.mxu1 %v6076_v61  ;;  %v6078_v49 = vld [vmem:[%s11612_s26 + $0x180] sm:$0xff] }
0x2290   : > { %7269 = vmatprep.subr.mxu0 %v6059_v62  ;;  %7304 = vmatprep.subr.mxu1 %v6091_v0  ;;  %v6030_v59 = vld [vmem:[%s11612_s26] sm:$0xff] }
0x2291   : > { %7270 = vmatpush3.msra.mxu0 %v6043_v1  ;;  %7305 = vmatpush3.msra.mxu1 %v6075_v63  ;;  %v6062_v61 = vld [vmem:[%s11612_s26 + $0x100] sm:$0xff] }
0x2292   : > { %7271 = vmatprep.subr.mxu0 %v6058_v2  ;;  %7306 = vmatprep.subr.mxu1 %v6090_v20  ;;  %v5830_v62 = vld [vmem:[%s11685_s7] sm:$0xf] }
0x2293   : > { %7272 = vmatpush3.msra.mxu0 %v6042_v44  ;;  %7307 = vmatpush3.msra.mxu1 %v6074_v3  ;;  %v5835_v0 = vrot.slane %v5830_v62, %v9313_v45  ;;  %v5843_v1 = vrot.slane %v5830_v62, %v1010_v43  ;;  %v5839_v63 = vrot.slane %v5830_v62, %v1006_v40 }
0x2294   : > { %7273 = vmatprep.subr.mxu0 %v6057_v34  ;;  %7308 = vmatprep.subr.mxu1 %v6089_v6  ;;  %v5847_v2 = vrot.slane %v5830_v62, %v1014_v5 }
0x2295   : > { %7274 = vmatpush3.msra.mxu0 %v6041_v8  ;;  %7309 = vmatpush3.msra.mxu1 %v6073_v9 }
0x2296   : > { %7275 = vmatprep.subr.mxu0 %v6056_v58  ;;  %7310 = vmatprep.subr.mxu1 %v6088_v4 }
0x2297   : > { %7276 = vmatpush3.msra.mxu0 %v6040_v10  ;;  %7311 = vmatpush3.msra.mxu1 %v6072_v28 }
0x2298   : > { %7277 = vmatprep.subr.mxu0 %v6055_v11  ;;  %7312 = vmatprep.subr.mxu1 %v6087_v12 }
0x2299   : > { %7278 = vmatpush3.msra.mxu0 %v6039_v32  ;;  %7313 = vmatpush3.msra.mxu1 %v6071_v60 }
0x229a   : > { %7279 = vmatprep.subr.mxu0 %v6054_v35  ;;  %7314 = vmatprep.subr.mxu1 %v6086_v56 }
0x229b   : > { %7280 = vmatpush3.msra.mxu0 %v6038_v13  ;;  %7315 = vmatpush3.msra.mxu1 %v6070_v14 }
0x229c   : > { %7281 = vmatprep.subr.mxu0 %v6053_v15  ;;  %7316 = vmatprep.subr.mxu1 %v6085_v46 }
0x229d   : > { %7282 = vmatpush3.msra.mxu0 %v6037_v16  ;;  %7317 = vmatpush3.msra.mxu1 %v6069_v18 }
0x229e   : > { %7283 = vmatprep.subr.mxu0 %v6052_v19  ;;  %7318 = vmatprep.subr.mxu1 %v6084_v21 }
0x229f   : > { %7284 = vmatpush3.msra.mxu0 %v6036_v22  ;;  %7319 = vmatpush3.msra.mxu1 %v6068_v23 }
0x22a0   : > { %7285 = vmatprep.subr.mxu0 %v6051_v27  ;;  %7320 = vmatprep.subr.mxu1 %v6083_v29 }
0x22a1   : > { %7286 = vmatpush3.msra.mxu0 %v6035_v30  ;;  %7321 = vmatpush3.msra.mxu1 %v6067_v37 }
0x22a2   : > { %7287 = vmatprep.subr.mxu0 %v6050_v39  ;;  %7322 = vmatprep.subr.mxu1 %v6082_v41 }
0x22a3   : > { %7288 = vmatpush3.msra.mxu0 %v6034_v42  ;;  %7323 = vmatpush3.msra.mxu1 %v6066_v47 }
0x22a4   : > { %7289 = vmatprep.subr.mxu0 %v6049_v48  ;;  %7324 = vmatprep.subr.mxu1 %v6081_v50 }
0x22a5   : > { %7290 = vmatpush3.msra.mxu0 %v6033_v51  ;;  %7325 = vmatpush3.msra.mxu1 %v6065_v52 }
0x22a6   : > { %7291 = vmatprep.subr.mxu0 %v6048_v53  ;;  %7326 = vmatprep.subr.mxu1 %v6080_v54 }
0x22a7   : > { %7292 = vmatpush3.msra.mxu0 %v6032_v55  ;;  %7327 = vmatpush3.msra.mxu1 %v6064_v7  ;;  %v1026_v55 = vsub.s32 6, %v9304_v36 }
0x22a8   : > { %7293 = vmatprep.subr.mxu0 %v6047_v26  ;;  %7328 = vmatprep.subr.mxu1 %v6079_v57 }
0x22a9   : > { %7294 = vmatpush3.msra.mxu0 %v6031_v25  ;;  %7329 = vmatpush3.msra.mxu1 %v6063_v38  ;;  %v1027_v7 = vrot.slane %v11121_v31, %v1026_v55  ;;  %v6746_v25 = vld [vmem:[%s11688_s30] ss:$0 sm:$0xff]  ;;  %s6260_s30 = scalar_lea.hbm %s11690_s8, %s6748_s25 }
0x22aa   : > { %7295 = vmatprep.subr.mxu0 %v6046_v24  ;;  %7330 = vmatprep.subr.mxu1 %v6078_v49 }
0x22ab   : > { %7296 = vmatpush3.msra.mxu0 %v6030_v59  ;;  %7331 = vmatpush3.msra.mxu1 %v6062_v61  ;;  %v1315_v24 = vadd.f32 %v9302_v33, %v1027_v7 }
0x22ad   : > { %v6244_v36 = vrot.slane %v1315_v24, %v9313_v45 }
0x234c   : > { %v5918_v20 = vpop.f32.mrf.mxu0  ;;  %v5989_v44 = vpop.f32.mrf.mxu1 }
0x234d   : > { %v5919_v3 = vadd.f32 %v5918_v20, %v5835_v0  ;;  %v5990_v34 = vadd.f32 %v5989_v44, %v5843_v1 }
0x234e   : > { %v5920_v6 = vpop.f32.mrf.mxu0  ;;  %v5991_v8 = vpop.f32.mrf.mxu1 }
0x234f   : > { %v5998_v9 = vmul.f32 0.044715, %v5919_v3  ;;  %v6000_v58 = vmul.f32 0.044715, %v5990_v34  ;;  %v5921_v4 = vadd.f32 %v5920_v6, %v5839_v63  ;;  %v5992_v10 = vadd.f32 %v5991_v8, %v5847_v2 }
0x2350   : > { %v5994_v48 = vmul.f32 0.5, %v5919_v3  ;;  %v5996_v51 = vmul.f32 0.5, %v5990_v34 }
0x2351   : > { %v6002_v28 = vmul.f32 %v5998_v9, %v5919_v3  ;;  %v6004_v11 = vmul.f32 %v6000_v58, %v5990_v34  ;;  %v5999_v12 = vmul.f32 0.044715, %v5921_v4  ;;  %v6001_v43 = vmul.f32 0.044715, %v5992_v10 }
0x2352   : > { %v5995_v37 = vmul.f32 0.5, %v5921_v4  ;;  %v5997_v42 = vmul.f32 0.5, %v5992_v10 }
0x2353   : > { %v6006_v32 = vmul.f32 %v6002_v28, %v5919_v3  ;;  %v6008_v60 = vmul.f32 %v6004_v11, %v5990_v34  ;;  %v6003_v40 = vmul.f32 %v5999_v12, %v5921_v4  ;;  %v6005_v35 = vmul.f32 %v6001_v43, %v5992_v10 }
0x2355   : > { %v6010_v56 = vadd.f32 %v6006_v32, %v5919_v3  ;;  %v6012_v5 = vadd.f32 %v6008_v60, %v5990_v34  ;;  %v6007_v13 = vmul.f32 %v6003_v40, %v5921_v4  ;;  %v6009_v14 = vmul.f32 %v6005_v35, %v5992_v10 }
0x2357   : > { %v6011_v15 = vadd.f32 %v6007_v13, %v5921_v4  ;;  %v6013_v46 = vadd.f32 %v6009_v14, %v5992_v10  ;;  %v6014_v16 = vmul.f32 0.7978846, %v6010_v56  ;;  %v6016_v18 = vmul.f32 0.7978846, %v6012_v5 }
0x2359   : > { %v6015_v19 = vmul.f32 0.7978846, %v6011_v15  ;;  %v6017_v21 = vmul.f32 0.7978846, %v6013_v46  ;;  %8501 = vtanh.f32 %v6014_v16 }
0x235a   : > { %8503 = vtanh.f32 %v6016_v18 }
0x235b   : > { %8505 = vtanh.f32 %v6015_v19 }
0x235c   : > { %8507 = vtanh.f32 %v6017_v21 }
0x2366   : > { %v8502_v22 = vpop.eup %8501 }
0x2367   : > { %v8504_v23 = vpop.eup %8503  ;;  %v6022_v29 = vadd.f32 1.0, %v8502_v22 }
0x2368   : > { %v8506_v27 = vpop.eup %8505  ;;  %v6024_v41 = vadd.f32 1.0, %v8504_v23 }
0x2369   : > { %v8508_v30 = vpop.eup %8507  ;;  %v6023_v39 = vadd.f32 1.0, %v8506_v27  ;;  %v6026_v53 = vmul.f32 %v6022_v29, %v5994_v48 }
0x236a   : > { %v6025_v47 = vadd.f32 1.0, %v8508_v30  ;;  %v6028_v54 = vmul.f32 %v6024_v41, %v5996_v51 }
0x236b   : > { %v6027_v50 = vmul.f32 %v6023_v39, %v5995_v37 }
0x236c   : > { %v6029_v52 = vmul.f32 %v6025_v47, %v5997_v42 }
0x236d   : > { %6165 = vmatprep.mubr.f32.mxu0 %v6027_v50 }
0x236e   : > { %6235 = vmatprep.mubr.f32.mxu1 %v6029_v52  ;;  %6166 = vmatmul.mubr.f32.vlgmr.msra.gmra.mxu0 %v6026_v53 }
0x236f   : > { %6236 = vmatmul.mubr.f32.vlgmr.msra.gmra.mxu1 %v6028_v54 }
0x242e   : > { %v7297_v26 = vpop.f32.mrf.mxu0 }
0x242f   : > { %v7332_v57 = vpop.f32.mrf.mxu1 }
0x2430   : > { %v7298_v38 = vpop.f32.mrf.mxu0 }
0x2431   : > { %v7299_v49 = vadd.f32 %v7298_v38, %v7297_v26  ;;  %v7333_v59 = vpop.f32.mrf.mxu1 }
0x2432   : > { %v7334_v62 = vadd.f32 %v7333_v59, %v7332_v57 }
0x2433   : > { %v6168_v61 = vadd.f32 %v7299_v49, %v6746_v25 }
0x2435   : > { %v6238_v0 = vadd.f32 %v7334_v62, %v6168_v61 }
0x2437   : > { %v6245_v31 = vmul.f32 %v6244_v36, %v6238_v0 }
0x2439   : > { %v6246_v1 = vadd.f32 %v6245_v31, %v11133_v17 }
0x243b   : > { %6247 = vst [vmem:[%s862_s4] sm:$0xff] %v6246_v1 }
0x243c   : > { %8529 = shalt.err (!%p8526_p3)
}
0x243d   : > { %s8530_s5 = scalar_lea.hbm %s6260_s30, 128  ;;  %s8534_s4 = scalar_lea.hbm %s11691_s28, 256 }
0x243e   : > { %p8531_p4 = scmp.ne.s32.totalorder %s6260_s30, %s8530_s5  ;;  %p8535_p9 = scmp.lt.s32.totalorder %s6260_s30, %s11691_s28 }
0x243f   : > { %p8536_p10 = scmp.lt.s32.totalorder %s8534_s4, %s8530_s5 }
0x2440   : > { %p8532_p7 = pnand %p8531_p4, %p8764_p5 }
0x2441   : > { %p8537_p11 = por %p8536_p10, %p8535_p9 }
0x2442   : > { %p8533_p8 = pneg %p8532_p7 }
0x2444   : > { %p8538_p12 = pnand %p8537_p11, %p8533_p8 }
0x2446   : > { %8541 = shalt.err (!%p8538_p12)
}
0x2447   : > { %8394 = dma.vmem_to_hbm [thread:$0]  (%p8764_p5), %s6263_s29, 128, %s6260_s30, %s6249_s2  }
0x2448 PF: > { %s11692_s10 = sld [smem:[#allocation8_spill]] }
0x2449   : > { %s11693_s11 = sld [smem:[#allocation5_spill]] }
0x244e   : > { %p8400_p13 = scmp.ge.s32.totalorder %s11692_s10, 2 }
0x244f   : > { %s6274_s8 = sand.u32 1, %s11693_s11  }
0x2450   : > { %p8397_p0 = pnand %p8400_p13, %p8768_p6  ;;  %s6275_s0 = scalar_lea.sflag [#allocation3], %s6274_s8 }
0x2452   : > { %p8398_p1 = pneg %p8397_p0 }
0x2454   : > { %8559 = dma.done.wait (%p8398_p1), %s6275_s0, 128  }
0x2455   : > { %8561 = vsyncadd (%p8398_p1), %s6275_s0, 4294967168  ;;  %s11695_s30 = sld [smem:[#allocation10_spill]] }
0x2456   : > { %s11696_s8 = sld [smem:[#allocation6_spill]] }
0x2457   : > { %s11697_s5 = sld [smem:[#allocation7_spill]] }
0x2458   : > { %s11698_s9 = sld [smem:[#allocation11_spill]] }
0x245b   : > { %p38_p2 = scmp.ge.s32.totalorder %s11695_s30, 4  }
0x245d   :  { %40 = sbr.rel (!%p38_p2) target bundleno = 20 (0x14), region = 215 }
0x2462   :  { %6280 = vsyncpa [#allocation3], 1 }
0x2463   :  { %6282 = vsyncpa [#allocation3 + $0x1], 1 }

</bundles_post_ra>
